<compile_context>
chip_gen: v5e
topology: v5e:2x2
jax: 0.10.0
libtpu: 0.0.40
codegen_flags: <defaults>
</compile_context>

<pallas_src>
import numpy as np
import jax
import jax.numpy as jnp
from jax.experimental import pallas as pl
from jax.experimental.pallas import tpu as pltpu


# --------------------------------------------------------------------------------------
# Fused kernel
# --------------------------------------------------------------------------------------
def _make_convblock_kernel(D, H, W, Cin, Cout):
    WCin, WCout = W * Cin, W * Cout

    def kernel(x_ref, w1_ref, s1_ref, b1_ref, w2_ref, s2_ref, b2_ref,
               o_ref, xp1_ref, xp2_ref, acc_ref):
        """One batch element per grid step.

          x_ref  : (D, H, W*Cin)   bf16   input tile (NDHWC with W,C folded into lanes)
          w*_ref : (9, W*Cin_l, W*Cout)   bf16 block-Toeplitz-over-W conv weights
          s*/b*  : (1, W*Cout)     f32    fused BN scale / bias (conv bias folded in)
          o_ref  : (D, H, W*Cout)  f32
          xp1/xp2: (D+2, H+2, W*C) f32    zero-bordered halo scratches (D/H padding)
          acc_ref: (D*H, W*Cout)   f32    MXU accumulator scratch
        """

        def conv_bn_lrelu(xpad_ref, cin, w_ref, s_ref, b_ref):
            # 3x3x3 conv: W taps + W zero-padding are folded into the Toeplitz weights,
            # D/H taps come from sublane-shifted slices of the zero-bordered scratch.
            acc_ref[...] = jnp.zeros_like(acc_ref)
            for kd in range(3):
                for kh in range(3):
                    lhs = xpad_ref[kd:kd + D, kh:kh + H, :]        # (D, H, W*cin)
                    lhs = lhs.reshape(D * H, W * cin)              # collapse leading dims
                    acc_ref[...] += jnp.dot(lhs.astype(jnp.bfloat16),
                                            w_ref[kd * 3 + kh],
                                            preferred_element_type=jnp.float32)
            y = acc_ref[...] * s_ref[...] + b_ref[...]             # BN(eval) + conv bias, folded
            return jnp.where(y > 0, y, 0.01 * y)                   # LeakyReLU, slope 0.01

        # ---- layer 1: fill halo scratch (border stays zero = spatial padding) ----------
        xp1_ref[...] = jnp.zeros_like(xp1_ref)
        xp1_ref[1:D + 1, 1:H + 1, :] = x_ref[...].astype(jnp.float32)
        h = conv_bn_lrelu(xp1_ref, Cin, w1_ref, s1_ref, b1_ref)    # (D*H, W*Cout) f32

        # nn.Dropout is identity in eval mode (inference semantics).

        # ---- layer 2: intermediate never leaves VMEM ------------------------------------
        xp2_ref[...] = jnp.zeros_like(xp2_ref)
        xp2_ref[1:D + 1, 1:H + 1, :] = h.reshape(D, H, WCout)
        y = conv_bn_lrelu(xp2_ref, Cout, w2_ref, s2_ref, b2_ref)   # (D*H, W*Cout) f32

        o_ref[...] = y.reshape(D, H, WCout)                        # lane-dense store (W*Cout)

    return kernel


def conv_block_forward(x_ncdhw, packed):
    """Pallas ConvBlock forward. Input/output are PyTorch-style NCDHW."""
    N, Cin, D, H, W = x_ncdhw.shape
    Cout = packed["s1"].shape[-1] // W
    WCin, WCout = W * Cin, W * Cout

    # NCDHW -> NDHWC, fold (W, C) into the lane dim; bf16 halves the HBM read.
    x = jnp.transpose(x_ncdhw.astype(jnp.bfloat16), (0, 2, 3, 4, 1)).reshape(N, D, H, WCin)

    kernel = _make_convblock_kernel(D, H, W, Cin, Cout)
    out = pl.pallas_call(
        kernel,
        out_shape=jax.ShapeDtypeStruct((N, D, H, WCout), jnp.float32),
        grid_spec=pltpu.PrefetchScalarGridSpec(
            num_scalar_prefetch=0,
            grid=(N,),
            in_specs=[
                pl.BlockSpec((pl.Squeezed(), D, H, WCin), lambda n: (n, 0, 0, 0)),
                pl.BlockSpec((9, WCin, WCout), lambda n: (0, 0, 0)),
                pl.BlockSpec((1, WCout), lambda n: (0, 0)),
                pl.BlockSpec((1, WCout), lambda n: (0, 0)),
                pl.BlockSpec((9, WCout, WCout), lambda n: (0, 0, 0)),
                pl.BlockSpec((1, WCout), lambda n: (0, 0)),
                pl.BlockSpec((1, WCout), lambda n: (0, 0)),
            ],
            out_specs=pl.BlockSpec((pl.Squeezed(), D, H, WCout), lambda n: (n, 0, 0, 0)),
            scratch_shapes=[
                pltpu.VMEM((D + 2, H + 2, WCin), jnp.float32),    # layer-1 halo scratch
                pltpu.VMEM((D + 2, H + 2, WCout), jnp.float32),   # layer-2 halo scratch (VMEM-resident intermediate)
                pltpu.VMEM((D * H, WCout), jnp.float32),          # f32 accumulator
            ],
        ),
        compiler_params=pltpu.CompilerParams(dimension_semantics=("parallel",)),
    )(x, packed["w1"], packed["s1"], packed["b1"],
      packed["w2"], packed["s2"], packed["b2"])

    # (N, D, H, W*Cout) is NDHWC flattened; back to PyTorch NCDHW.
    return jnp.transpose(out.reshape(N, D, H, W, Cout), (0, 4, 1, 2, 3))


# --------------------------------------------------------------------------------------
# One-time parameter packing (weights -> block-Toeplitz over W, BN folded)
# --------------------------------------------------------------------------------------
def _toeplitz_w(w_oidhw, W):
    """PyTorch (Cout, Cin, 3, 3, 3) conv weight -> (9, W*Cin, W*Cout) bf16.

    For each (kd, kh) pair, a block-Toeplitz matrix over W folds the three kw taps AND the
    zero padding along W into one MXU matmul with K = W*Cin, N = W*Cout.
    """
    w = np.asarray(w_oidhw, np.float32)
    Cout, Cin = w.shape[0], w.shape[1]
    T = np.zeros((9, W * Cin, W * Cout), np.float32)
    for kd in range(3):
        for kh in range(3):
            for kw in range(3):
                blk = w[:, :, kd, kh, kw].T                       # (Cin, Cout)
                for wo in range(W):
                    wi = wo + kw - 1
                    if 0 <= wi < W:
                        T[kd * 3 + kh,
                          wi * Cin:(wi + 1) * Cin,
                          wo * Cout:(wo + 1) * Cout] = blk
    return jnp.asarray(T, jnp.bfloat16)


def _fuse_bn(conv_bias, gamma, beta, mean, var, W, eps=1e-5):
    scale = np.asarray(gamma) / np.sqrt(np.asarray(var) + eps)
    bias = (np.asarray(conv_bias) - np.asarray(mean)) * scale + np.asarray(beta)
    # lane index is w*Cout + c -> tile per-channel params W times
    s = np.tile(scale, W)[None, :]
    b = np.tile(bias, W)[None, :]
    return jnp.asarray(s, jnp.float32), jnp.asarray(b, jnp.float32)


def pack_params(p, W):
    s1, b1 = _fuse_bn(p["b1"], p["g1"], p["be1"], p["m1"], p["v1"], W)
    s2, b2 = _fuse_bn(p["b2"], p["g2"], p["be2"], p["m2"], p["v2"], W)
    return {"w1": _toeplitz_w(p["w1"], W), "s1": s1, "b1": b1,
            "w2": _toeplitz_w(p["w2"], W), "s2": s2, "b2": b2}


# --------------------------------------------------------------------------------------
# Params / pure-JAX reference (PyTorch eval-mode semantics)
# --------------------------------------------------------------------------------------
def init_params(key, cin, cout):
    ks = jax.random.split(key, 12)
    f32 = jnp.float32
    return {
        "w1": 0.1 * jax.random.normal(ks[0], (cout, cin, 3, 3, 3), f32),
        "b1": 0.1 * jax.random.normal(ks[1], (cout,), f32),
        "g1": 1.0 + 0.1 * jax.random.normal(ks[2], (cout,), f32),
        "be1": 0.1 * jax.random.normal(ks[3], (cout,), f32),
        "m1": 0.05 * jax.random.normal(ks[4], (cout,), f32),
        "v1": 1.0 + 0.1 * jax.random.uniform(ks[5], (cout,), f32),
        "w2": 0.1 * jax.random.normal(ks[6], (cout, cout, 3, 3, 3), f32),
        "b2": 0.1 * jax.random.normal(ks[7], (cout,), f32),
        "g2": 1.0 + 0.1 * jax.random.normal(ks[8], (cout,), f32),
        "be2": 0.1 * jax.random.normal(ks[9], (cout,), f32),
        "m2": 0.05 * jax.random.normal(ks[10], (cout,), f32),
        "v2": 1.0 + 0.1 * jax.random.uniform(ks[11], (cout,), f32),
    }


def conv_block_reference(x_ncdhw, p):
    def conv(x, w, b):
        y = jax.lax.conv_general_dilated(
            x, w, window_strides=(1, 1, 1),
            padding=((1, 1), (1, 1), (1, 1)),
            dimension_numbers=("NCDHW", "OIDHW", "NCDHW"))
        return y + b[None, :, None, None, None]

    def bn(x, g, be, m, v, eps=1e-5):
        g, be, m, v = (a[None, :, None, None, None] for a in (g, be, m, v))
        return (x - m) / jnp.sqrt(v + eps) * g + be

    lrelu = lambda t: jnp.where(t > 0, t, 0.01 * t)
    h = lrelu(bn(conv(x_ncdhw, p["w1"], p["b1"]), p["g1"], p["be1"], p["m1"], p["v1"]))
    h = lrelu(bn(conv(h,       p["w2"], p["b2"]), p["g2"], p["be2"], p["m2"], p["v2"]))
    return h


if __name__ == "__main__":
    key = jax.random.PRNGKey(0)
    kx, kp = jax.random.split(key)

    N, Cin, Cout, D, H, W = 2, 4, 8, 16, 16, 16
    dropout_p = 0.3  # unused in eval mode

    x = jax.random.normal(kx, (N, Cin, D, H, W), jnp.float32)   # PyTorch NCDHW input
    params = init_params(kp, Cin, Cout)
    packed = pack_params(params, W)

    fwd = jax.jit(conv_block_forward)
    out = jax.block_until_ready(fwd(x, packed))
    ref = jax.block_until_ready(conv_block_reference(x, params))

    assert out.shape == (N, Cout, D, H, W), out.shape
    # bf16 matmul operands with f32 accumulation -> loosened tolerance vs. pure-f32 reference.
    np.testing.assert_allclose(np.asarray(out), np.asarray(ref), atol=5e-2, rtol=5e-2)
    print("KERNEL_OK")
</pallas_src>

<mosaic_0001>
module attributes {stable_mosaic.version = 11 : i64} {
  func.func @kernel(%arg0: i32, %arg1: memref<1x16x16x64xbf16, #tpu.memory_space<vmem>>, %arg2: memref<9x64x128xbf16, #tpu.memory_space<vmem>>, %arg3: memref<1x128xf32, #tpu.memory_space<vmem>>, %arg4: memref<1x128xf32, #tpu.memory_space<vmem>>, %arg5: memref<9x128x128xbf16, #tpu.memory_space<vmem>>, %arg6: memref<1x128xf32, #tpu.memory_space<vmem>>, %arg7: memref<1x128xf32, #tpu.memory_space<vmem>>, %arg8: memref<1x16x16x128xf32, #tpu.memory_space<vmem>>, %arg9: memref<18x18x64xf32, #tpu.memory_space<vmem>>, %arg10: memref<18x18x128xf32, #tpu.memory_space<vmem>>, %arg11: memref<256x128xf32, #tpu.memory_space<vmem>>) attributes {dimension_semantics = [#tpu.dimension_semantics<parallel>], iteration_bounds = array<i64: 2>, scalar_prefetch = 0 : i64, scratch_operands = 3 : i64, tpu.core_type = #tpu.core_type<tc>, window_params = [{transform_indices = @transform_0, window_bounds = array<i64: 1, 16, 16, 64>}, {pipeline_mode = #tpu.pipeline_mode<synchronous>, transform_indices = @transform_1, window_bounds = array<i64: 9, 64, 128>}, {pipeline_mode = #tpu.pipeline_mode<synchronous>, transform_indices = @transform_2, window_bounds = array<i64: 1, 128>}, {pipeline_mode = #tpu.pipeline_mode<synchronous>, transform_indices = @transform_3, window_bounds = array<i64: 1, 128>}, {pipeline_mode = #tpu.pipeline_mode<synchronous>, transform_indices = @transform_4, window_bounds = array<i64: 9, 128, 128>}, {pipeline_mode = #tpu.pipeline_mode<synchronous>, transform_indices = @transform_5, window_bounds = array<i64: 1, 128>}, {pipeline_mode = #tpu.pipeline_mode<synchronous>, transform_indices = @transform_6, window_bounds = array<i64: 1, 128>}, {transform_indices = @transform_7, window_bounds = array<i64: 1, 16, 16, 128>}]} {
    %cst = arith.constant 0.000000e+00 : f32
    %0 = vector.broadcast %cst : f32 to vector<18x18x64xf32>
    %c0 = arith.constant 0 : index
    %c0_0 = arith.constant 0 : index
    %c0_1 = arith.constant 0 : index
    %1 = vector.load %arg9[%c0, %c0_0, %c0_1] : memref<18x18x64xf32, #tpu.memory_space<vmem>>, vector<18x18x64xf32>
    tpu.vector_store %arg9[%c0, %c0_0, %c0_1], %0 {strides = array<i32>} : memref<18x18x64xf32, #tpu.memory_space<vmem>>, vector<18x18x64xf32>,
    %c0_2 = arith.constant 0 : index
    %c0_3 = arith.constant 0 : index
    %c0_4 = arith.constant 0 : index
    %c0_5 = arith.constant 0 : index
    %2 = vector.load %arg1[%c0_2, %c0_3, %c0_4, %c0_5] : memref<1x16x16x64xbf16, #tpu.memory_space<vmem>>, vector<1x16x16x64xbf16>
    %3 = vector.shape_cast %2 : vector<1x16x16x64xbf16> to vector<16x16x64xbf16>
    %4 = arith.extf %3 : vector<16x16x64xbf16> to vector<16x16x64xf32>
    %c1 = arith.constant 1 : index
    %c1_6 = arith.constant 1 : index
    %c0_7 = arith.constant 0 : index
    %5 = vector.load %arg9[%c1, %c1_6, %c0_7] : memref<18x18x64xf32, #tpu.memory_space<vmem>>, vector<16x16x64xf32>
    tpu.vector_store %arg9[%c1, %c1_6, %c0_7], %4 {strides = array<i32>} : memref<18x18x64xf32, #tpu.memory_space<vmem>>, vector<16x16x64xf32>,
    %cst_8 = arith.constant 0.000000e+00 : f32
    %6 = vector.broadcast %cst_8 : f32 to vector<256x128xf32>
    %c0_9 = arith.constant 0 : index
    %c0_10 = arith.constant 0 : index
    %7 = vector.load %arg11[%c0_9, %c0_10] : memref<256x128xf32, #tpu.memory_space<vmem>>, vector<256x128xf32>
    tpu.vector_store %arg11[%c0_9, %c0_10], %6 {strides = array<i32>} : memref<256x128xf32, #tpu.memory_space<vmem>>, vector<256x128xf32>,
    %c0_11 = arith.constant 0 : index
    %c0_12 = arith.constant 0 : index
    %c0_13 = arith.constant 0 : index
    %8 = vector.load %arg9[%c0_11, %c0_12, %c0_13] : memref<18x18x64xf32, #tpu.memory_space<vmem>>, vector<16x16x64xf32>
    %9 = vector.shape_cast %8 : vector<16x16x64xf32> to vector<256x64xf32>
    %c0_14 = arith.constant 0 : index
    %c0_15 = arith.constant 0 : index
    %10 = vector.load %arg11[%c0_14, %c0_15] : memref<256x128xf32, #tpu.memory_space<vmem>>, vector<256x128xf32>
    %11 = arith.truncf %9 : vector<256x64xf32> to vector<256x64xbf16>
    %c0_16 = arith.constant 0 : index
    %c0_17 = arith.constant 0 : index
    %c0_18 = arith.constant 0 : index
    %12 = vector.load %arg2[%c0_16, %c0_17, %c0_18] : memref<9x64x128xbf16, #tpu.memory_space<vmem>>, vector<1x64x128xbf16>
    %13 = vector.shape_cast %12 : vector<1x64x128xbf16> to vector<64x128xbf16>
    %cst_19 = arith.constant dense<0.000000e+00> : vector<256x128xf32>
    %14 = tpu.matmul %11, %13, %cst_19 {dimension_numbers = #tpu.dot_dimension_numbers<[1], [0], [0], [1], [0, 0, 1, 1], [], []>} : vector<256x64xbf16>, vector<64x128xbf16>, vector<256x128xf32> -> vector<256x128xf32>
    %15 = arith.addf %10, %14 : vector<256x128xf32>
    %c0_20 = arith.constant 0 : index
    %c0_21 = arith.constant 0 : index
    %16 = vector.load %arg11[%c0_20, %c0_21] : memref<256x128xf32, #tpu.memory_space<vmem>>, vector<256x128xf32>
    tpu.vector_store %arg11[%c0_20, %c0_21], %15 {strides = array<i32>} : memref<256x128xf32, #tpu.memory_space<vmem>>, vector<256x128xf32>,
    %c0_22 = arith.constant 0 : index
    %c1_23 = arith.constant 1 : index
    %c0_24 = arith.constant 0 : index
    %17 = vector.load %arg9[%c0_22, %c1_23, %c0_24] : memref<18x18x64xf32, #tpu.memory_space<vmem>>, vector<16x16x64xf32>
    %18 = vector.shape_cast %17 : vector<16x16x64xf32> to vector<256x64xf32>
    %c0_25 = arith.constant 0 : index
    %c0_26 = arith.constant 0 : index
    %19 = vector.load %arg11[%c0_25, %c0_26] : memref<256x128xf32, #tpu.memory_space<vmem>>, vector<256x128xf32>
    %20 = arith.truncf %18 : vector<256x64xf32> to vector<256x64xbf16>
    %c1_27 = arith.constant 1 : index
    %c0_28 = arith.constant 0 : index
    %c0_29 = arith.constant 0 : index
    %21 = vector.load %arg2[%c1_27, %c0_28, %c0_29] : memref<9x64x128xbf16, #tpu.memory_space<vmem>>, vector<1x64x128xbf16>
    %22 = vector.shape_cast %21 : vector<1x64x128xbf16> to vector<64x128xbf16>
    %cst_30 = arith.constant dense<0.000000e+00> : vector<256x128xf32>
    %23 = tpu.matmul %20, %22, %cst_30 {dimension_numbers = #tpu.dot_dimension_numbers<[1], [0], [0], [1], [0, 0, 1, 1], [], []>} : vector<256x64xbf16>, vector<64x128xbf16>, vector<256x128xf32> -> vector<256x128xf32>
    %24 = arith.addf %19, %23 : vector<256x128xf32>
    %c0_31 = arith.constant 0 : index
    %c0_32 = arith.constant 0 : index
    %25 = vector.load %arg11[%c0_31, %c0_32] : memref<256x128xf32, #tpu.memory_space<vmem>>, vector<256x128xf32>
    tpu.vector_store %arg11[%c0_31, %c0_32], %24 {strides = array<i32>} : memref<256x128xf32, #tpu.memory_space<vmem>>, vector<256x128xf32>,
    %c0_33 = arith.constant 0 : index
    %c2 = arith.constant 2 : index
    %c0_34 = arith.constant 0 : index
    %26 = vector.load %arg9[%c0_33, %c2, %c0_34] : memref<18x18x64xf32, #tpu.memory_space<vmem>>, vector<16x16x64xf32>
    %27 = vector.shape_cast %26 : vector<16x16x64xf32> to vector<256x64xf32>
    %c0_35 = arith.constant 0 : index
    %c0_36 = arith.constant 0 : index
    %28 = vector.load %arg11[%c0_35, %c0_36] : memref<256x128xf32, #tpu.memory_space<vmem>>, vector<256x128xf32>
    %29 = arith.truncf %27 : vector<256x64xf32> to vector<256x64xbf16>
    %c2_37 = arith.constant 2 : index
    %c0_38 = arith.constant 0 : index
    %c0_39 = arith.constant 0 : index
    %30 = vector.load %arg2[%c2_37, %c0_38, %c0_39] : memref<9x64x128xbf16, #tpu.memory_space<vmem>>, vector<1x64x128xbf16>
    %31 = vector.shape_cast %30 : vector<1x64x128xbf16> to vector<64x128xbf16>
    %cst_40 = arith.constant dense<0.000000e+00> : vector<256x128xf32>
    %32 = tpu.matmul %29, %31, %cst_40 {dimension_numbers = #tpu.dot_dimension_numbers<[1], [0], [0], [1], [0, 0, 1, 1], [], []>} : vector<256x64xbf16>, vector<64x128xbf16>, vector<256x128xf32> -> vector<256x128xf32>
    %33 = arith.addf %28, %32 : vector<256x128xf32>
    %c0_41 = arith.constant 0 : index
    %c0_42 = arith.constant 0 : index
    %34 = vector.load %arg11[%c0_41, %c0_42] : memref<256x128xf32, #tpu.memory_space<vmem>>, vector<256x128xf32>
    tpu.vector_store %arg11[%c0_41, %c0_42], %33 {strides = array<i32>} : memref<256x128xf32, #tpu.memory_space<vmem>>, vector<256x128xf32>,
    %c1_43 = arith.constant 1 : index
    %c0_44 = arith.constant 0 : index
    %c0_45 = arith.constant 0 : index
    %35 = vector.load %arg9[%c1_43, %c0_44, %c0_45] : memref<18x18x64xf32, #tpu.memory_space<vmem>>, vector<16x16x64xf32>
    %36 = vector.shape_cast %35 : vector<16x16x64xf32> to vector<256x64xf32>
    %c0_46 = arith.constant 0 : index
    %c0_47 = arith.constant 0 : index
    %37 = vector.load %arg11[%c0_46, %c0_47] : memref<256x128xf32, #tpu.memory_space<vmem>>, vector<256x128xf32>
    %38 = arith.truncf %36 : vector<256x64xf32> to vector<256x64xbf16>
    %c3 = arith.constant 3 : index
    %c0_48 = arith.constant 0 : index
    %c0_49 = arith.constant 0 : index
    %39 = vector.load %arg2[%c3, %c0_48, %c0_49] : memref<9x64x128xbf16, #tpu.memory_space<vmem>>, vector<1x64x128xbf16>
    %40 = vector.shape_cast %39 : vector<1x64x128xbf16> to vector<64x128xbf16>
    %cst_50 = arith.constant dense<0.000000e+00> : vector<256x128xf32>
    %41 = tpu.matmul %38, %40, %cst_50 {dimension_numbers = #tpu.dot_dimension_numbers<[1], [0], [0], [1], [0, 0, 1, 1], [], []>} : vector<256x64xbf16>, vector<64x128xbf16>, vector<256x128xf32> -> vector<256x128xf32>
    %42 = arith.addf %37, %41 : vector<256x128xf32>
    %c0_51 = arith.constant 0 : index
    %c0_52 = arith.constant 0 : index
    %43 = vector.load %arg11[%c0_51, %c0_52] : memref<256x128xf32, #tpu.memory_space<vmem>>, vector<256x128xf32>
    tpu.vector_store %arg11[%c0_51, %c0_52], %42 {strides = array<i32>} : memref<256x128xf32, #tpu.memory_space<vmem>>, vector<256x128xf32>,
    %c1_53 = arith.constant 1 : index
    %c1_54 = arith.constant 1 : index
    %c0_55 = arith.constant 0 : index
    %44 = vector.load %arg9[%c1_53, %c1_54, %c0_55] : memref<18x18x64xf32, #tpu.memory_space<vmem>>, vector<16x16x64xf32>
    %45 = vector.shape_cast %44 : vector<16x16x64xf32> to vector<256x64xf32>
    %c0_56 = arith.constant 0 : index
    %c0_57 = arith.constant 0 : index
    %46 = vector.load %arg11[%c0_56, %c0_57] : memref<256x128xf32, #tpu.memory_space<vmem>>, vector<256x128xf32>
    %47 = arith.truncf %45 : vector<256x64xf32> to vector<256x64xbf16>
    %c4 = arith.constant 4 : index
    %c0_58 = arith.constant 0 : index
    %c0_59 = arith.constant 0 : index
    %48 = vector.load %arg2[%c4, %c0_58, %c0_59] : memref<9x64x128xbf16, #tpu.memory_space<vmem>>, vector<1x64x128xbf16>
    %49 = vector.shape_cast %48 : vector<1x64x128xbf16> to vector<64x128xbf16>
    %cst_60 = arith.constant dense<0.000000e+00> : vector<256x128xf32>
    %50 = tpu.matmul %47, %49, %cst_60 {dimension_numbers = #tpu.dot_dimension_numbers<[1], [0], [0], [1], [0, 0, 1, 1], [], []>} : vector<256x64xbf16>, vector<64x128xbf16>, vector<256x128xf32> -> vector<256x128xf32>
    %51 = arith.addf %46, %50 : vector<256x128xf32>
    %c0_61 = arith.constant 0 : index
    %c0_62 = arith.constant 0 : index
    %52 = vector.load %arg11[%c0_61, %c0_62] : memref<256x128xf32, #tpu.memory_space<vmem>>, vector<256x128xf32>
    tpu.vector_store %arg11[%c0_61, %c0_62], %51 {strides = array<i32>} : memref<256x128xf32, #tpu.memory_space<vmem>>, vector<256x128xf32>,
    %c1_63 = arith.constant 1 : index
    %c2_64 = arith.constant 2 : index
    %c0_65 = arith.constant 0 : index
    %53 = vector.load %arg9[%c1_63, %c2_64, %c0_65] : memref<18x18x64xf32, #tpu.memory_space<vmem>>, vector<16x16x64xf32>
    %54 = vector.shape_cast %53 : vector<16x16x64xf32> to vector<256x64xf32>
    %c0_66 = arith.constant 0 : index
    %c0_67 = arith.constant 0 : index
    %55 = vector.load %arg11[%c0_66, %c0_67] : memref<256x128xf32, #tpu.memory_space<vmem>>, vector<256x128xf32>
    %56 = arith.truncf %54 : vector<256x64xf32> to vector<256x64xbf16>
    %c5 = arith.constant 5 : index
    %c0_68 = arith.constant 0 : index
    %c0_69 = arith.constant 0 : index
    %57 = vector.load %arg2[%c5, %c0_68, %c0_69] : memref<9x64x128xbf16, #tpu.memory_space<vmem>>, vector<1x64x128xbf16>
    %58 = vector.shape_cast %57 : vector<1x64x128xbf16> to vector<64x128xbf16>
    %cst_70 = arith.constant dense<0.000000e+00> : vector<256x128xf32>
    %59 = tpu.matmul %56, %58, %cst_70 {dimension_numbers = #tpu.dot_dimension_numbers<[1], [0], [0], [1], [0, 0, 1, 1], [], []>} : vector<256x64xbf16>, vector<64x128xbf16>, vector<256x128xf32> -> vector<256x128xf32>
    %60 = arith.addf %55, %59 : vector<256x128xf32>
    %c0_71 = arith.constant 0 : index
    %c0_72 = arith.constant 0 : index
    %61 = vector.load %arg11[%c0_71, %c0_72] : memref<256x128xf32, #tpu.memory_space<vmem>>, vector<256x128xf32>
    tpu.vector_store %arg11[%c0_71, %c0_72], %60 {strides = array<i32>} : memref<256x128xf32, #tpu.memory_space<vmem>>, vector<256x128xf32>,
    %c2_73 = arith.constant 2 : index
    %c0_74 = arith.constant 0 : index
    %c0_75 = arith.constant 0 : index
    %62 = vector.load %arg9[%c2_73, %c0_74, %c0_75] : memref<18x18x64xf32, #tpu.memory_space<vmem>>, vector<16x16x64xf32>
    %63 = vector.shape_cast %62 : vector<16x16x64xf32> to vector<256x64xf32>
    %c0_76 = arith.constant 0 : index
    %c0_77 = arith.constant 0 : index
    %64 = vector.load %arg11[%c0_76, %c0_77] : memref<256x128xf32, #tpu.memory_space<vmem>>, vector<256x128xf32>
    %65 = arith.truncf %63 : vector<256x64xf32> to vector<256x64xbf16>
    %c6 = arith.constant 6 : index
    %c0_78 = arith.constant 0 : index
    %c0_79 = arith.constant 0 : index
    %66 = vector.load %arg2[%c6, %c0_78, %c0_79] : memref<9x64x128xbf16, #tpu.memory_space<vmem>>, vector<1x64x128xbf16>
    %67 = vector.shape_cast %66 : vector<1x64x128xbf16> to vector<64x128xbf16>
    %cst_80 = arith.constant dense<0.000000e+00> : vector<256x128xf32>
    %68 = tpu.matmul %65, %67, %cst_80 {dimension_numbers = #tpu.dot_dimension_numbers<[1], [0], [0], [1], [0, 0, 1, 1], [], []>} : vector<256x64xbf16>, vector<64x128xbf16>, vector<256x128xf32> -> vector<256x128xf32>
    %69 = arith.addf %64, %68 : vector<256x128xf32>
    %c0_81 = arith.constant 0 : index
    %c0_82 = arith.constant 0 : index
    %70 = vector.load %arg11[%c0_81, %c0_82] : memref<256x128xf32, #tpu.memory_space<vmem>>, vector<256x128xf32>
    tpu.vector_store %arg11[%c0_81, %c0_82], %69 {strides = array<i32>} : memref<256x128xf32, #tpu.memory_space<vmem>>, vector<256x128xf32>,
    %c2_83 = arith.constant 2 : index
    %c1_84 = arith.constant 1 : index
    %c0_85 = arith.constant 0 : index
    %71 = vector.load %arg9[%c2_83, %c1_84, %c0_85] : memref<18x18x64xf32, #tpu.memory_space<vmem>>, vector<16x16x64xf32>
    %72 = vector.shape_cast %71 : vector<16x16x64xf32> to vector<256x64xf32>
    %c0_86 = arith.constant 0 : index
    %c0_87 = arith.constant 0 : index
    %73 = vector.load %arg11[%c0_86, %c0_87] : memref<256x128xf32, #tpu.memory_space<vmem>>, vector<256x128xf32>
    %74 = arith.truncf %72 : vector<256x64xf32> to vector<256x64xbf16>
    %c7 = arith.constant 7 : index
    %c0_88 = arith.constant 0 : index
    %c0_89 = arith.constant 0 : index
    %75 = vector.load %arg2[%c7, %c0_88, %c0_89] : memref<9x64x128xbf16, #tpu.memory_space<vmem>>, vector<1x64x128xbf16>
    %76 = vector.shape_cast %75 : vector<1x64x128xbf16> to vector<64x128xbf16>
    %cst_90 = arith.constant dense<0.000000e+00> : vector<256x128xf32>
    %77 = tpu.matmul %74, %76, %cst_90 {dimension_numbers = #tpu.dot_dimension_numbers<[1], [0], [0], [1], [0, 0, 1, 1], [], []>} : vector<256x64xbf16>, vector<64x128xbf16>, vector<256x128xf32> -> vector<256x128xf32>
    %78 = arith.addf %73, %77 : vector<256x128xf32>
    %c0_91 = arith.constant 0 : index
    %c0_92 = arith.constant 0 : index
    %79 = vector.load %arg11[%c0_91, %c0_92] : memref<256x128xf32, #tpu.memory_space<vmem>>, vector<256x128xf32>
    tpu.vector_store %arg11[%c0_91, %c0_92], %78 {strides = array<i32>} : memref<256x128xf32, #tpu.memory_space<vmem>>, vector<256x128xf32>,
    %c2_93 = arith.constant 2 : index
    %c2_94 = arith.constant 2 : index
    %c0_95 = arith.constant 0 : index
    %80 = vector.load %arg9[%c2_93, %c2_94, %c0_95] : memref<18x18x64xf32, #tpu.memory_space<vmem>>, vector<16x16x64xf32>
    %81 = vector.shape_cast %80 : vector<16x16x64xf32> to vector<256x64xf32>
    %c0_96 = arith.constant 0 : index
    %c0_97 = arith.constant 0 : index
    %82 = vector.load %arg11[%c0_96, %c0_97] : memref<256x128xf32, #tpu.memory_space<vmem>>, vector<256x128xf32>
    %83 = arith.truncf %81 : vector<256x64xf32> to vector<256x64xbf16>
    %c8 = arith.constant 8 : index
    %c0_98 = arith.constant 0 : index
    %c0_99 = arith.constant 0 : index
    %84 = vector.load %arg2[%c8, %c0_98, %c0_99] : memref<9x64x128xbf16, #tpu.memory_space<vmem>>, vector<1x64x128xbf16>
    %85 = vector.shape_cast %84 : vector<1x64x128xbf16> to vector<64x128xbf16>
    %cst_100 = arith.constant dense<0.000000e+00> : vector<256x128xf32>
    %86 = tpu.matmul %83, %85, %cst_100 {dimension_numbers = #tpu.dot_dimension_numbers<[1], [0], [0], [1], [0, 0, 1, 1], [], []>} : vector<256x64xbf16>, vector<64x128xbf16>, vector<256x128xf32> -> vector<256x128xf32>
    %87 = arith.addf %82, %86 : vector<256x128xf32>
    %c0_101 = arith.constant 0 : index
    %c0_102 = arith.constant 0 : index
    %88 = vector.load %arg11[%c0_101, %c0_102] : memref<256x128xf32, #tpu.memory_space<vmem>>, vector<256x128xf32>
    tpu.vector_store %arg11[%c0_101, %c0_102], %87 {strides = array<i32>} : memref<256x128xf32, #tpu.memory_space<vmem>>, vector<256x128xf32>,
    %c0_103 = arith.constant 0 : index
    %c0_104 = arith.constant 0 : index
    %89 = vector.load %arg11[%c0_103, %c0_104] : memref<256x128xf32, #tpu.memory_space<vmem>>, vector<256x128xf32>
    %c0_105 = arith.constant 0 : index
    %c0_106 = arith.constant 0 : index
    %90 = vector.load %arg3[%c0_105, %c0_106] : memref<1x128xf32, #tpu.memory_space<vmem>>, vector<1x128xf32>
    %91 = vector.broadcast %90 : vector<1x128xf32> to vector<256x128xf32>
    %92 = arith.mulf %89, %91 : vector<256x128xf32>
    %c0_107 = arith.constant 0 : index
    %c0_108 = arith.constant 0 : index
    %93 = vector.load %arg4[%c0_107, %c0_108] : memref<1x128xf32, #tpu.memory_space<vmem>>, vector<1x128xf32>
    %94 = vector.broadcast %93 : vector<1x128xf32> to vector<256x128xf32>
    %95 = arith.addf %92, %94 : vector<256x128xf32>
    %cst_109 = arith.constant 0.000000e+00 : f32
    %96 = vector.broadcast %cst_109 : f32 to vector<256x128xf32>
    %97 = arith.cmpf ogt, %95, %96 : vector<256x128xf32>
    %cst_110 = arith.constant 0.00999999977 : f32
    %98 = vector.broadcast %cst_110 : f32 to vector<256x128xf32>
    %99 = arith.mulf %98, %95 : vector<256x128xf32>
    %100 = arith.select %97, %95, %99 : vector<256x128xi1>, vector<256x128xf32>
    %cst_111 = arith.constant 0.000000e+00 : f32
    %101 = vector.broadcast %cst_111 : f32 to vector<18x18x128xf32>
    %c0_112 = arith.constant 0 : index
    %c0_113 = arith.constant 0 : index
    %c0_114 = arith.constant 0 : index
    %102 = vector.load %arg10[%c0_112, %c0_113, %c0_114] : memref<18x18x128xf32, #tpu.memory_space<vmem>>, vector<18x18x128xf32>
    tpu.vector_store %arg10[%c0_112, %c0_113, %c0_114], %101 {strides = array<i32>} : memref<18x18x128xf32, #tpu.memory_space<vmem>>, vector<18x18x128xf32>,
    %103 = vector.shape_cast %100 : vector<256x128xf32> to vector<16x16x128xf32>
    %c1_115 = arith.constant 1 : index
    %c1_116 = arith.constant 1 : index
    %c0_117 = arith.constant 0 : index
    %104 = vector.load %arg10[%c1_115, %c1_116, %c0_117] : memref<18x18x128xf32, #tpu.memory_space<vmem>>, vector<16x16x128xf32>
    tpu.vector_store %arg10[%c1_115, %c1_116, %c0_117], %103 {strides = array<i32>} : memref<18x18x128xf32, #tpu.memory_space<vmem>>, vector<16x16x128xf32>,
    %cst_118 = arith.constant 0.000000e+00 : f32
    %105 = vector.broadcast %cst_118 : f32 to vector<256x128xf32>
    %c0_119 = arith.constant 0 : index
    %c0_120 = arith.constant 0 : index
    %106 = vector.load %arg11[%c0_119, %c0_120] : memref<256x128xf32, #tpu.memory_space<vmem>>, vector<256x128xf32>
    tpu.vector_store %arg11[%c0_119, %c0_120], %105 {strides = array<i32>} : memref<256x128xf32, #tpu.memory_space<vmem>>, vector<256x128xf32>,
    %c0_121 = arith.constant 0 : index
    %c0_122 = arith.constant 0 : index
    %c0_123 = arith.constant 0 : index
    %107 = vector.load %arg10[%c0_121, %c0_122, %c0_123] : memref<18x18x128xf32, #tpu.memory_space<vmem>>, vector<16x16x128xf32>
    %108 = vector.shape_cast %107 : vector<16x16x128xf32> to vector<256x128xf32>
    %c0_124 = arith.constant 0 : index
    %c0_125 = arith.constant 0 : index
    %109 = vector.load %arg11[%c0_124, %c0_125] : memref<256x128xf32, #tpu.memory_space<vmem>>, vector<256x128xf32>
    %110 = arith.truncf %108 : vector<256x128xf32> to vector<256x128xbf16>
    %c0_126 = arith.constant 0 : index
    %c0_127 = arith.constant 0 : index
    %c0_128 = arith.constant 0 : index
    %111 = vector.load %arg5[%c0_126, %c0_127, %c0_128] : memref<9x128x128xbf16, #tpu.memory_space<vmem>>, vector<1x128x128xbf16>
    %112 = vector.shape_cast %111 : vector<1x128x128xbf16> to vector<128x128xbf16>
    %cst_129 = arith.constant dense<0.000000e+00> : vector<256x128xf32>
    %113 = tpu.matmul %110, %112, %cst_129 {dimension_numbers = #tpu.dot_dimension_numbers<[1], [0], [0], [1], [0, 0, 1, 1], [], []>} : vector<256x128xbf16>, vector<128x128xbf16>, vector<256x128xf32> -> vector<256x128xf32>
    %114 = arith.addf %109, %113 : vector<256x128xf32>
    %c0_130 = arith.constant 0 : index
    %c0_131 = arith.constant 0 : index
    %115 = vector.load %arg11[%c0_130, %c0_131] : memref<256x128xf32, #tpu.memory_space<vmem>>, vector<256x128xf32>
    tpu.vector_store %arg11[%c0_130, %c0_131], %114 {strides = array<i32>} : memref<256x128xf32, #tpu.memory_space<vmem>>, vector<256x128xf32>,
    %c0_132 = arith.constant 0 : index
    %c1_133 = arith.constant 1 : index
    %c0_134 = arith.constant 0 : index
    %116 = vector.load %arg10[%c0_132, %c1_133, %c0_134] : memref<18x18x128xf32, #tpu.memory_space<vmem>>, vector<16x16x128xf32>
    %117 = vector.shape_cast %116 : vector<16x16x128xf32> to vector<256x128xf32>
    %c0_135 = arith.constant 0 : index
    %c0_136 = arith.constant 0 : index
    %118 = vector.load %arg11[%c0_135, %c0_136] : memref<256x128xf32, #tpu.memory_space<vmem>>, vector<256x128xf32>
    %119 = arith.truncf %117 : vector<256x128xf32> to vector<256x128xbf16>
    %c1_137 = arith.constant 1 : index
    %c0_138 = arith.constant 0 : index
    %c0_139 = arith.constant 0 : index
    %120 = vector.load %arg5[%c1_137, %c0_138, %c0_139] : memref<9x128x128xbf16, #tpu.memory_space<vmem>>, vector<1x128x128xbf16>
    %121 = vector.shape_cast %120 : vector<1x128x128xbf16> to vector<128x128xbf16>
    %cst_140 = arith.constant dense<0.000000e+00> : vector<256x128xf32>
    %122 = tpu.matmul %119, %121, %cst_140 {dimension_numbers = #tpu.dot_dimension_numbers<[1], [0], [0], [1], [0, 0, 1, 1], [], []>} : vector<256x128xbf16>, vector<128x128xbf16>, vector<256x128xf32> -> vector<256x128xf32>
    %123 = arith.addf %118, %122 : vector<256x128xf32>
    %c0_141 = arith.constant 0 : index
    %c0_142 = arith.constant 0 : index
    %124 = vector.load %arg11[%c0_141, %c0_142] : memref<256x128xf32, #tpu.memory_space<vmem>>, vector<256x128xf32>
    tpu.vector_store %arg11[%c0_141, %c0_142], %123 {strides = array<i32>} : memref<256x128xf32, #tpu.memory_space<vmem>>, vector<256x128xf32>,
    %c0_143 = arith.constant 0 : index
    %c2_144 = arith.constant 2 : index
    %c0_145 = arith.constant 0 : index
    %125 = vector.load %arg10[%c0_143, %c2_144, %c0_145] : memref<18x18x128xf32, #tpu.memory_space<vmem>>, vector<16x16x128xf32>
    %126 = vector.shape_cast %125 : vector<16x16x128xf32> to vector<256x128xf32>
    %c0_146 = arith.constant 0 : index
    %c0_147 = arith.constant 0 : index
    %127 = vector.load %arg11[%c0_146, %c0_147] : memref<256x128xf32, #tpu.memory_space<vmem>>, vector<256x128xf32>
    %128 = arith.truncf %126 : vector<256x128xf32> to vector<256x128xbf16>
    %c2_148 = arith.constant 2 : index
    %c0_149 = arith.constant 0 : index
    %c0_150 = arith.constant 0 : index
    %129 = vector.load %arg5[%c2_148, %c0_149, %c0_150] : memref<9x128x128xbf16, #tpu.memory_space<vmem>>, vector<1x128x128xbf16>
    %130 = vector.shape_cast %129 : vector<1x128x128xbf16> to vector<128x128xbf16>
    %cst_151 = arith.constant dense<0.000000e+00> : vector<256x128xf32>
    %131 = tpu.matmul %128, %130, %cst_151 {dimension_numbers = #tpu.dot_dimension_numbers<[1], [0], [0], [1], [0, 0, 1, 1], [], []>} : vector<256x128xbf16>, vector<128x128xbf16>, vector<256x128xf32> -> vector<256x128xf32>
    %132 = arith.addf %127, %131 : vector<256x128xf32>
    %c0_152 = arith.constant 0 : index
    %c0_153 = arith.constant 0 : index
    %133 = vector.load %arg11[%c0_152, %c0_153] : memref<256x128xf32, #tpu.memory_space<vmem>>, vector<256x128xf32>
    tpu.vector_store %arg11[%c0_152, %c0_153], %132 {strides = array<i32>} : memref<256x128xf32, #tpu.memory_space<vmem>>, vector<256x128xf32>,
    %c1_154 = arith.constant 1 : index
    %c0_155 = arith.constant 0 : index
    %c0_156 = arith.constant 0 : index
    %134 = vector.load %arg10[%c1_154, %c0_155, %c0_156] : memref<18x18x128xf32, #tpu.memory_space<vmem>>, vector<16x16x128xf32>
    %135 = vector.shape_cast %134 : vector<16x16x128xf32> to vector<256x128xf32>
    %c0_157 = arith.constant 0 : index
    %c0_158 = arith.constant 0 : index
    %136 = vector.load %arg11[%c0_157, %c0_158] : memref<256x128xf32, #tpu.memory_space<vmem>>, vector<256x128xf32>
    %137 = arith.truncf %135 : vector<256x128xf32> to vector<256x128xbf16>
    %c3_159 = arith.constant 3 : index
    %c0_160 = arith.constant 0 : index
    %c0_161 = arith.constant 0 : index
    %138 = vector.load %arg5[%c3_159, %c0_160, %c0_161] : memref<9x128x128xbf16, #tpu.memory_space<vmem>>, vector<1x128x128xbf16>
    %139 = vector.shape_cast %138 : vector<1x128x128xbf16> to vector<128x128xbf16>
    %cst_162 = arith.constant dense<0.000000e+00> : vector<256x128xf32>
    %140 = tpu.matmul %137, %139, %cst_162 {dimension_numbers = #tpu.dot_dimension_numbers<[1], [0], [0], [1], [0, 0, 1, 1], [], []>} : vector<256x128xbf16>, vector<128x128xbf16>, vector<256x128xf32> -> vector<256x128xf32>
    %141 = arith.addf %136, %140 : vector<256x128xf32>
    %c0_163 = arith.constant 0 : index
    %c0_164 = arith.constant 0 : index
    %142 = vector.load %arg11[%c0_163, %c0_164] : memref<256x128xf32, #tpu.memory_space<vmem>>, vector<256x128xf32>
    tpu.vector_store %arg11[%c0_163, %c0_164], %141 {strides = array<i32>} : memref<256x128xf32, #tpu.memory_space<vmem>>, vector<256x128xf32>,
    %c1_165 = arith.constant 1 : index
    %c1_166 = arith.constant 1 : index
    %c0_167 = arith.constant 0 : index
    %143 = vector.load %arg10[%c1_165, %c1_166, %c0_167] : memref<18x18x128xf32, #tpu.memory_space<vmem>>, vector<16x16x128xf32>
    %144 = vector.shape_cast %143 : vector<16x16x128xf32> to vector<256x128xf32>
    %c0_168 = arith.constant 0 : index
    %c0_169 = arith.constant 0 : index
    %145 = vector.load %arg11[%c0_168, %c0_169] : memref<256x128xf32, #tpu.memory_space<vmem>>, vector<256x128xf32>
    %146 = arith.truncf %144 : vector<256x128xf32> to vector<256x128xbf16>
    %c4_170 = arith.constant 4 : index
    %c0_171 = arith.constant 0 : index
    %c0_172 = arith.constant 0 : index
    %147 = vector.load %arg5[%c4_170, %c0_171, %c0_172] : memref<9x128x128xbf16, #tpu.memory_space<vmem>>, vector<1x128x128xbf16>
    %148 = vector.shape_cast %147 : vector<1x128x128xbf16> to vector<128x128xbf16>
    %cst_173 = arith.constant dense<0.000000e+00> : vector<256x128xf32>
    %149 = tpu.matmul %146, %148, %cst_173 {dimension_numbers = #tpu.dot_dimension_numbers<[1], [0], [0], [1], [0, 0, 1, 1], [], []>} : vector<256x128xbf16>, vector<128x128xbf16>, vector<256x128xf32> -> vector<256x128xf32>
    %150 = arith.addf %145, %149 : vector<256x128xf32>
    %c0_174 = arith.constant 0 : index
    %c0_175 = arith.constant 0 : index
    %151 = vector.load %arg11[%c0_174, %c0_175] : memref<256x128xf32, #tpu.memory_space<vmem>>, vector<256x128xf32>
    tpu.vector_store %arg11[%c0_174, %c0_175], %150 {strides = array<i32>} : memref<256x128xf32, #tpu.memory_space<vmem>>, vector<256x128xf32>,
    %c1_176 = arith.constant 1 : index
    %c2_177 = arith.constant 2 : index
    %c0_178 = arith.constant 0 : index
    %152 = vector.load %arg10[%c1_176, %c2_177, %c0_178] : memref<18x18x128xf32, #tpu.memory_space<vmem>>, vector<16x16x128xf32>
    %153 = vector.shape_cast %152 : vector<16x16x128xf32> to vector<256x128xf32>
    %c0_179 = arith.constant 0 : index
    %c0_180 = arith.constant 0 : index
    %154 = vector.load %arg11[%c0_179, %c0_180] : memref<256x128xf32, #tpu.memory_space<vmem>>, vector<256x128xf32>
    %155 = arith.truncf %153 : vector<256x128xf32> to vector<256x128xbf16>
    %c5_181 = arith.constant 5 : index
    %c0_182 = arith.constant 0 : index
    %c0_183 = arith.constant 0 : index
    %156 = vector.load %arg5[%c5_181, %c0_182, %c0_183] : memref<9x128x128xbf16, #tpu.memory_space<vmem>>, vector<1x128x128xbf16>
    %157 = vector.shape_cast %156 : vector<1x128x128xbf16> to vector<128x128xbf16>
    %cst_184 = arith.constant dense<0.000000e+00> : vector<256x128xf32>
    %158 = tpu.matmul %155, %157, %cst_184 {dimension_numbers = #tpu.dot_dimension_numbers<[1], [0], [0], [1], [0, 0, 1, 1], [], []>} : vector<256x128xbf16>, vector<128x128xbf16>, vector<256x128xf32> -> vector<256x128xf32>
    %159 = arith.addf %154, %158 : vector<256x128xf32>
    %c0_185 = arith.constant 0 : index
    %c0_186 = arith.constant 0 : index
    %160 = vector.load %arg11[%c0_185, %c0_186] : memref<256x128xf32, #tpu.memory_space<vmem>>, vector<256x128xf32>
    tpu.vector_store %arg11[%c0_185, %c0_186], %159 {strides = array<i32>} : memref<256x128xf32, #tpu.memory_space<vmem>>, vector<256x128xf32>,
    %c2_187 = arith.constant 2 : index
    %c0_188 = arith.constant 0 : index
    %c0_189 = arith.constant 0 : index
    %161 = vector.load %arg10[%c2_187, %c0_188, %c0_189] : memref<18x18x128xf32, #tpu.memory_space<vmem>>, vector<16x16x128xf32>
    %162 = vector.shape_cast %161 : vector<16x16x128xf32> to vector<256x128xf32>
    %c0_190 = arith.constant 0 : index
    %c0_191 = arith.constant 0 : index
    %163 = vector.load %arg11[%c0_190, %c0_191] : memref<256x128xf32, #tpu.memory_space<vmem>>, vector<256x128xf32>
    %164 = arith.truncf %162 : vector<256x128xf32> to vector<256x128xbf16>
    %c6_192 = arith.constant 6 : index
    %c0_193 = arith.constant 0 : index
    %c0_194 = arith.constant 0 : index
    %165 = vector.load %arg5[%c6_192, %c0_193, %c0_194] : memref<9x128x128xbf16, #tpu.memory_space<vmem>>, vector<1x128x128xbf16>
    %166 = vector.shape_cast %165 : vector<1x128x128xbf16> to vector<128x128xbf16>
    %cst_195 = arith.constant dense<0.000000e+00> : vector<256x128xf32>
    %167 = tpu.matmul %164, %166, %cst_195 {dimension_numbers = #tpu.dot_dimension_numbers<[1], [0], [0], [1], [0, 0, 1, 1], [], []>} : vector<256x128xbf16>, vector<128x128xbf16>, vector<256x128xf32> -> vector<256x128xf32>
    %168 = arith.addf %163, %167 : vector<256x128xf32>
    %c0_196 = arith.constant 0 : index
    %c0_197 = arith.constant 0 : index
    %169 = vector.load %arg11[%c0_196, %c0_197] : memref<256x128xf32, #tpu.memory_space<vmem>>, vector<256x128xf32>
    tpu.vector_store %arg11[%c0_196, %c0_197], %168 {strides = array<i32>} : memref<256x128xf32, #tpu.memory_space<vmem>>, vector<256x128xf32>,
    %c2_198 = arith.constant 2 : index
    %c1_199 = arith.constant 1 : index
    %c0_200 = arith.constant 0 : index
    %170 = vector.load %arg10[%c2_198, %c1_199, %c0_200] : memref<18x18x128xf32, #tpu.memory_space<vmem>>, vector<16x16x128xf32>
    %171 = vector.shape_cast %170 : vector<16x16x128xf32> to vector<256x128xf32>
    %c0_201 = arith.constant 0 : index
    %c0_202 = arith.constant 0 : index
    %172 = vector.load %arg11[%c0_201, %c0_202] : memref<256x128xf32, #tpu.memory_space<vmem>>, vector<256x128xf32>
    %173 = arith.truncf %171 : vector<256x128xf32> to vector<256x128xbf16>
    %c7_203 = arith.constant 7 : index
    %c0_204 = arith.constant 0 : index
    %c0_205 = arith.constant 0 : index
    %174 = vector.load %arg5[%c7_203, %c0_204, %c0_205] : memref<9x128x128xbf16, #tpu.memory_space<vmem>>, vector<1x128x128xbf16>
    %175 = vector.shape_cast %174 : vector<1x128x128xbf16> to vector<128x128xbf16>
    %cst_206 = arith.constant dense<0.000000e+00> : vector<256x128xf32>
    %176 = tpu.matmul %173, %175, %cst_206 {dimension_numbers = #tpu.dot_dimension_numbers<[1], [0], [0], [1], [0, 0, 1, 1], [], []>} : vector<256x128xbf16>, vector<128x128xbf16>, vector<256x128xf32> -> vector<256x128xf32>
    %177 = arith.addf %172, %176 : vector<256x128xf32>
    %c0_207 = arith.constant 0 : index
    %c0_208 = arith.constant 0 : index
    %178 = vector.load %arg11[%c0_207, %c0_208] : memref<256x128xf32, #tpu.memory_space<vmem>>, vector<256x128xf32>
    tpu.vector_store %arg11[%c0_207, %c0_208], %177 {strides = array<i32>} : memref<256x128xf32, #tpu.memory_space<vmem>>, vector<256x128xf32>,
    %c2_209 = arith.constant 2 : index
    %c2_210 = arith.constant 2 : index
    %c0_211 = arith.constant 0 : index
    %179 = vector.load %arg10[%c2_209, %c2_210, %c0_211] : memref<18x18x128xf32, #tpu.memory_space<vmem>>, vector<16x16x128xf32>
    %180 = vector.shape_cast %179 : vector<16x16x128xf32> to vector<256x128xf32>
    %c0_212 = arith.constant 0 : index
    %c0_213 = arith.constant 0 : index
    %181 = vector.load %arg11[%c0_212, %c0_213] : memref<256x128xf32, #tpu.memory_space<vmem>>, vector<256x128xf32>
    %182 = arith.truncf %180 : vector<256x128xf32> to vector<256x128xbf16>
    %c8_214 = arith.constant 8 : index
    %c0_215 = arith.constant 0 : index
    %c0_216 = arith.constant 0 : index
    %183 = vector.load %arg5[%c8_214, %c0_215, %c0_216] : memref<9x128x128xbf16, #tpu.memory_space<vmem>>, vector<1x128x128xbf16>
    %184 = vector.shape_cast %183 : vector<1x128x128xbf16> to vector<128x128xbf16>
    %cst_217 = arith.constant dense<0.000000e+00> : vector<256x128xf32>
    %185 = tpu.matmul %182, %184, %cst_217 {dimension_numbers = #tpu.dot_dimension_numbers<[1], [0], [0], [1], [0, 0, 1, 1], [], []>} : vector<256x128xbf16>, vector<128x128xbf16>, vector<256x128xf32> -> vector<256x128xf32>
    %186 = arith.addf %181, %185 : vector<256x128xf32>
    %c0_218 = arith.constant 0 : index
    %c0_219 = arith.constant 0 : index
    %187 = vector.load %arg11[%c0_218, %c0_219] : memref<256x128xf32, #tpu.memory_space<vmem>>, vector<256x128xf32>
    tpu.vector_store %arg11[%c0_218, %c0_219], %186 {strides = array<i32>} : memref<256x128xf32, #tpu.memory_space<vmem>>, vector<256x128xf32>,
    %c0_220 = arith.constant 0 : index
    %c0_221 = arith.constant 0 : index
    %188 = vector.load %arg11[%c0_220, %c0_221] : memref<256x128xf32, #tpu.memory_space<vmem>>, vector<256x128xf32>
    %c0_222 = arith.constant 0 : index
    %c0_223 = arith.constant 0 : index
    %189 = vector.load %arg6[%c0_222, %c0_223] : memref<1x128xf32, #tpu.memory_space<vmem>>, vector<1x128xf32>
    %190 = vector.broadcast %189 : vector<1x128xf32> to vector<256x128xf32>
    %191 = arith.mulf %188, %190 : vector<256x128xf32>
    %c0_224 = arith.constant 0 : index
    %c0_225 = arith.constant 0 : index
    %192 = vector.load %arg7[%c0_224, %c0_225] : memref<1x128xf32, #tpu.memory_space<vmem>>, vector<1x128xf32>
    %193 = vector.broadcast %192 : vector<1x128xf32> to vector<256x128xf32>
    %194 = arith.addf %191, %193 : vector<256x128xf32>
    %cst_226 = arith.constant 0.000000e+00 : f32
    %195 = vector.broadcast %cst_226 : f32 to vector<256x128xf32>
    %196 = arith.cmpf ogt, %194, %195 : vector<256x128xf32>
    %cst_227 = arith.constant 0.00999999977 : f32
    %197 = vector.broadcast %cst_227 : f32 to vector<256x128xf32>
    %198 = arith.mulf %197, %194 : vector<256x128xf32>
    %199 = arith.select %196, %194, %198 : vector<256x128xi1>, vector<256x128xf32>
    %200 = vector.shape_cast %199 : vector<256x128xf32> to vector<16x16x128xf32>
    %c0_228 = arith.constant 0 : index
    %c0_229 = arith.constant 0 : index
    %c0_230 = arith.constant 0 : index
    %c0_231 = arith.constant 0 : index
    %201 = vector.load %arg8[%c0_228, %c0_229, %c0_230, %c0_231] : memref<1x16x16x128xf32, #tpu.memory_space<vmem>>, vector<1x16x16x128xf32>
    %202 = vector.shape_cast %201 : vector<1x16x16x128xf32> to vector<16x16x128xf32>
    %203 = vector.shape_cast %200 : vector<16x16x128xf32> to vector<1x16x16x128xf32>
    tpu.vector_store %arg8[%c0_228, %c0_229, %c0_230, %c0_231], %203 {strides = array<i32>} : memref<1x16x16x128xf32, #tpu.memory_space<vmem>>, vector<1x16x16x128xf32>,
    return
  }
  func.func @transform_0(%arg0: i32) -> (i32, i32, i32, i32) {
    %c0_i32 = arith.constant 0 : i32
    %c0_i32_0 = arith.constant 0 : i32
    %c0_i32_1 = arith.constant 0 : i32
    %c0_i32_2 = arith.constant 0 : i32
    return %arg0, %c0_i32, %c0_i32_0, %c0_i32_1 : i32, i32, i32, i32
  }
  func.func @transform_1(%arg0: i32) -> (i32, i32, i32) {
    %c0_i32 = arith.constant 0 : i32
    %c0_i32_0 = arith.constant 0 : i32
    %c0_i32_1 = arith.constant 0 : i32
    %c0_i32_2 = arith.constant 0 : i32
    return %c0_i32, %c0_i32_0, %c0_i32_1 : i32, i32, i32
  }
  func.func @transform_2(%arg0: i32) -> (i32, i32) {
    %c0_i32 = arith.constant 0 : i32
    %c0_i32_0 = arith.constant 0 : i32
    %c0_i32_1 = arith.constant 0 : i32
    return %c0_i32, %c0_i32_0 : i32, i32
  }
  func.func @transform_3(%arg0: i32) -> (i32, i32) {
    %c0_i32 = arith.constant 0 : i32
    %c0_i32_0 = arith.constant 0 : i32
    %c0_i32_1 = arith.constant 0 : i32
    return %c0_i32, %c0_i32_0 : i32, i32
  }
  func.func @transform_4(%arg0: i32) -> (i32, i32, i32) {
    %c0_i32 = arith.constant 0 : i32
    %c0_i32_0 = arith.constant 0 : i32
    %c0_i32_1 = arith.constant 0 : i32
    %c0_i32_2 = arith.constant 0 : i32
    return %c0_i32, %c0_i32_0, %c0_i32_1 : i32, i32, i32
  }
  func.func @transform_5(%arg0: i32) -> (i32, i32) {
    %c0_i32 = arith.constant 0 : i32
    %c0_i32_0 = arith.constant 0 : i32
    %c0_i32_1 = arith.constant 0 : i32
    return %c0_i32, %c0_i32_0 : i32, i32
  }
  func.func @transform_6(%arg0: i32) -> (i32, i32) {
    %c0_i32 = arith.constant 0 : i32
    %c0_i32_0 = arith.constant 0 : i32
    %c0_i32_1 = arith.constant 0 : i32
    return %c0_i32, %c0_i32_0 : i32, i32
  }
  func.func @transform_7(%arg0: i32) -> (i32, i32, i32, i32) {
    %c0_i32 = arith.constant 0 : i32
    %c0_i32_0 = arith.constant 0 : i32
    %c0_i32_1 = arith.constant 0 : i32
    %c0_i32_2 = arith.constant 0 : i32
    return %arg0, %c0_i32, %c0_i32_0, %c0_i32_1 : i32, i32, i32, i32
  }
}

</mosaic_0001>

<bundles_post_ra>
// kernel: conv_block_forward.1
= control target key start
LH: loop header
LB: loop body
LE: loop exit
PB: predicated region body
PF: predicated region fallthrough
CT: control target
= control target key end

     0   :  { %s7621_s24 = smov 0   ;;  %s9645_s0 = inlined_call_operand.vmem [shape: bf16[2,16,16,64], index: 0, kind: input, shape index: {}]   ;;  %s9646_s1 = inlined_call_operand.vmem [shape: bf16[9,64,128], index: 1, kind: input, shape index: {}]   ;;  %s9647_s2 = inlined_call_operand.vmem [shape: f32[1,128], index: 2, kind: input, shape index: {}]   ;;  %s9648_s3 = inlined_call_operand.vmem [shape: f32[1,128], index: 3, kind: input, shape index: {}]   ;;  %s9649_s4 = inlined_call_operand.vmem [shape: bf16[9,128,128], index: 4, kind: input, shape index: {}]   ;;  %s9650_s5 = inlined_call_operand.vmem [shape: f32[1,128], index: 5, kind: input, shape index: {}]   ;;  %s9651_s6 = inlined_call_operand.vmem [shape: f32[1,128], index: 6, kind: input, shape index: {}]   ;;  %s9652_s7 = inlined_call_operand.vmem [shape: f32[2,16,16,128], index: 7, kind: output, shape index: {}]  }
   0x1 LB: > { %s6579_s25 = sadd.s32 4294967295, %s7578_s24   ;;  %p6583_p0 = scmp.ge.s32.totalorder %s7578_s24, 1  ;;  %s7578_s24 = sphi %s7621_s24, %s17_s24  }
   0x2   : > { %p237_p1 = scmp.lt.s32.totalorder %s7578_s24, 3 }
   0x4   : > { %p238_p2 = pnand %p6583_p0, %p237_p1 }
   0x6   : > { %241 = sbr.rel (%p238_p2) target bundleno = 1547 (0x60b), region = 48 }
   0xb   : > { %v7363_v0 = vld [vmem:[%s9646_s1 + $0x18] sm:$0xff]  ;;  %vm280_vm0 = vcmask 523264   ;;  %v7580_v2 = vmov 0.0   ;;  %v7362_v3 = vld [vmem:[%s9646_s1 + $0x10] sm:$0xff]  ;;  %v7361_v5 = vld [vmem:[%s9646_s1 + $0x8] sm:$0xff]  ;;  %p269_p3 = scmp.lt.s32.totalorder %s6579_s25, 1 }
   0xc   : > { %v7367_v1 = vld [vmem:[%s9646_s1 + $0x38] sm:$0xff]  ;;  %281 = vst.msk [vmem:[#allocation2] sm:$0xff] %vm280_vm0, %v7580_v2  ;;  %629 = vmatpush.bf16.msra.mxu0 %v7363_v0  ;;  %7547 = vmatpush.bf16.msra.mxu2 %v7363_v0  ;;  %v7366_v4 = vld [vmem:[%s9646_s1 + $0x30] sm:$0xff]  ;;  %v7365_v6 = vld [vmem:[%s9646_s1 + $0x28] sm:$0xff]  ;;  %vm283_vm1 = vcmask 517120  }
   0xd   : > { %282 = vst.msk [vmem:[#allocation2 + $0x8] sm:$0xff] %vm280_vm0, %v7580_v2  ;;  %7551 = vmatpush.bf16.msra.mxu3 %v7367_v1  ;;  %943 = vmatpush.bf16.msra.mxu1 %v7367_v1  ;;  %v7360_v7 = vld [vmem:[%s9646_s1] sm:$0xff]  ;;  %s9686_s25 = smov (!%p269_p3, %s6579_s25), 1  ;;  %v7371_v12 = vld [vmem:[%s9646_s1 + $0x58] sm:$0xff]  ;;  %v7370_v32 = vld [vmem:[%s9646_s1 + $0x50] sm:$0xff] }
   0xe   : > { %285 = vst.msk [vmem:[#allocation2 + $0x18] sm:$0xff] %vm280_vm0, %v7580_v2  ;;  %v7364_v10 = vld [vmem:[%s9646_s1 + $0x20] sm:$0xff]  ;;  %v7375_v13 = vld [vmem:[%s9646_s1 + $0x78] sm:$0xff]  ;;  %s7358_s27 = sshll.u32 %s9686_s25, 7  ;;  %v7374_v33 = vld [vmem:[%s9646_s1 + $0x70] sm:$0xff]  ;;  %s7359_s28 = sshll.u32 %s9686_s25, 8 }
   0xf   : > { %286 = vst.msk [vmem:[#allocation2 + $0x20] sm:$0xff] %vm280_vm0, %v7580_v2  ;;  %v7379_v14 = vld [vmem:[%s9646_s1 + $0x98] sm:$0xff]  ;;  %s7791_s30 = scalar_lea.vmem %s9645_s0, %s7358_s27  ;;  %v7378_v34 = vld [vmem:[%s9646_s1 + $0x90] sm:$0xff]  ;;  %s9454_s9 = scalar_lea.vmem %s9652_s7, %s7359_s28 }
  0x10   : > { %288 = vst.msk [vmem:[#allocation2 + $0x30] sm:$0xff] %vm280_vm0, %v7580_v2  ;;  %630 = vmatpush.bf16.msra.mxu0 %v7362_v3  ;;  %7548 = vmatpush.bf16.msra.mxu2 %v7362_v3  ;;  %v7538_v15 = vld [vmem:[%s7791_s30 + $0x38] sm:$0xff]   ;;  %v7469_v27 = vld [vmem:[%s7791_s30] sm:$0xff]   ;;  %v7532_v30 = vld [vmem:[%s7791_s30 + $0x8] sm:$0xff]  }
  0x11   : > { %289 = vst.msk [vmem:[#allocation2 + $0x38] sm:$0xff] %vm280_vm0, %v7580_v2  ;;  %7552 = vmatpush.bf16.msra.mxu3 %v7366_v4  ;;  %944 = vmatpush.bf16.msra.mxu1 %v7366_v4  ;;  %v7498_v16 = vunpack.c.l.bf16 %v7538_v15  ;;  %v7499_v17 = vunpack.c.h.bf16 %v7538_v15  ;;  %v7539_v28 = vld [vmem:[%s7791_s30 + $0x40] sm:$0xff]   ;;  %v7470_v29 = vunpack.c.l.bf16 %v7469_v27  ;;  %v7471_v31 = vunpack.c.h.bf16 %v7469_v27  ;;  %v7540_v37 = vld [vmem:[%s7791_s30 + $0x48] sm:$0xff]   ;;  %v7533_v40 = vld [vmem:[%s7791_s30 + $0x10] sm:$0xff]  }
  0x12   : > { %291 = vst.msk [vmem:[#allocation2 + $0x48] sm:$0xff] %vm280_vm0, %v7580_v2  ;;  %v7502_v35 = vunpack.c.l.bf16 %v7539_v28  ;;  %v7503_v36 = vunpack.c.h.bf16 %v7539_v28  ;;  %v7474_v38 = vunpack.c.l.bf16 %v7532_v30  ;;  %v7475_v39 = vunpack.c.h.bf16 %v7532_v30  ;;  %v7541_v43 = vld [vmem:[%s7791_s30 + $0x50] sm:$0xff]   ;;  %v7534_v60 = vld [vmem:[%s7791_s30 + $0x18] sm:$0xff]   ;;  %v7373_v15 = vld [vmem:[%s9646_s1 + $0x68] sm:$0xff] }
  0x13   : > { %292 = vst.msk [vmem:[#allocation2 + $0x50] sm:$0xff] %vm280_vm0, %v7580_v2  ;;  %v465_v8 = vld [vmem:[#allocation2] sm:$0xff]  ;;  %v7506_v41 = vunpack.c.l.bf16 %v7540_v37  ;;  %v7507_v42 = vunpack.c.h.bf16 %v7540_v37  ;;  %v7478_v44 = vunpack.c.l.bf16 %v7533_v40  ;;  %v7479_v45 = vunpack.c.h.bf16 %v7533_v40  ;;  %v7542_v63 = vld [vmem:[%s7791_s30 + $0x58] sm:$0xff]   ;;  %v7536_v37 = vld [vmem:[%s7791_s30 + $0x28] sm:$0xff]  }
  0x14   : > { %294 = vst.msk [vmem:[#allocation2 + $0x60] sm:$0xff] %vm280_vm0, %v7580_v2  ;;  %631 = vmatpush.bf16.msra.mxu0 %v7361_v5  ;;  %7549 = vmatpush.bf16.msra.mxu2 %v7361_v5  ;;  %v466_v9 = vld [vmem:[#allocation2 + $0x8] sm:$0xff]  ;;  %v7510_v46 = vunpack.c.l.bf16 %v7541_v43  ;;  %v7511_v49 = vunpack.c.h.bf16 %v7541_v43  ;;  %v7482_v61 = vunpack.c.l.bf16 %v7534_v60  ;;  %v7483_v62 = vunpack.c.h.bf16 %v7534_v60  ;;  %v7372_v60 = vld [vmem:[%s9646_s1 + $0x60] sm:$0xff] }
  0x15   : > { %295 = vst.msk [vmem:[#allocation2 + $0x68] sm:$0xff] %vm280_vm0, %v7580_v2  ;;  %7553 = vmatpush.bf16.msra.mxu3 %v7365_v6  ;;  %945 = vmatpush.bf16.msra.mxu1 %v7365_v6  ;;  %v529_v11 = vpack.c.bf16 %v466_v9, %v465_v8  ;;  %v778_v20 = vld [vmem:[#allocation2 + $0x1] sm:$0xff]  ;;  %v7514_v0 = vunpack.c.l.bf16 %v7542_v63  ;;  %v7515_v1 = vunpack.c.h.bf16 %v7542_v63 }
  0x16   : > { %297 = vst.msk [vmem:[#allocation2 + $0x78] sm:$0xff] %vm280_vm0, %v7580_v2  ;;  %v7544_v40 = vld [vmem:[%s7791_s30 + $0x68] sm:$0xff]  }
  0x17   : > { %298 = vst.msk [vmem:[#allocation2 + $0x80] sm:$0xff] %vm280_vm0, %v7580_v2 }
  0x18   : > { %300 = vst.msk [vmem:[#allocation2 + $0x90] sm:$0xff] %vm280_vm0, %v7580_v2  ;;  %632 = vmatpush.bf16.msra.mxu0 %v7360_v7  ;;  %7550 = vmatpush.bf16.msra.mxu2 %v7360_v7 }
  0x19   : > { %301 = vst.msk [vmem:[#allocation2 + $0x98] sm:$0xff] %vm280_vm0, %v7580_v2  ;;  %7554 = vmatpush.bf16.msra.mxu3 %v7364_v10  ;;  %946 = vmatpush.bf16.msra.mxu1 %v7364_v10 }
  0x1a   : > { %303 = vst.msk [vmem:[#allocation2 + $0xa8] sm:$0xff] %vm280_vm0, %v7580_v2 }
  0x1b   : > { %304 = vst.msk [vmem:[#allocation2 + $0xb0] sm:$0xff] %vm280_vm0, %v7580_v2  ;;  %6604 = vmatmul.msk.bf16.vlgmr.msra.gmra.mxu0 %vm280_vm0, %v529_v11 }
  0x1c   : > { %306 = vst.msk [vmem:[#allocation2 + $0xc0] sm:$0xff] %vm280_vm0, %v7580_v2  ;;  %1257 = vmatpush.bf16.msrb.mxu2 %v7371_v12  ;;  %1885 = vmatpush.bf16.msrb.mxu0 %v7379_v14  ;;  %v7369_v14 = vld [vmem:[%s9646_s1 + $0x48] sm:$0xff] }
  0x1d   : > { %307 = vst.msk [vmem:[#allocation2 + $0xc8] sm:$0xff] %vm280_vm0, %v7580_v2  ;;  %1571 = vmatpush.bf16.msrb.mxu3 %v7375_v13 }
  0x1e   : > { %309 = vst.msk [vmem:[#allocation2 + $0xd8] sm:$0xff] %vm280_vm0, %v7580_v2 }
  0x1f   : > { %310 = vst.msk [vmem:[#allocation2 + $0xe0] sm:$0xff] %vm280_vm0, %v7580_v2 }
  0x20   : > { %312 = vst.msk [vmem:[#allocation2 + $0xf0] sm:$0xff] %vm280_vm0, %v7580_v2  ;;  %1258 = vmatpush.bf16.msrb.mxu2 %v7370_v32  ;;  %1886 = vmatpush.bf16.msrb.mxu0 %v7378_v34 }
  0x21   : > { %313 = vst.msk [vmem:[#allocation2 + $0xf8] sm:$0xff] %vm280_vm0, %v7580_v2  ;;  %1572 = vmatpush.bf16.msrb.mxu3 %v7374_v33 }
  0x22   : > { %315 = vst.msk [vmem:[#allocation2 + $0x108] sm:$0xff] %vm280_vm0, %v7580_v2 }
  0x23   : > { %316 = vst.msk [vmem:[#allocation2 + $0x110] sm:$0xff] %vm280_vm0, %v7580_v2 }
  0x24   : > { %318 = vst.msk [vmem:[#allocation2 + $0x120] sm:$0xff] %vm280_vm0, %v7580_v2  ;;  %1259 = vmatpush.bf16.msrb.mxu2 %v7369_v14 }
  0x25   : > { %319 = vst.msk [vmem:[#allocation2 + $0x128] sm:$0xff] %vm280_vm0, %v7580_v2  ;;  %1573 = vmatpush.bf16.msrb.mxu3 %v7373_v15 }
  0x26   : > { %321 = vst.msk [vmem:[#allocation2 + $0x138] sm:$0xff] %vm280_vm0, %v7580_v2 }
  0x27   : > { %322 = vst.msk [vmem:[#allocation2 + $0x140] sm:$0xff] %vm280_vm0, %v7580_v2 }
  0x28   : > { %324 = vst.msk [vmem:[#allocation2 + $0x150] sm:$0xff] %vm280_vm0, %v7580_v2 }
  0x29   : > { %325 = vst.msk [vmem:[#allocation2 + $0x158] sm:$0xff] %vm280_vm0, %v7580_v2  ;;  %1574 = vmatpush.bf16.msrb.mxu3 %v7372_v60 }
  0x2a   : > { %327 = vst.msk [vmem:[#allocation2 + $0x168] sm:$0xff] %vm280_vm0, %v7580_v2 }
  0x2b   : > { %328 = vst.msk [vmem:[#allocation2 + $0x170] sm:$0xff] %vm280_vm0, %v7580_v2 }
  0x2c   : > { %330 = vst.msk [vmem:[#allocation2 + $0x180] sm:$0xff] %vm280_vm0, %v7580_v2 }
  0x2d   : > { %331 = vst.msk [vmem:[#allocation2 + $0x188] sm:$0xff] %vm280_vm0, %v7580_v2 }
  0x2e   : > { %333 = vst.msk [vmem:[#allocation2 + $0x198] sm:$0xff] %vm280_vm0, %v7580_v2 }
  0x2f   : > { %334 = vst.msk [vmem:[#allocation2 + $0x1a0] sm:$0xff] %vm280_vm0, %v7580_v2 }
  0x30   : > { %3491 = vst [vmem:[#allocation3] sm:$0xff] %v7580_v2 }
  0x31   : > { %3492 = vst [vmem:[#allocation3 + $0x8] sm:$0xff] %v7580_v2 }
  0x32   : > { %3493 = vst [vmem:[#allocation3 + $0x10] sm:$0x3] %v7580_v2 }
  0x33   : > { %3494 = vst [vmem:[#allocation3 + $0x18] sm:$0xff] %v7580_v2 }
  0x34   : > { %3495 = vst [vmem:[#allocation3 + $0x20] sm:$0xff] %v7580_v2 }
  0x35   : > { %3496 = vst [vmem:[#allocation3 + $0x28] sm:$0x3] %v7580_v2 }
  0x36   : > { %3497 = vst [vmem:[#allocation3 + $0x30] sm:$0xff] %v7580_v2 }
  0x37   : > { %3498 = vst [vmem:[#allocation3 + $0x38] sm:$0xff] %v7580_v2 }
  0x38   : > { %3499 = vst [vmem:[#allocation3 + $0x40] sm:$0x3] %v7580_v2 }
  0x39   : > { %3500 = vst [vmem:[#allocation3 + $0x48] sm:$0xff] %v7580_v2 }
  0x3a   : > { %3501 = vst [vmem:[#allocation3 + $0x50] sm:$0xff] %v7580_v2 }
  0x3b   : > { %3502 = vst [vmem:[#allocation3 + $0x58] sm:$0x3] %v7580_v2 }
  0x3c   : > { %3503 = vst [vmem:[#allocation3 + $0x60] sm:$0xff] %v7580_v2 }
  0x3d   : > { %3504 = vst [vmem:[#allocation3 + $0x68] sm:$0xff] %v7580_v2 }
  0x3e   : > { %3505 = vst [vmem:[#allocation3 + $0x70] sm:$0x3] %v7580_v2 }
  0x3f   : > { %3506 = vst [vmem:[#allocation3 + $0x78] sm:$0xff] %v7580_v2 }
  0x40   : > { %3507 = vst [vmem:[#allocation3 + $0x80] sm:$0xff] %v7580_v2 }
  0x41   : > { %3508 = vst [vmem:[#allocation3 + $0x88] sm:$0x3] %v7580_v2 }
  0x42   : > { %3509 = vst [vmem:[#allocation3 + $0x90] sm:$0xff] %v7580_v2 }
  0x43   : > { %3510 = vst [vmem:[#allocation3 + $0x98] sm:$0xff] %v7580_v2 }
  0x44   : > { %3511 = vst [vmem:[#allocation3 + $0xa0] sm:$0x3] %v7580_v2 }
  0x45   : > { %3512 = vst [vmem:[#allocation3 + $0xa8] sm:$0xff] %v7580_v2 }
  0x46   : > { %3513 = vst [vmem:[#allocation3 + $0xb0] sm:$0xff] %v7580_v2 }
  0x47   : > { %3514 = vst [vmem:[#allocation3 + $0xb8] sm:$0x3] %v7580_v2 }
  0x48   : > { %3515 = vst [vmem:[#allocation3 + $0xc0] sm:$0xff] %v7580_v2 }
  0x49   : > { %3516 = vst [vmem:[#allocation3 + $0xc8] sm:$0xff] %v7580_v2 }
  0x4a   : > { %3517 = vst [vmem:[#allocation3 + $0xd0] sm:$0x3] %v7580_v2 }
  0x4b   : > { %3518 = vst [vmem:[#allocation3 + $0xd8] sm:$0xff] %v7580_v2 }
  0x4c   : > { %3519 = vst [vmem:[#allocation3 + $0xe0] sm:$0xff] %v7580_v2 }
  0x4d   : > { %3520 = vst [vmem:[#allocation3 + $0xe8] sm:$0x3] %v7580_v2 }
  0x4e   : > { %3521 = vst [vmem:[#allocation3 + $0xf0] sm:$0xff] %v7580_v2 }
  0x4f   : > { %3522 = vst [vmem:[#allocation3 + $0xf8] sm:$0xff] %v7580_v2 }
  0x50   : > { %3523 = vst [vmem:[#allocation3 + $0x100] sm:$0x3] %v7580_v2 }
  0x51   : > { %3524 = vst [vmem:[#allocation3 + $0x108] sm:$0xff] %v7580_v2 }
  0x52   : > { %3525 = vst [vmem:[#allocation3 + $0x110] sm:$0xff] %v7580_v2 }
  0x53   : > { %3526 = vst [vmem:[#allocation3 + $0x118] sm:$0x3] %v7580_v2 }
  0x54   : > { %3527 = vst [vmem:[#allocation3 + $0x120] sm:$0xff] %v7580_v2 }
  0x55   : > { %3528 = vst [vmem:[#allocation3 + $0x128] sm:$0xff] %v7580_v2 }
  0x56   : > { %3529 = vst [vmem:[#allocation3 + $0x130] sm:$0x3] %v7580_v2 }
  0x57   : > { %3530 = vst [vmem:[#allocation3 + $0x138] sm:$0xff] %v7580_v2 }
  0x58   : > { %3531 = vst [vmem:[#allocation3 + $0x140] sm:$0xff] %v7580_v2 }
  0x59   : > { %3532 = vst [vmem:[#allocation3 + $0x148] sm:$0x3] %v7580_v2 }
  0x5a   : > { %3533 = vst [vmem:[#allocation3 + $0x150] sm:$0xff] %v7580_v2 }
  0x5b   : > { %3534 = vst [vmem:[#allocation3 + $0x158] sm:$0xff] %v7580_v2 }
  0x5c   : > { %3535 = vst [vmem:[#allocation3 + $0x160] sm:$0x3] %v7580_v2 }
  0x5d   : > { %3536 = vst [vmem:[#allocation3 + $0x168] sm:$0xff] %v7580_v2 }
  0x5e   : > { %3537 = vst [vmem:[#allocation3 + $0x170] sm:$0xff] %v7580_v2 }
  0x5f   : > { %3538 = vst [vmem:[#allocation3 + $0x178] sm:$0x3] %v7580_v2 }
  0x60   : > { %3539 = vst [vmem:[#allocation3 + $0x180] sm:$0xff] %v7580_v2 }
  0x61   : > { %3540 = vst [vmem:[#allocation3 + $0x188] sm:$0xff] %v7580_v2 }
  0x62   : > { %3541 = vst [vmem:[#allocation3 + $0x190] sm:$0x3] %v7580_v2 }
  0x63   : > { %3542 = vst [vmem:[#allocation3 + $0x198] sm:$0xff] %v7580_v2 }
  0x64   : > { %3543 = vst [vmem:[#allocation3 + $0x1a0] sm:$0xff] %v7580_v2 }
  0x65   : > { %3544 = vst [vmem:[#allocation3 + $0x1a8] sm:$0x3] %v7580_v2 }
  0x66   : > { %308 = vst.msk [vmem:[#allocation2 + $0xd0] sm:$0x3] %vm283_vm1, %v7580_v2 }
  0x67   : > { %415 = vst.msk [vmem:[#allocation2 + $0xc1] sm:$0xff] %vm280_vm0, %v7498_v16  ;;  %v7377_v16 = vld [vmem:[%s9646_s1 + $0x88] sm:$0xff] }
  0x68   : > { %416 = vst.msk [vmem:[#allocation2 + $0xc9] sm:$0xff] %vm280_vm0, %v7499_v17  ;;  %v7535_v17 = vld [vmem:[%s7791_s30 + $0x20] sm:$0xff]   ;;  %1887 = vmatpush.bf16.msrb.mxu0 %v7377_v16 }
  0x69   : > { %284 = vst.msk [vmem:[#allocation2 + $0x10] sm:$0x3] %vm283_vm1, %v7580_v2 }
  0x6a   : > { %287 = vst.msk [vmem:[#allocation2 + $0x28] sm:$0x3] %vm283_vm1, %v7580_v2 }
  0x6b   : > { %290 = vst.msk [vmem:[#allocation2 + $0x40] sm:$0x3] %vm283_vm1, %v7580_v2 }
  0x6c   : > { %293 = vst.msk [vmem:[#allocation2 + $0x58] sm:$0x3] %vm283_vm1, %v7580_v2 }
  0x6d   : > { %296 = vst.msk [vmem:[#allocation2 + $0x70] sm:$0x3] %vm283_vm1, %v7580_v2 }
  0x6e   : > { %v481_v18 = vld [vmem:[#allocation2 + $0xc0] sm:$0xff]  ;;  %299 = vst.msk [vmem:[#allocation2 + $0x88] sm:$0x3] %vm283_vm1, %v7580_v2 }
  0x6f   : > { %v794_v19 = vld [vmem:[#allocation2 + $0xc1] sm:$0xff]  ;;  %302 = vst.msk [vmem:[#allocation2 + $0xa0] sm:$0x3] %vm283_vm1, %v7580_v2  ;;  %v795_v22 = vld [vmem:[#allocation2 + $0xc9] sm:$0xff] }
  0x70   : > { %v482_v21 = vld [vmem:[#allocation2 + $0xc8] sm:$0xff]  ;;  %305 = vst.msk [vmem:[#allocation2 + $0xb8] sm:$0x3] %vm283_vm1, %v7580_v2  ;;  %v7824_v24 = vpack.c.bf16 %v795_v22, %v794_v19  ;;  %v7487_v19 = vunpack.c.h.bf16 %v7535_v17 }
  0x71   : > { %v7820_v23 = vpack.c.bf16 %v482_v21, %v481_v18  ;;  %v779_v25 = vld [vmem:[#allocation2 + $0x9] sm:$0xff]  ;;  %311 = vst.msk [vmem:[#allocation2 + $0xe8] sm:$0x3] %vm283_vm1, %v7580_v2  ;;  %v7486_v18 = vunpack.c.l.bf16 %v7535_v17 }
  0x72   : > { %v842_v26 = vpack.c.bf16 %v779_v25, %v778_v20  ;;  %314 = vst.msk [vmem:[#allocation2 + $0x100] sm:$0x3] %vm283_vm1, %v7580_v2  ;;  %6652 = vmatmul.msk.bf16.vlgmr.msra.gmra.mxu3 %vm280_vm0, %v7824_v24  ;;  %v7543_v20 = vld [vmem:[%s7791_s30 + $0x60] sm:$0xff]  }
  0x73   : > { %6612 = vmatmul.msk.bf16.vlgmr.msra.gmra.mxu2 %vm280_vm0, %v7820_v23  ;;  %317 = vst.msk [vmem:[#allocation2 + $0x118] sm:$0x3] %vm283_vm1, %v7580_v2  ;;  %v7518_v21 = vunpack.c.l.bf16 %v7543_v20  ;;  %v7519_v22 = vunpack.c.h.bf16 %v7543_v20  ;;  %v7383_v20 = vld [vmem:[%s9646_s1 + $0xb8] sm:$0xff] }
  0x74   : > { %6644 = vmatmul.msk.bf16.vlgmr.msra.gmra.mxu1 %vm280_vm0, %v842_v26  ;;  %320 = vst.msk [vmem:[#allocation2 + $0x130] sm:$0x3] %vm283_vm1, %v7580_v2 }
  0x75   : > { %323 = vst.msk [vmem:[#allocation2 + $0x148] sm:$0x3] %vm283_vm1, %v7580_v2  ;;  %2199 = vmatpush.bf16.msrb.mxu1 %v7383_v20 }
  0x76   : > { %326 = vst.msk [vmem:[#allocation2 + $0x160] sm:$0x3] %vm283_vm1, %v7580_v2 }
  0x77   : > { %329 = vst.msk [vmem:[#allocation2 + $0x178] sm:$0x3] %vm283_vm1, %v7580_v2 }
  0x78   : > { %332 = vst.msk [vmem:[#allocation2 + $0x190] sm:$0x3] %vm283_vm1, %v7580_v2 }
  0x79   : > { %335 = vst.msk [vmem:[#allocation2 + $0x1a8] sm:$0x3] %vm283_vm1, %v7580_v2 }
  0x7a   : > { %401 = vst.msk [vmem:[#allocation2 + $0x19] sm:$0xff] %vm280_vm0, %v7470_v29 }
  0x7b   : > { %402 = vst.msk [vmem:[#allocation2 + $0x21] sm:$0xff] %vm280_vm0, %v7471_v31 }
  0x7c   : > { %417 = vst.msk [vmem:[#allocation2 + $0xd9] sm:$0xff] %vm280_vm0, %v7502_v35 }
  0x7d   : > { %418 = vst.msk [vmem:[#allocation2 + $0xe1] sm:$0xff] %vm280_vm0, %v7503_v36 }
  0x7e   : > { %403 = vst.msk [vmem:[#allocation2 + $0x31] sm:$0xff] %vm280_vm0, %v7474_v38  ;;  %v7490_v38 = vunpack.c.l.bf16 %v7536_v37 }
  0x7f   : > { %404 = vst.msk [vmem:[#allocation2 + $0x39] sm:$0xff] %vm280_vm0, %v7475_v39  ;;  %v7491_v39 = vunpack.c.h.bf16 %v7536_v37 }
  0x80   : > { %419 = vst.msk [vmem:[#allocation2 + $0xf1] sm:$0xff] %vm280_vm0, %v7506_v41  ;;  %v7522_v41 = vunpack.c.l.bf16 %v7544_v40 }
  0x81   : > { %v467_v47 = vld [vmem:[#allocation2 + $0x18] sm:$0xff]  ;;  %420 = vst.msk [vmem:[#allocation2 + $0xf9] sm:$0xff] %vm280_vm0, %v7507_v42  ;;  %v7523_v42 = vunpack.c.h.bf16 %v7544_v40 }
  0x82   : > { %v780_v48 = vld [vmem:[#allocation2 + $0x19] sm:$0xff]  ;;  %v781_v51 = vld [vmem:[#allocation2 + $0x21] sm:$0xff]  ;;  %405 = vst.msk [vmem:[#allocation2 + $0x49] sm:$0xff] %vm280_vm0, %v7478_v44 }
  0x83   : > { %v468_v50 = vld [vmem:[#allocation2 + $0x20] sm:$0xff]  ;;  %v483_v53 = vld [vmem:[#allocation2 + $0xd8] sm:$0xff]  ;;  %v7875_v55 = vpack.c.bf16 %v781_v51, %v780_v48  ;;  %406 = vst.msk [vmem:[#allocation2 + $0x51] sm:$0xff] %vm280_vm0, %v7479_v45 }
  0x84   : > { %v7873_v52 = vpack.c.bf16 %v468_v50, %v467_v47  ;;  %v796_v54 = vld [vmem:[#allocation2 + $0xd9] sm:$0xff]  ;;  %v797_v57 = vld [vmem:[#allocation2 + $0xe1] sm:$0xff]  ;;  %421 = vst.msk [vmem:[#allocation2 + $0x109] sm:$0xff] %vm280_vm0, %v7510_v46 }
  0x85   : > { %v484_v56 = vld [vmem:[#allocation2 + $0xe0] sm:$0xff]  ;;  %v7883_v59 = vpack.c.bf16 %v797_v57, %v796_v54  ;;  %6645 = vmatmul.msk.bf16.gmra.mxu1 %vm280_vm0, %v7875_v55  ;;  %422 = vst.msk [vmem:[#allocation2 + $0x111] sm:$0xff] %vm280_vm0, %v7511_v49  ;;  %v469_v2 = vld [vmem:[#allocation2 + $0x30] sm:$0xff]  ;;  %v7387_v40 = vld [vmem:[%s9646_s1 + $0xd8] sm:$0xff] }
  0x86   : > { %6605 = vmatmul.msk.bf16.gmra.mxu0 %vm280_vm0, %v7873_v52  ;;  %v7881_v58 = vpack.c.bf16 %v484_v56, %v483_v53  ;;  %407 = vst.msk [vmem:[#allocation2 + $0x61] sm:$0xff] %vm280_vm0, %v7482_v61  ;;  %v470_v3 = vld [vmem:[#allocation2 + $0x38] sm:$0xff]  ;;  %v7368_v57 = vld [vmem:[%s9646_s1 + $0x40] sm:$0xff] }
  0x87   : > { %6653 = vmatmul.msk.bf16.gmra.mxu3 %vm280_vm0, %v7883_v59  ;;  %408 = vst.msk [vmem:[#allocation2 + $0x69] sm:$0xff] %vm280_vm0, %v7483_v62  ;;  %v782_v4 = vld [vmem:[#allocation2 + $0x31] sm:$0xff]  ;;  %v783_v5 = vld [vmem:[#allocation2 + $0x39] sm:$0xff]  ;;  %v7898_v10 = vpack.c.bf16 %v470_v3, %v469_v2  ;;  %1260 = vmatpush.bf16.msrb.mxu2 %v7368_v57 }
  0x88   : > { %6613 = vmatmul.msk.bf16.gmra.mxu2 %vm280_vm0, %v7881_v58  ;;  %423 = vst.msk [vmem:[#allocation2 + $0x121] sm:$0xff] %vm280_vm0, %v7514_v0  ;;  %v485_v6 = vld [vmem:[#allocation2 + $0xf0] sm:$0xff]  ;;  %v486_v7 = vld [vmem:[#allocation2 + $0xf8] sm:$0xff]  ;;  %v7900_v11 = vpack.c.bf16 %v783_v5, %v782_v4  ;;  %v7376_v61 = vld [vmem:[%s9646_s1 + $0x80] sm:$0xff] }
  0x89   : > { %424 = vst.msk [vmem:[#allocation2 + $0x129] sm:$0xff] %vm280_vm0, %v7515_v1  ;;  %v798_v8 = vld [vmem:[#allocation2 + $0xf1] sm:$0xff]  ;;  %v799_v9 = vld [vmem:[#allocation2 + $0xf9] sm:$0xff]  ;;  %v7902_v12 = vpack.c.bf16 %v486_v7, %v485_v6  ;;  %v471_v25 = vld [vmem:[#allocation2 + $0x48] sm:$0xff]  ;;  %1888 = vmatpush.bf16.msrb.mxu0 %v7376_v61 }
  0x8a   : > { %v7904_v13 = vpack.c.bf16 %v799_v9, %v798_v8  ;;  %409 = vst.msk [vmem:[#allocation2 + $0x79] sm:$0xff] %vm280_vm0, %v7486_v18  ;;  %v472_v26 = vld [vmem:[#allocation2 + $0x50] sm:$0xff] }
  0x8b   : > { %410 = vst.msk [vmem:[#allocation2 + $0x81] sm:$0xff] %vm280_vm0, %v7487_v19  ;;  %v784_v27 = vld [vmem:[#allocation2 + $0x49] sm:$0xff]  ;;  %v785_v28 = vld [vmem:[#allocation2 + $0x51] sm:$0xff]  ;;  %v7929_v33 = vpack.c.bf16 %v472_v26, %v471_v25  ;;  %2514 = vmatpush.bf16.msra.mxu2 %v7387_v40 }
  0x8c   : > { %425 = vst.msk [vmem:[#allocation2 + $0x139] sm:$0xff] %vm280_vm0, %v7518_v21  ;;  %v487_v29 = vld [vmem:[#allocation2 + $0x108] sm:$0xff]  ;;  %v488_v30 = vld [vmem:[#allocation2 + $0x110] sm:$0xff]  ;;  %v7931_v34 = vpack.c.bf16 %v785_v28, %v784_v27 }
  0x8d   : > { %426 = vst.msk [vmem:[#allocation2 + $0x141] sm:$0xff] %vm280_vm0, %v7519_v22  ;;  %v800_v31 = vld [vmem:[#allocation2 + $0x109] sm:$0xff]  ;;  %v801_v32 = vld [vmem:[#allocation2 + $0x111] sm:$0xff]  ;;  %v7933_v35 = vpack.c.bf16 %v488_v30, %v487_v29  ;;  %v473_v43 = vld [vmem:[#allocation2 + $0x60] sm:$0xff] }
  0x8e   : > { %v7935_v36 = vpack.c.bf16 %v801_v32, %v800_v31  ;;  %411 = vst.msk [vmem:[#allocation2 + $0x91] sm:$0xff] %vm280_vm0, %v7490_v38  ;;  %v474_v44 = vld [vmem:[#allocation2 + $0x68] sm:$0xff]  ;;  %v7537_v62 = vld [vmem:[%s7791_s30 + $0x30] sm:$0xff]  }
  0x8f   : > { %412 = vst.msk [vmem:[#allocation2 + $0x99] sm:$0xff] %vm280_vm0, %v7491_v39  ;;  %v786_v45 = vld [vmem:[#allocation2 + $0x61] sm:$0xff]  ;;  %v787_v46 = vld [vmem:[#allocation2 + $0x69] sm:$0xff]  ;;  %v7951_v51 = vpack.c.bf16 %v474_v44, %v473_v43  ;;  %v7494_v63 = vunpack.c.l.bf16 %v7537_v62  ;;  %v7495_v0 = vunpack.c.h.bf16 %v7537_v62  ;;  %v7395_v43 = vld [vmem:[%s9646_s1 + $0x118] sm:$0xff] }
  0x90   : > { %427 = vst.msk [vmem:[#allocation2 + $0x151] sm:$0xff] %vm280_vm0, %v7522_v41  ;;  %v489_v47 = vld [vmem:[#allocation2 + $0x120] sm:$0xff]  ;;  %v490_v48 = vld [vmem:[#allocation2 + $0x128] sm:$0xff]  ;;  %v7953_v53 = vpack.c.bf16 %v787_v46, %v786_v45  ;;  %v7545_v1 = vld [vmem:[%s7791_s30 + $0x70] sm:$0xff]   ;;  %3142 = vmatpush.bf16.msra.mxu0 %v7395_v43 }
  0x91   : > { %428 = vst.msk [vmem:[#allocation2 + $0x159] sm:$0xff] %vm280_vm0, %v7523_v42  ;;  %v802_v49 = vld [vmem:[#allocation2 + $0x121] sm:$0xff]  ;;  %v803_v50 = vld [vmem:[#allocation2 + $0x129] sm:$0xff]  ;;  %v7955_v54 = vpack.c.bf16 %v490_v48, %v489_v47  ;;  %v7526_v2 = vunpack.c.l.bf16 %v7545_v1  ;;  %v7527_v3 = vunpack.c.h.bf16 %v7545_v1  ;;  %v475_v4 = vld [vmem:[#allocation2 + $0x78] sm:$0xff] }
  0x92   : > { %v7957_v56 = vpack.c.bf16 %v803_v50, %v802_v49  ;;  %413 = vst.msk [vmem:[#allocation2 + $0xa9] sm:$0xff] %vm280_vm0, %v7494_v63  ;;  %v476_v5 = vld [vmem:[#allocation2 + $0x80] sm:$0xff]  ;;  %v7382_v39 = vld [vmem:[%s9646_s1 + $0xb0] sm:$0xff]  ;;  %v7391_v41 = vld [vmem:[%s9646_s1 + $0xf8] sm:$0xff] }
  0x93   : > { %414 = vst.msk [vmem:[#allocation2 + $0xb1] sm:$0xff] %vm280_vm0, %v7495_v0  ;;  %v788_v6 = vld [vmem:[#allocation2 + $0x79] sm:$0xff]  ;;  %v789_v7 = vld [vmem:[#allocation2 + $0x81] sm:$0xff]  ;;  %v7982_v16 = vpack.c.bf16 %v476_v5, %v475_v4  ;;  %2200 = vmatpush.bf16.msrb.mxu1 %v7382_v39  ;;  %2828 = vmatpush.bf16.msra.mxu3 %v7391_v41 }
  0x94   : > { %429 = vst.msk [vmem:[#allocation2 + $0x169] sm:$0xff] %vm280_vm0, %v7526_v2  ;;  %v491_v8 = vld [vmem:[#allocation2 + $0x138] sm:$0xff]  ;;  %v492_v9 = vld [vmem:[#allocation2 + $0x140] sm:$0xff]  ;;  %v7984_v17 = vpack.c.bf16 %v789_v7, %v788_v6  ;;  %v7381_v42 = vld [vmem:[%s9646_s1 + $0xa8] sm:$0xff] }
  0x95   : > { %6646 = vmatmul.msk.bf16.gmra.mxu1 %vm280_vm0, %v7900_v11  ;;  %430 = vst.msk [vmem:[#allocation2 + $0x171] sm:$0xff] %vm280_vm0, %v7527_v3  ;;  %v804_v14 = vld [vmem:[#allocation2 + $0x139] sm:$0xff]  ;;  %v805_v15 = vld [vmem:[#allocation2 + $0x141] sm:$0xff]  ;;  %v7986_v18 = vpack.c.bf16 %v492_v9, %v491_v8  ;;  %v477_v21 = vld [vmem:[#allocation2 + $0x90] sm:$0xff] }
  0x96   : > { %6606 = vmatmul.msk.bf16.gmra.mxu0 %vm280_vm0, %v7898_v10  ;;  %v7988_v19 = vpack.c.bf16 %v805_v15, %v804_v14  ;;  %v478_v22 = vld [vmem:[#allocation2 + $0x98] sm:$0xff]  ;;  %v7380_v44 = vld [vmem:[%s9646_s1 + $0xa0] sm:$0xff]  ;;  %v1093_v6 = vld [vmem:[#allocation2 + $0xa] sm:$0xff] }
  0x97   : > { %6654 = vmatmul.msk.bf16.gmra.mxu3 %vm280_vm0, %v7904_v13  ;;  %v790_v25 = vld [vmem:[#allocation2 + $0x91] sm:$0xff]  ;;  %v791_v26 = vld [vmem:[#allocation2 + $0x99] sm:$0xff]  ;;  %v8001_v31 = vpack.c.bf16 %v478_v22, %v477_v21  ;;  %2201 = vmatpush.bf16.msrb.mxu1 %v7381_v42  ;;  %v2035_v3 = vld [vmem:[#allocation2 + $0x22] sm:$0xff] }
  0x98   : > { %6614 = vmatmul.msk.bf16.gmra.mxu2 %vm280_vm0, %v7902_v12  ;;  %v493_v27 = vld [vmem:[#allocation2 + $0x150] sm:$0xff]  ;;  %v494_v28 = vld [vmem:[#allocation2 + $0x158] sm:$0xff]  ;;  %v8003_v32 = vpack.c.bf16 %v791_v26, %v790_v25  ;;  %v634_v1 = vpop.f32.mrf.mxu0  ;;  %v1092_v5 = vld [vmem:[#allocation2 + $0x2] sm:$0xff] }
  0x99   : > { %v806_v29 = vld [vmem:[#allocation2 + $0x151] sm:$0xff]  ;;  %v807_v30 = vld [vmem:[#allocation2 + $0x159] sm:$0xff]  ;;  %v8005_v37 = vpack.c.bf16 %v494_v28, %v493_v27  ;;  %v479_v45 = vld [vmem:[#allocation2 + $0xa8] sm:$0xff]  ;;  %v1156_v9 = vpack.c.bf16 %v1093_v6, %v1092_v5 }
  0x9a   : > { %v8007_v38 = vpack.c.bf16 %v807_v30, %v806_v29  ;;  %v480_v46 = vld [vmem:[#allocation2 + $0xb0] sm:$0xff]  ;;  %v2034_v2 = vld [vmem:[#allocation2 + $0x1a] sm:$0xff] }
  0x9b   : > { %v792_v47 = vld [vmem:[#allocation2 + $0xa9] sm:$0xff]  ;;  %v793_v48 = vld [vmem:[#allocation2 + $0xb1] sm:$0xff]  ;;  %2202 = vmatpush.bf16.msrb.mxu1 %v7380_v44  ;;  %v8035_v61 = vpack.c.bf16 %v480_v46, %v479_v45  ;;  %v2098_v8 = vpack.c.bf16 %v2035_v3, %v2034_v2  ;;  %v2037_v29 = vld [vmem:[#allocation2 + $0x3a] sm:$0xff] }
  0x9c   : > { %v495_v49 = vld [vmem:[#allocation2 + $0x168] sm:$0xff]  ;;  %v496_v50 = vld [vmem:[#allocation2 + $0x170] sm:$0xff]  ;;  %v8037_v62 = vpack.c.bf16 %v793_v48, %v792_v47 }
  0x9d   : > { %v808_v57 = vld [vmem:[#allocation2 + $0x169] sm:$0xff]  ;;  %v809_v60 = vld [vmem:[#allocation2 + $0x171] sm:$0xff]  ;;  %v8039_v63 = vpack.c.bf16 %v496_v50, %v495_v49 }
  0x9e   : > { %v8041_v0 = vpack.c.bf16 %v809_v60, %v808_v57  ;;  %v2038_v47 = vld [vmem:[#allocation2 + $0x4a] sm:$0xff]  ;;  %v2039_v48 = vld [vmem:[#allocation2 + $0x52] sm:$0xff] }
  0x9f   : > { %v8080_v49 = vpack.c.bf16 %v2039_v48, %v2038_v47  ;;  %v7390_v3 = vld [vmem:[%s9646_s1 + $0xf0] sm:$0xff]  ;;  %v2042_v48 = vld [vmem:[#allocation2 + $0x7a] sm:$0xff] }
  0xa0   : > { %v636_v21 = vpop.f32.mrf.mxu0  ;;  %2829 = vmatpush.bf16.msra.mxu3 %v7390_v3 }
  0xa5   : > { %6647 = vmatmul.msk.bf16.gmra.mxu1 %vm280_vm0, %v7931_v34 }
  0xa6   : > { %6607 = vmatmul.msk.bf16.gmra.mxu0 %vm280_vm0, %v7929_v33 }
  0xa7   : > { %6655 = vmatmul.msk.bf16.gmra.mxu3 %vm280_vm0, %v7935_v36 }
  0xa8   : > { %6615 = vmatmul.msk.bf16.gmra.mxu2 %vm280_vm0, %v7933_v35 }
  0xb5   : > { %6648 = vmatmul.msk.bf16.gmra.mxu1 %vm280_vm0, %v7953_v53 }
  0xb6   : > { %6608 = vmatmul.msk.bf16.gmra.mxu0 %vm280_vm0, %v7951_v51 }
  0xb7   : > { %6656 = vmatmul.msk.bf16.gmra.mxu3 %vm280_vm0, %v7957_v56 }
  0xb8   : > { %6616 = vmatmul.msk.bf16.gmra.mxu2 %vm280_vm0, %v7955_v54 }
  0xc5   : > { %6649 = vmatmul.msk.bf16.gmra.mxu1 %vm280_vm0, %v7984_v17 }
  0xc6   : > { %6609 = vmatmul.msk.bf16.gmra.mxu0 %vm280_vm0, %v7982_v16 }
  0xc7   : > { %6657 = vmatmul.msk.bf16.gmra.mxu3 %vm280_vm0, %v7988_v19 }
  0xc8   : > { %6617 = vmatmul.msk.bf16.gmra.mxu2 %vm280_vm0, %v7986_v18 }
  0xd5   : > { %6650 = vmatmul.msk.bf16.gmra.mxu1 %vm280_vm0, %v8003_v32 }
  0xd6   : > { %6610 = vmatmul.msk.bf16.gmra.mxu0 %vm280_vm0, %v8001_v31 }
  0xd7   : > { %6658 = vmatmul.msk.bf16.gmra.mxu3 %vm280_vm0, %v8007_v38 }
  0xd8   : > { %6618 = vmatmul.msk.bf16.gmra.mxu2 %vm280_vm0, %v8005_v37 }
  0xe5   : > { %6651 = vmatmul.msk.bf16.gmra.mxu1 %vm280_vm0, %v8037_v62 }
  0xe6   : > { %6611 = vmatmul.msk.bf16.gmra.mxu0 %vm280_vm0, %v8035_v61 }
  0xe7   : > { %6659 = vmatmul.msk.bf16.gmra.mxu3 %vm280_vm0, %v8041_v0 }
  0xe8   : > { %6619 = vmatmul.msk.bf16.gmra.mxu2 %vm280_vm0, %v8039_v63 }
  0xf1   : > { %v948_v4 = vpop.f32.mrf.mxu1 }
  0xf2   : > { %v8051_v7 = vadd.f32 %v948_v4, %v634_v1 }
  0xf5   : > { %v988_v15 = vpop.f32.mrf.mxu3  ;;  %6804 = vmatmul.msk.bf16.vlgmr.msrb.gmra.mxu1 %vm280_vm0, %v2098_v8 }
  0xf6   : > { %6764 = vmatmul.msk.bf16.vlgmr.msrb.gmra.mxu0 %vm280_vm0, %v7875_v55  ;;  %v674_v14 = vpop.f32.mrf.mxu2  ;;  %v2036_v55 = vld [vmem:[#allocation2 + $0x32] sm:$0xff] }
  0xf7   : > { %v8056_v20 = vadd.f32 %v988_v15, %v674_v14  ;;  %6724 = vmatmul.msk.bf16.vlgmr.msrb.gmra.mxu3 %vm280_vm0, %v7873_v52  ;;  %v8065_v30 = vpack.c.bf16 %v2037_v29, %v2036_v55  ;;  %v2040_v14 = vld [vmem:[#allocation2 + $0x62] sm:$0xff]  ;;  %v2041_v15 = vld [vmem:[#allocation2 + $0x6a] sm:$0xff] }
  0xf8   : > { %6684 = vmatmul.msk.bf16.vlgmr.msrb.gmra.mxu2 %vm280_vm0, %v1156_v9 }
  0xf9   : > { %v950_v22 = vpop.f32.mrf.mxu1 }
  0xfa   : > { %v8061_v25 = vadd.f32 %v950_v22, %v636_v21  ;;  %v8107_v21 = vpack.c.bf16 %v2041_v15, %v2040_v14  ;;  %v2044_v15 = vld [vmem:[#allocation2 + $0x92] sm:$0xff] }
  0xfd   : > { %v990_v27 = vpop.f32.mrf.mxu3 }
  0xfe   : > { %v676_v26 = vpop.f32.mrf.mxu2 }
  0xff   : > { %v8063_v28 = vadd.f32 %v990_v27, %v676_v26 }
 0x102   : > { %v953_v40 = vpop.f32.mrf.mxu1 }
 0x103   : > { %v639_v39 = vpop.f32.mrf.mxu0 }
 0x104   : > { %v8067_v41 = vadd.f32 %v953_v40, %v639_v39 }
 0x105   : > { %6805 = vmatmul.msk.bf16.gmra.mxu1 %vm280_vm0, %v8065_v30 }
 0x106   : > { %6765 = vmatmul.msk.bf16.gmra.mxu0 %vm280_vm0, %v7900_v11 }
 0x107   : > { %6725 = vmatmul.msk.bf16.gmra.mxu3 %vm280_vm0, %v7898_v10  ;;  %v7386_v10 = vld [vmem:[%s9646_s1 + $0xd0] sm:$0xff] }
 0x108   : > { %6685 = vmatmul.msk.bf16.gmra.mxu2 %vm280_vm0, %v2098_v8 }
 0x109   : > { %2515 = vmatpush.bf16.msra.mxu2 %v7386_v10 }
 0x10a   : > { %v993_v42 = vpop.f32.mrf.mxu3  ;;  %v955_v45 = vpop.f32.mrf.mxu1 }
 0x10b   : > { %v679_v52 = vpop.f32.mrf.mxu2  ;;  %v641_v44 = vpop.f32.mrf.mxu0 }
 0x10c   : > { %v8076_v43 = vadd.f32 %v993_v42, %v679_v52  ;;  %v8078_v46 = vadd.f32 %v955_v45, %v641_v44 }
 0x112   : > { %v995_v50 = vpop.f32.mrf.mxu3  ;;  %v958_v1 = vpop.f32.mrf.mxu1 }
 0x113   : > { %v681_v11 = vpop.f32.mrf.mxu2  ;;  %v644_v60 = vpop.f32.mrf.mxu0 }
 0x114   : > { %v8082_v57 = vadd.f32 %v995_v50, %v681_v11  ;;  %v8084_v2 = vadd.f32 %v958_v1, %v644_v60  ;;  %v2043_v11 = vld [vmem:[#allocation2 + $0x82] sm:$0xff] }
 0x115   : > { %6806 = vmatmul.msk.bf16.gmra.mxu1 %vm280_vm0, %v8080_v49 }
 0x116   : > { %6766 = vmatmul.msk.bf16.gmra.mxu0 %vm280_vm0, %v7931_v34 }
 0x117   : > { %6726 = vmatmul.msk.bf16.gmra.mxu3 %vm280_vm0, %v7929_v33  ;;  %v7394_v33 = vld [vmem:[%s9646_s1 + $0x110] sm:$0xff] }
 0x118   : > { %6686 = vmatmul.msk.bf16.gmra.mxu2 %vm280_vm0, %v8065_v30  ;;  %3143 = vmatpush.bf16.msra.mxu0 %v7394_v33 }
 0x11a   : > { %v998_v4 = vpop.f32.mrf.mxu3  ;;  %v960_v8 = vpop.f32.mrf.mxu1 }
 0x11b   : > { %v684_v34 = vpop.f32.mrf.mxu2  ;;  %v646_v6 = vpop.f32.mrf.mxu0 }
 0x11c   : > { %v8100_v5 = vadd.f32 %v998_v4, %v684_v34  ;;  %v8102_v9 = vadd.f32 %v960_v8, %v646_v6 }
 0x122   : > { %v1000_v26 = vpop.f32.mrf.mxu3  ;;  %v963_v29 = vpop.f32.mrf.mxu1 }
 0x123   : > { %v686_v22 = vpop.f32.mrf.mxu2  ;;  %v649_v55 = vpop.f32.mrf.mxu0 }
 0x124   : > { %v8109_v27 = vadd.f32 %v1000_v26, %v686_v22  ;;  %v8111_v39 = vadd.f32 %v963_v29, %v649_v55  ;;  %v2045_v22 = vld [vmem:[#allocation2 + $0x9a] sm:$0xff] }
 0x125   : > { %6807 = vmatmul.msk.bf16.gmra.mxu1 %vm280_vm0, %v8107_v21 }
 0x126   : > { %6767 = vmatmul.msk.bf16.gmra.mxu0 %vm280_vm0, %v7953_v53  ;;  %v8125_v53 = vpack.c.bf16 %v2043_v11, %v2042_v48 }
 0x127   : > { %6727 = vmatmul.msk.bf16.gmra.mxu3 %vm280_vm0, %v7951_v51 }
 0x128   : > { %6687 = vmatmul.msk.bf16.gmra.mxu2 %vm280_vm0, %v8080_v49 }
 0x12a   : > { %v1003_v52 = vpop.f32.mrf.mxu3  ;;  %v965_v45 = vpop.f32.mrf.mxu1 }
 0x12b   : > { %v689_v40 = vpop.f32.mrf.mxu2  ;;  %v651_v44 = vpop.f32.mrf.mxu0 }
 0x12c   : > { %v8121_v42 = vadd.f32 %v1003_v52, %v689_v40  ;;  %v8123_v47 = vadd.f32 %v965_v45, %v651_v44 }
 0x132   : > { %v1005_v60 = vpop.f32.mrf.mxu3  ;;  %v968_v3 = vpop.f32.mrf.mxu1 }
 0x133   : > { %v691_v50 = vpop.f32.mrf.mxu2  ;;  %v654_v10 = vpop.f32.mrf.mxu0 }
 0x134   : > { %v8127_v1 = vadd.f32 %v1005_v60, %v691_v50  ;;  %v8129_v34 = vadd.f32 %v968_v3, %v654_v10  ;;  %v2046_v10 = vld [vmem:[#allocation2 + $0xaa] sm:$0xff]  ;;  %v2047_v3 = vld [vmem:[#allocation2 + $0xb2] sm:$0xff] }
 0x135   : > { %6808 = vmatmul.msk.bf16.gmra.mxu1 %vm280_vm0, %v8125_v53 }
 0x136   : > { %6768 = vmatmul.msk.bf16.gmra.mxu0 %vm280_vm0, %v7984_v17  ;;  %v8143_v17 = vpack.c.bf16 %v2045_v22, %v2044_v15 }
 0x137   : > { %6728 = vmatmul.msk.bf16.gmra.mxu3 %vm280_vm0, %v7982_v16 }
 0x138   : > { %6688 = vmatmul.msk.bf16.gmra.mxu2 %vm280_vm0, %v8107_v21 }
 0x13a   : > { %v1008_v4 = vpop.f32.mrf.mxu3  ;;  %v970_v33 = vpop.f32.mrf.mxu1 }
 0x13b   : > { %v694_v51 = vpop.f32.mrf.mxu2  ;;  %v656_v8 = vpop.f32.mrf.mxu0 }
 0x13c   : > { %v8139_v6 = vadd.f32 %v1008_v4, %v694_v51  ;;  %v8141_v14 = vadd.f32 %v970_v33, %v656_v8 }
 0x142   : > { %v1010_v55 = vpop.f32.mrf.mxu3  ;;  %v973_v52 = vpop.f32.mrf.mxu1 }
 0x143   : > { %v696_v26 = vpop.f32.mrf.mxu2  ;;  %v659_v40 = vpop.f32.mrf.mxu0 }
 0x144   : > { %v8145_v29 = vadd.f32 %v1010_v55, %v696_v26  ;;  %v8147_v44 = vadd.f32 %v973_v52, %v659_v40  ;;  %v7389_v26 = vld [vmem:[%s9646_s1 + $0xe8] sm:$0xff] }
 0x145   : > { %6809 = vmatmul.msk.bf16.gmra.mxu1 %vm280_vm0, %v8143_v17  ;;  %2830 = vmatpush.bf16.msra.mxu3 %v7389_v26 }
 0x146   : > { %6769 = vmatmul.msk.bf16.gmra.mxu0 %vm280_vm0, %v8003_v32  ;;  %v8161_v32 = vpack.c.bf16 %v2047_v3, %v2046_v10  ;;  %v7393_v10 = vld [vmem:[%s9646_s1 + $0x108] sm:$0xff] }
 0x147   : > { %6729 = vmatmul.msk.bf16.gmra.mxu3 %vm280_vm0, %v8001_v31  ;;  %v7385_v31 = vld [vmem:[%s9646_s1 + $0xc8] sm:$0xff]  ;;  %3144 = vmatpush.bf16.msra.mxu0 %v7393_v10 }
 0x148   : > { %6689 = vmatmul.msk.bf16.gmra.mxu2 %vm280_vm0, %v8125_v53  ;;  %v2051_v10 = vld [vmem:[#allocation2 + $0xe2] sm:$0xff] }
 0x149   : > { %2516 = vmatpush.bf16.msra.mxu2 %v7385_v31 }
 0x14a   : > { %v1013_v45 = vpop.f32.mrf.mxu3  ;;  %v975_v50 = vpop.f32.mrf.mxu1 }
 0x14b   : > { %v699_v16 = vpop.f32.mrf.mxu2  ;;  %v661_v11 = vpop.f32.mrf.mxu0 }
 0x14c   : > { %v8157_v48 = vadd.f32 %v1013_v45, %v699_v16  ;;  %v8159_v60 = vadd.f32 %v975_v50, %v661_v11  ;;  %v2048_v11 = vld [vmem:[#allocation2 + $0xc2] sm:$0xff] }
 0x14e   : > { %9654 = vst [vmem:[#allocation5_spill] sm:$0xff] %v8157_v48 }
 0x152   : > { %v1015_v4 = vpop.f32.mrf.mxu3  ;;  %v978_v15 = vpop.f32.mrf.mxu1 }
 0x153   : > { %v701_v51 = vpop.f32.mrf.mxu2  ;;  %v664_v33 = vpop.f32.mrf.mxu0 }
 0x154   : > { %v8163_v8 = vadd.f32 %v1015_v4, %v701_v51  ;;  %v8165_v22 = vadd.f32 %v978_v15, %v664_v33 }
 0x155   : > { %6810 = vmatmul.msk.bf16.gmra.mxu1 %vm280_vm0, %v8161_v32 }
 0x156   : > { %9655 = vst [vmem:[#allocation6_spill] sm:$0xff] %v8163_v8  ;;  %6770 = vmatmul.msk.bf16.gmra.mxu0 %vm280_vm0, %v8037_v62 }
 0x157   : > { %6730 = vmatmul.msk.bf16.gmra.mxu3 %vm280_vm0, %v8035_v61  ;;  %v2049_v61 = vld [vmem:[#allocation2 + $0xca] sm:$0xff] }
 0x158   : > { %6690 = vmatmul.msk.bf16.gmra.mxu2 %vm280_vm0, %v8143_v17  ;;  %v8185_v50 = vpack.c.bf16 %v2049_v61, %v2048_v11  ;;  %v2050_v61 = vld [vmem:[#allocation2 + $0xda] sm:$0xff] }
 0x15a   : > { %v1018_v55 = vpop.f32.mrf.mxu3  ;;  %v980_v16 = vpop.f32.mrf.mxu1  ;;  %9657 = vst [vmem:[#allocation8_spill] sm:$0xff] %v8185_v50 }
 0x15b   : > { %v704_v62 = vpop.f32.mrf.mxu2  ;;  %v666_v52 = vpop.f32.mrf.mxu0 }
 0x15c   : > { %v8181_v40 = vadd.f32 %v1018_v55, %v704_v62  ;;  %v8183_v45 = vadd.f32 %v980_v16, %v666_v52 }
 0x15e   : > { %9656 = vst [vmem:[#allocation7_spill] sm:$0xff] %v8181_v40 }
 0x162   : > { %v1020_v51 = vpop.f32.mrf.mxu3  ;;  %v983_v15 = vpop.f32.mrf.mxu1 }
 0x163   : > { %v706_v3 = vpop.f32.mrf.mxu2  ;;  %v669_v33 = vpop.f32.mrf.mxu0 }
 0x164   : > { %v8190_v4 = vadd.f32 %v1020_v51, %v706_v3  ;;  %v8192_v31 = vadd.f32 %v983_v15, %v669_v33  ;;  %v8209_v3 = vpack.c.bf16 %v2051_v10, %v2050_v61 }
 0x165   : > { %6811 = vmatmul.msk.bf16.gmra.mxu1 %vm280_vm0, %v8185_v50 }
 0x166   : > { %9658 = vst [vmem:[#allocation9_spill] sm:$0xff] %v8190_v4  ;;  %6771 = vmatmul.msk.bf16.gmra.mxu0 %vm280_vm0, %v7824_v24  ;;  %v7403_v24 = vld [vmem:[%s9649_s4 + $0x38] sm:$0xff] }
 0x167   : > { %6731 = vmatmul.msk.bf16.gmra.mxu3 %vm280_vm0, %v7820_v23  ;;  %3754 = vmatpush.bf16.msra.mxu1 %v7403_v24 }
 0x168   : > { %6691 = vmatmul.msk.bf16.gmra.mxu2 %vm280_vm0, %v8161_v32 }
 0x16a   : > { %v1023_v62 = vpop.f32.mrf.mxu3  ;;  %v985_v16 = vpop.f32.mrf.mxu1 }
 0x16b   : > { %v709_v26 = vpop.f32.mrf.mxu2  ;;  %v671_v52 = vpop.f32.mrf.mxu0 }
 0x16c   : > { %v8202_v55 = vadd.f32 %v1023_v62, %v709_v26  ;;  %v8204_v11 = vadd.f32 %v985_v16, %v671_v52 }
 0x16e   : > { %9659 = vst [vmem:[#allocation10_spill] sm:$0xff] %v8202_v55 }
 0x172   : > { %v1025_v33 = vpop.f32.mrf.mxu3  ;;  %v2204_v26 = vpop.f32.mrf.mxu1 }
 0x173   : > { %v711_v51 = vpop.f32.mrf.mxu2  ;;  %v1890_v15 = vpop.f32.mrf.mxu0 }
 0x174   : > { %v8211_v23 = vadd.f32 %v1025_v33, %v711_v51  ;;  %v2052_v51 = vld [vmem:[#allocation2 + $0xf2] sm:$0xff]  ;;  %v2053_v33 = vld [vmem:[#allocation2 + $0xfa] sm:$0xff] }
 0x175   : > { %6812 = vmatmul.msk.bf16.gmra.mxu1 %vm280_vm0, %v8209_v3  ;;  %v8224_v55 = vpack.c.bf16 %v2053_v33, %v2052_v51 }
 0x176   : > { %9660 = vst [vmem:[#allocation11_spill] sm:$0xff] %v8211_v23  ;;  %6772 = vmatmul.msk.bf16.gmra.mxu0 %vm280_vm0, %v7883_v59 }
 0x177   : > { %6732 = vmatmul.msk.bf16.gmra.mxu3 %vm280_vm0, %v7881_v58 }
 0x178   : > { %6692 = vmatmul.msk.bf16.gmra.mxu2 %vm280_vm0, %v8185_v50 }
 0x17a   : > { %v1576_v52 = vpop.f32.mrf.mxu3  ;;  %v2206_v61 = vpop.f32.mrf.mxu1 }
 0x17b   : > { %v1262_v62 = vpop.f32.mrf.mxu2  ;;  %v1892_v24 = vpop.f32.mrf.mxu0 }
 0x17c   : > { %v1342_v16 = vadd.f32 %v1262_v62, %v8051_v7  ;;  %v2054_v62 = vld [vmem:[#allocation2 + $0x10a] sm:$0xff] }
 0x17e   : > { %v1656_v10 = vadd.f32 %v1576_v52, %v1342_v16  ;;  %v2055_v52 = vld [vmem:[#allocation2 + $0x112] sm:$0xff] }
 0x180   : > { %v1970_v23 = vadd.f32 %v1890_v15, %v1656_v10 }
 0x182   : > { %v8222_v59 = vadd.f32 %v2204_v26, %v1970_v23  ;;  %v1578_v40 = vpop.f32.mrf.mxu3  ;;  %v2209_v58 = vpop.f32.mrf.mxu1 }
 0x183   : > { %v1264_v4 = vpop.f32.mrf.mxu2  ;;  %v1895_v8 = vpop.f32.mrf.mxu0 }
 0x184   : > { %v1343_v50 = vadd.f32 %v1264_v4, %v8061_v25 }
 0x185   : > { %6813 = vmatmul.msk.bf16.gmra.mxu1 %vm280_vm0, %v8224_v55 }
 0x186   : > { %v1657_v48 = vadd.f32 %v1578_v40, %v1343_v50  ;;  %6773 = vmatmul.msk.bf16.gmra.mxu0 %vm280_vm0, %v7904_v13  ;;  %v7402_v13 = vld [vmem:[%s9649_s4 + $0x30] sm:$0xff] }
 0x187   : > { %6733 = vmatmul.msk.bf16.gmra.mxu3 %vm280_vm0, %v7902_v12  ;;  %3755 = vmatpush.bf16.msra.mxu1 %v7402_v13  ;;  %v8243_v12 = vpack.c.bf16 %v2055_v52, %v2054_v62  ;;  %v2057_v13 = vld [vmem:[#allocation2 + $0x12a] sm:$0xff] }
 0x188   : > { %6693 = vmatmul.msk.bf16.gmra.mxu2 %vm280_vm0, %v8209_v3  ;;  %v1971_v7 = vadd.f32 %v1892_v24, %v1657_v48 }
 0x18a   : > { %v8235_v23 = vadd.f32 %v2206_v61, %v1971_v7  ;;  %v1581_v25 = vpop.f32.mrf.mxu3  ;;  %v2211_v50 = vpop.f32.mrf.mxu1 }
 0x18b   : > { %v1267_v15 = vpop.f32.mrf.mxu2  ;;  %v1897_v40 = vpop.f32.mrf.mxu0 }
 0x18c   : > { %v1344_v4 = vadd.f32 %v1267_v15, %v8067_v41 }
 0x18e   : > { %v1658_v26 = vadd.f32 %v1581_v25, %v1344_v4 }
 0x190   : > { %v1972_v16 = vadd.f32 %v1895_v8, %v1658_v26 }
 0x192   : > { %v8241_v10 = vadd.f32 %v2209_v58, %v1972_v16  ;;  %v1583_v24 = vpop.f32.mrf.mxu3  ;;  %v2214_v51 = vpop.f32.mrf.mxu1  ;;  %v7392_v16 = vld [vmem:[%s9646_s1 + $0x100] sm:$0xff] }
 0x193   : > { %v1269_v48 = vpop.f32.mrf.mxu2  ;;  %v1900_v41 = vpop.f32.mrf.mxu0  ;;  %3145 = vmatpush.bf16.msra.mxu0 %v7392_v16 }
 0x194   : > { %v1345_v61 = vadd.f32 %v1269_v48, %v8078_v46  ;;  %v7384_v46 = vld [vmem:[%s9646_s1 + $0xc0] sm:$0xff] }
 0x195   : > { %6814 = vmatmul.msk.bf16.gmra.mxu1 %vm280_vm0, %v8243_v12  ;;  %2517 = vmatpush.bf16.msra.mxu2 %v7384_v46 }
 0x196   : > { %v1659_v33 = vadd.f32 %v1583_v24, %v1345_v61  ;;  %6774 = vmatmul.msk.bf16.gmra.mxu0 %vm280_vm0, %v7935_v36  ;;  %v7388_v36 = vld [vmem:[%s9646_s1 + $0xe0] sm:$0xff] }
 0x197   : > { %6734 = vmatmul.msk.bf16.gmra.mxu3 %vm280_vm0, %v7933_v35 }
 0x198   : > { %6694 = vmatmul.msk.bf16.gmra.mxu2 %vm280_vm0, %v8224_v55  ;;  %v1973_v8 = vadd.f32 %v1897_v40, %v1659_v33  ;;  %2831 = vmatpush.bf16.msra.mxu3 %v7388_v36  ;;  %v2056_v40 = vld [vmem:[#allocation2 + $0x122] sm:$0xff] }
 0x19a   : > { %v8257_v58 = vadd.f32 %v2211_v50, %v1973_v8  ;;  %v1586_v15 = vpop.f32.mrf.mxu3  ;;  %v2216_v26 = vpop.f32.mrf.mxu1  ;;  %v8265_v50 = vpack.c.bf16 %v2057_v13, %v2056_v40  ;;  %v2059_v40 = vld [vmem:[#allocation2 + $0x142] sm:$0xff] }
 0x19b   : > { %v1272_v7 = vpop.f32.mrf.mxu2  ;;  %v1902_v4 = vpop.f32.mrf.mxu0 }
 0x19c   : > { %v1346_v25 = vadd.f32 %v1272_v7, %v8084_v2 }
 0x19e   : > { %v1660_v35 = vadd.f32 %v1586_v15, %v1346_v25 }
 0x1a0   : > { %v1974_v62 = vadd.f32 %v1900_v41, %v1660_v35  ;;  %v2058_v35 = vld [vmem:[#allocation2 + $0x13a] sm:$0xff] }
 0x1a2   : > { %v8263_v52 = vadd.f32 %v2214_v51, %v1974_v62  ;;  %v1588_v24 = vpop.f32.mrf.mxu3  ;;  %v2219_v33 = vpop.f32.mrf.mxu1 }
 0x1a3   : > { %v1274_v48 = vpop.f32.mrf.mxu2  ;;  %v1905_v2 = vpop.f32.mrf.mxu0 }
 0x1a4   : > { %v1347_v61 = vadd.f32 %v1274_v48, %v8102_v9 }
 0x1a5   : > { %6815 = vmatmul.msk.bf16.gmra.mxu1 %vm280_vm0, %v8265_v50 }
 0x1a6   : > { %v1661_v8 = vadd.f32 %v1588_v24, %v1347_v61  ;;  %6775 = vmatmul.msk.bf16.gmra.mxu0 %vm280_vm0, %v7957_v56  ;;  %v7401_v56 = vld [vmem:[%s9649_s4 + $0x28] sm:$0xff] }
 0x1a7   : > { %6735 = vmatmul.msk.bf16.gmra.mxu3 %vm280_vm0, %v7955_v54  ;;  %3756 = vmatpush.bf16.msra.mxu1 %v7401_v56  ;;  %v2060_v56 = vld [vmem:[#allocation2 + $0x152] sm:$0xff] }
 0x1a8   : > { %6695 = vmatmul.msk.bf16.gmra.mxu2 %vm280_vm0, %v8243_v12  ;;  %v1975_v41 = vadd.f32 %v1902_v4, %v1661_v8  ;;  %v8287_v4 = vpack.c.bf16 %v2059_v40, %v2058_v35 }
 0x1aa   : > { %v8279_v51 = vadd.f32 %v2216_v26, %v1975_v41  ;;  %v1591_v46 = vpop.f32.mrf.mxu3  ;;  %v2221_v15 = vpop.f32.mrf.mxu1 }
 0x1ab   : > { %v1277_v9 = vpop.f32.mrf.mxu2  ;;  %v1907_v7 = vpop.f32.mrf.mxu0 }
 0x1ac   : > { %v1348_v36 = vadd.f32 %v1277_v9, %v8111_v39 }
 0x1ae   : > { %v1662_v25 = vadd.f32 %v1591_v46, %v1348_v36 }
 0x1b0   : > { %v1976_v13 = vadd.f32 %v1905_v2, %v1662_v25 }
 0x1b2   : > { %v8285_v54 = vadd.f32 %v2219_v33, %v1976_v13  ;;  %v1593_v62 = vpop.f32.mrf.mxu3  ;;  %v2224_v48 = vpop.f32.mrf.mxu1  ;;  %v7546_v33 = vld [vmem:[%s7791_s30 + $0x78] sm:$0xff]  }
 0x1b3   : > { %v1279_v26 = vpop.f32.mrf.mxu2  ;;  %v1910_v16 = vpop.f32.mrf.mxu0  ;;  %v7530_v41 = vunpack.c.l.bf16 %v7546_v33  ;;  %v7531_v9 = vunpack.c.h.bf16 %v7546_v33 }
 0x1b4   : > { %v1349_v39 = vadd.f32 %v1279_v26, %v8123_v47 }
 0x1b5   : > { %6816 = vmatmul.msk.bf16.gmra.mxu1 %vm280_vm0, %v8287_v4  ;;  %431 = vst.msk [vmem:[#allocation2 + $0x181] sm:$0xff] %vm280_vm0, %v7530_v41  ;;  %v2063_v41 = vld [vmem:[#allocation2 + $0x172] sm:$0xff] }
 0x1b6   : > { %v1663_v24 = vadd.f32 %v1593_v62, %v1349_v39  ;;  %6776 = vmatmul.msk.bf16.gmra.mxu0 %vm280_vm0, %v7988_v19  ;;  %432 = vst.msk [vmem:[#allocation2 + $0x189] sm:$0xff] %vm280_vm0, %v7531_v9 }
 0x1b7   : > { %6736 = vmatmul.msk.bf16.gmra.mxu3 %vm280_vm0, %v7986_v18  ;;  %v2061_v18 = vld [vmem:[#allocation2 + $0x15a] sm:$0xff] }
 0x1b8   : > { %6696 = vmatmul.msk.bf16.gmra.mxu2 %vm280_vm0, %v8265_v50  ;;  %v1977_v61 = vadd.f32 %v1907_v7, %v1663_v24  ;;  %v8308_v35 = vpack.c.bf16 %v2061_v18, %v2060_v56 }
 0x1ba   : > { %v8298_v2 = vadd.f32 %v2221_v15, %v1977_v61  ;;  %v1596_v8 = vpop.f32.mrf.mxu3  ;;  %v8302_v36 = vpop.f32.mrf.mxu1 }
 0x1bb   : > { %v1282_v47 = vpop.f32.mrf.mxu2  ;;  %v1912_v19 = vpop.f32.mrf.mxu0 }
 0x1bc   : > { %v1350_v46 = vadd.f32 %v1282_v47, %v8129_v34 }
 0x1be   : > { %v1664_v25 = vadd.f32 %v1596_v8, %v1350_v46  ;;  %v2062_v8 = vld [vmem:[#allocation2 + $0x16a] sm:$0xff] }
 0x1c0   : > { %v1978_v7 = vadd.f32 %v1910_v16, %v1664_v25 }
 0x1c2   : > { %v8306_v15 = vadd.f32 %v2224_v48, %v1978_v7  ;;  %v1598_v13 = vpop.f32.mrf.mxu3  ;;  %v2229_v62 = vpop.f32.mrf.mxu1 }
 0x1c3   : > { %v1284_v40 = vpop.f32.mrf.mxu2  ;;  %v1915_v34 = vpop.f32.mrf.mxu0 }
 0x1c4   : > { %v1351_v26 = vadd.f32 %v1284_v40, %v8141_v14 }
 0x1c5   : > { %6817 = vmatmul.msk.bf16.gmra.mxu1 %vm280_vm0, %v8308_v35 }
 0x1c6   : > { %v1665_v39 = vadd.f32 %v1598_v13, %v1351_v26  ;;  %6777 = vmatmul.msk.bf16.gmra.mxu0 %vm280_vm0, %v8007_v38  ;;  %v7400_v38 = vld [vmem:[%s9649_s4 + $0x20] sm:$0xff] }
 0x1c7   : > { %6737 = vmatmul.msk.bf16.gmra.mxu3 %vm280_vm0, %v8005_v37  ;;  %3757 = vmatpush.bf16.msra.mxu1 %v7400_v38  ;;  %v2112_v37 = vpack.c.bf16 %v2063_v41, %v2062_v8  ;;  %v1436_v38 = vld [vmem:[#allocation2 + $0x180] sm:$0xff]  ;;  %v1437_v8 = vld [vmem:[#allocation2 + $0x188] sm:$0xff] }
 0x1c8   : > { %6697 = vmatmul.msk.bf16.gmra.mxu2 %vm280_vm0, %v8287_v4  ;;  %v8319_v16 = vadd.f32 %v1912_v19, %v1665_v39 }
 0x1ca   : > { %v1601_v24 = vpop.f32.mrf.mxu3  ;;  %v8322_v33 = vpop.f32.mrf.mxu1 }
 0x1cb   : > { %v1287_v48 = vpop.f32.mrf.mxu2  ;;  %v1917_v61 = vpop.f32.mrf.mxu0 }
 0x1cc   : > { %v1352_v14 = vadd.f32 %v1287_v48, %v8147_v44  ;;  %v1750_v48 = vld [vmem:[#allocation2 + $0x181] sm:$0xff] }
 0x1ce   : > { %v1666_v47 = vadd.f32 %v1601_v24, %v1352_v14  ;;  %v2064_v24 = vld [vmem:[#allocation2 + $0x182] sm:$0xff]  ;;  %v2065_v14 = vld [vmem:[#allocation2 + $0x18a] sm:$0xff] }
 0x1d0   : > { %v1980_v9 = vadd.f32 %v1915_v34, %v1666_v47 }
 0x1d2   : > { %v8327_v46 = vadd.f32 %v2229_v62, %v1980_v9  ;;  %v1603_v25 = vpop.f32.mrf.mxu3  ;;  %v2234_v18 = vpop.f32.mrf.mxu1 }
 0x1d3   : > { %v1289_v19 = vpop.f32.mrf.mxu2  ;;  %v1920_v44 = vpop.f32.mrf.mxu0 }
 0x1d4   : > { %v1353_v56 = vadd.f32 %v1289_v19, %v8159_v60 }
 0x1d5   : > { %6818 = vmatmul.msk.bf16.gmra.mxu1 %vm280_vm0, %v2112_v37 }
 0x1d6   : > { %v1667_v7 = vadd.f32 %v1603_v25, %v1353_v56  ;;  %6778 = vmatmul.msk.bf16.gmra.mxu0 %vm280_vm0, %v8041_v0  ;;  %v1751_v0 = vld [vmem:[#allocation2 + $0x189] sm:$0xff]  ;;  %v1485_v56 = vpack.c.bf16 %v1437_v8, %v1436_v38  ;;  %v2664_v38 = vld [vmem:[#allocation2 + $0x39] sm:$0xff] }
 0x1d7   : > { %6738 = vmatmul.msk.bf16.gmra.mxu3 %vm280_vm0, %v8039_v63  ;;  %v1799_v63 = vpack.c.bf16 %v1751_v0, %v1750_v48  ;;  %v7399_v0 = vld [vmem:[%s9649_s4 + $0x18] sm:$0xff] }
 0x1d8   : > { %6698 = vmatmul.msk.bf16.gmra.mxu2 %vm280_vm0, %v8308_v35  ;;  %v8337_v40 = vadd.f32 %v1917_v61, %v1667_v7  ;;  %v2113_v61 = vpack.c.bf16 %v2065_v14, %v2064_v24  ;;  %v2349_v14 = vld [vmem:[#allocation2 + $0x30] sm:$0xff]  ;;  %3758 = vmatpush.bf16.msra.mxu1 %v7399_v0  ;;  %v2351_v0 = vld [vmem:[#allocation2 + $0x48] sm:$0xff] }
 0x1da   : > { %v1606_v26 = vpop.f32.mrf.mxu3  ;;  %v8340_v62 = vpop.f32.mrf.mxu1 }
 0x1db   : > { %v1292_v13 = vpop.f32.mrf.mxu2  ;;  %v1922_v34 = vpop.f32.mrf.mxu0 }
 0x1dc   : > { %v1354_v60 = vadd.f32 %v1292_v13, %v8165_v22 }
 0x1de   : > { %v1668_v39 = vadd.f32 %v1606_v26, %v1354_v60 }
 0x1e0   : > { %v1982_v47 = vadd.f32 %v1920_v44, %v1668_v39 }
 0x1e2   : > { %v8342_v41 = vadd.f32 %v2234_v18, %v1982_v47  ;;  %v1608_v19 = vpop.f32.mrf.mxu3  ;;  %v2239_v7 = vpop.f32.mrf.mxu1  ;;  %v2663_v47 = vld [vmem:[#allocation2 + $0x31] sm:$0xff] }
 0x1e3   : > { %v1294_v9 = vpop.f32.mrf.mxu2  ;;  %v1925_v22 = vpop.f32.mrf.mxu0 }
 0x1e4   : > { %v1355_v25 = vadd.f32 %v1294_v9, %v8183_v45 }
 0x1e5   : > { %6819 = vmatmul.msk.bf16.gmra.mxu1 %vm280_vm0, %v2113_v61 }
 0x1e6   : > { %v1669_v13 = vadd.f32 %v1608_v19, %v1355_v25  ;;  %6779 = vmatmul.msk.bf16.gmra.mxu0 %vm280_vm0, %v1799_v63  ;;  %v2727_v19 = vpack.c.bf16 %v2664_v38, %v2663_v47 }
 0x1e7   : > { %6739 = vmatmul.msk.bf16.gmra.mxu3 %vm280_vm0, %v1485_v56 }
 0x1e8   : > { %6699 = vmatmul.msk.bf16.gmra.mxu2 %vm280_vm0, %v2112_v37  ;;  %v8349_v44 = vadd.f32 %v1922_v34, %v1669_v13  ;;  %v2350_v37 = vld [vmem:[#allocation2 + $0x38] sm:$0xff] }
 0x1e9   : > { %v2413_v9 = vpack.c.bf16 %v2350_v37, %v2349_v14  ;;  %v2665_v14 = vld [vmem:[#allocation2 + $0x49] sm:$0xff]  ;;  %v2666_v37 = vld [vmem:[#allocation2 + $0x51] sm:$0xff] }
 0x1ea   : > { %v1611_v26 = vpop.f32.mrf.mxu3  ;;  %v8352_v45 = vpop.f32.mrf.mxu1 }
 0x1eb   : > { %v1297_v18 = vpop.f32.mrf.mxu2  ;;  %v1927_v39 = vpop.f32.mrf.mxu0 }
 0x1ec   : > { %v1356_v60 = vadd.f32 %v1297_v18, %v8192_v31 }
 0x1ee   : > { %v1670_v48 = vadd.f32 %v1611_v26, %v1356_v60 }
 0x1f0   : > { %v1984_v24 = vadd.f32 %v1925_v22, %v1670_v48 }
 0x1f2   : > { %v8357_v34 = vadd.f32 %v2239_v7, %v1984_v24  ;;  %v1613_v63 = vpop.f32.mrf.mxu3  ;;  %v2244_v25 = vpop.f32.mrf.mxu1  ;;  %v2352_v24 = vld [vmem:[#allocation2 + $0x50] sm:$0xff] }
 0x1f3   : > { %v1299_v8 = vpop.f32.mrf.mxu2  ;;  %v1930_v61 = vpop.f32.mrf.mxu0 }
 0x1f4   : > { %v1357_v31 = vadd.f32 %v1299_v8, %v8204_v11 }
 0x1f6   : > { %v1671_v56 = vadd.f32 %v1613_v63, %v1357_v31  ;;  %6924 = vmatmul.msk.bf16.vlgmr.msra.gmra.mxu0 %vm280_vm0, %v8065_v30  ;;  %v2414_v63 = vpack.c.bf16 %v2352_v24, %v2351_v0  ;;  %v2728_v31 = vpack.c.bf16 %v2666_v37, %v2665_v14  ;;  %v2667_v0 = vld [vmem:[#allocation2 + $0x61] sm:$0xff]  ;;  %v2668_v24 = vld [vmem:[#allocation2 + $0x69] sm:$0xff] }
 0x1f7   : > { %6884 = vmatmul.msk.bf16.vlgmr.msra.gmra.mxu3 %vm280_vm0, %v2727_v19 }
 0x1f8   : > { %6844 = vmatmul.msk.bf16.vlgmr.msra.gmra.mxu2 %vm280_vm0, %v2413_v9  ;;  %v8364_v22 = vadd.f32 %v1927_v39, %v1671_v56 }
 0x1fa   : > { %v1616_v13 = vpop.f32.mrf.mxu3  ;;  %v8367_v11 = vpop.f32.mrf.mxu1 }
 0x1fb   : > { %v1302_v7 = vpop.f32.mrf.mxu2  ;;  %v1932_v26 = vpop.f32.mrf.mxu0 }
 0x1fc   : > { %v1358_v18 = vadd.f32 %v1302_v7, %v8056_v20 }
 0x1fe   : > { %v1672_v60 = vadd.f32 %v1616_v13, %v1358_v18  ;;  %v7398_v18 = vld [vmem:[%s9649_s4 + $0x10] sm:$0xff] }
 0x1ff   : > { %3759 = vmatpush.bf16.msra.mxu1 %v7398_v18  ;;  %v2355_v18 = vld [vmem:[#allocation2 + $0x78] sm:$0xff] }
 0x200   : > { %v1986_v48 = vadd.f32 %v1930_v61, %v1672_v60 }
 0x202   : > { %v8369_v30 = vadd.f32 %v2244_v25, %v1986_v48  ;;  %v1618_v38 = vpop.f32.mrf.mxu3  ;;  %v2249_v9 = vpop.f32.mrf.mxu1  ;;  %v2354_v48 = vld [vmem:[#allocation2 + $0x68] sm:$0xff] }
 0x203   : > { %v1304_v47 = vpop.f32.mrf.mxu2  ;;  %v1935_v8 = vpop.f32.mrf.mxu0 }
 0x204   : > { %v1359_v39 = vadd.f32 %v1304_v47, %v8063_v28 }
 0x206   : > { %v1673_v20 = vadd.f32 %v1618_v38, %v1359_v39  ;;  %6925 = vmatmul.msk.bf16.gmra.mxu0 %vm280_vm0, %v8080_v49  ;;  %v2353_v49 = vld [vmem:[#allocation2 + $0x60] sm:$0xff]  ;;  %v2729_v39 = vpack.c.bf16 %v2668_v24, %v2667_v0 }
 0x207   : > { %6885 = vmatmul.msk.bf16.gmra.mxu3 %vm280_vm0, %v2728_v31  ;;  %v2415_v38 = vpack.c.bf16 %v2354_v48, %v2353_v49  ;;  %v2669_v49 = vld [vmem:[#allocation2 + $0x79] sm:$0xff]  ;;  %v2670_v48 = vld [vmem:[#allocation2 + $0x81] sm:$0xff] }
 0x208   : > { %6845 = vmatmul.msk.bf16.gmra.mxu2 %vm280_vm0, %v2414_v63  ;;  %v8376_v61 = vadd.f32 %v1932_v26, %v1673_v20 }
 0x20a   : > { %v1621_v25 = vpop.f32.mrf.mxu3  ;;  %v8379_v28 = vpop.f32.mrf.mxu1 }
 0x20b   : > { %v1307_v19 = vpop.f32.mrf.mxu2  ;;  %v1937_v7 = vpop.f32.mrf.mxu0 }
 0x20c   : > { %v1360_v56 = vadd.f32 %v1307_v19, %v8076_v43 }
 0x20e   : > { %v1674_v13 = vadd.f32 %v1621_v25, %v1360_v56 }
 0x210   : > { %v1988_v60 = vadd.f32 %v1935_v8, %v1674_v13 }
 0x212   : > { %v8384_v26 = vadd.f32 %v2249_v9, %v1988_v60  ;;  %v1623_v37 = vpop.f32.mrf.mxu3  ;;  %v2254_v63 = vpop.f32.mrf.mxu1  ;;  %v2356_v60 = vld [vmem:[#allocation2 + $0x80] sm:$0xff] }
 0x213   : > { %v1309_v14 = vpop.f32.mrf.mxu2  ;;  %v1940_v47 = vpop.f32.mrf.mxu0 }
 0x214   : > { %v1361_v43 = vadd.f32 %v1309_v14, %v8082_v57 }
 0x216   : > { %v1675_v31 = vadd.f32 %v1623_v37, %v1361_v43  ;;  %6926 = vmatmul.msk.bf16.gmra.mxu0 %vm280_vm0, %v8107_v21  ;;  %v2416_v37 = vpack.c.bf16 %v2356_v60, %v2355_v18  ;;  %v2730_v43 = vpack.c.bf16 %v2670_v48, %v2669_v49  ;;  %v2671_v18 = vld [vmem:[#allocation2 + $0x91] sm:$0xff]  ;;  %v2672_v60 = vld [vmem:[#allocation2 + $0x99] sm:$0xff] }
 0x217   : > { %6886 = vmatmul.msk.bf16.gmra.mxu3 %vm280_vm0, %v2729_v39 }
 0x218   : > { %6846 = vmatmul.msk.bf16.gmra.mxu2 %vm280_vm0, %v2415_v38  ;;  %v8391_v8 = vadd.f32 %v1937_v7, %v1675_v31 }
 0x21a   : > { %v1626_v20 = vpop.f32.mrf.mxu3  ;;  %v8394_v57 = vpop.f32.mrf.mxu1 }
 0x21b   : > { %v1312_v9 = vpop.f32.mrf.mxu2  ;;  %v1942_v25 = vpop.f32.mrf.mxu0 }
 0x21c   : > { %v1362_v19 = vadd.f32 %v1312_v9, %v8100_v5 }
 0x21e   : > { %v1676_v56 = vadd.f32 %v1626_v20, %v1362_v19  ;;  %v7397_v19 = vld [vmem:[%s9649_s4 + $0x8] sm:$0xff] }
 0x21f   : > { %3760 = vmatpush.bf16.msra.mxu1 %v7397_v19  ;;  %v2359_v19 = vld [vmem:[#allocation2 + $0xa8] sm:$0xff] }
 0x220   : > { %v1990_v13 = vadd.f32 %v1940_v47, %v1676_v56 }
 0x222   : > { %v8396_v21 = vadd.f32 %v2254_v63, %v1990_v13  ;;  %v1628_v24 = vpop.f32.mrf.mxu3  ;;  %v2259_v38 = vpop.f32.mrf.mxu1  ;;  %v2358_v13 = vld [vmem:[#allocation2 + $0x98] sm:$0xff] }
 0x223   : > { %v1314_v0 = vpop.f32.mrf.mxu2  ;;  %v1945_v14 = vpop.f32.mrf.mxu0 }
 0x224   : > { %v1363_v7 = vadd.f32 %v1314_v0, %v8109_v27 }
 0x226   : > { %v1677_v5 = vadd.f32 %v1628_v24, %v1363_v7  ;;  %6927 = vmatmul.msk.bf16.gmra.mxu0 %vm280_vm0, %v8125_v53  ;;  %v2357_v53 = vld [vmem:[#allocation2 + $0x90] sm:$0xff]  ;;  %v2731_v7 = vpack.c.bf16 %v2672_v60, %v2671_v18 }
 0x227   : > { %6887 = vmatmul.msk.bf16.gmra.mxu3 %vm280_vm0, %v2730_v43  ;;  %v2417_v24 = vpack.c.bf16 %v2358_v13, %v2357_v53  ;;  %v2673_v53 = vld [vmem:[#allocation2 + $0xa9] sm:$0xff]  ;;  %v2674_v13 = vld [vmem:[#allocation2 + $0xb1] sm:$0xff] }
 0x228   : > { %6847 = vmatmul.msk.bf16.gmra.mxu2 %vm280_vm0, %v2416_v37  ;;  %v8403_v47 = vadd.f32 %v1942_v25, %v1677_v5 }
 0x22a   : > { %v1631_v63 = vpop.f32.mrf.mxu3  ;;  %v8406_v27 = vpop.f32.mrf.mxu1 }
 0x22b   : > { %v1317_v39 = vpop.f32.mrf.mxu2  ;;  %v1947_v9 = vpop.f32.mrf.mxu0 }
 0x22c   : > { %v1364_v31 = vadd.f32 %v1317_v39, %v8121_v42 }
 0x22e   : > { %v1678_v20 = vadd.f32 %v1631_v63, %v1364_v31 }
 0x230   : > { %v1992_v56 = vadd.f32 %v1945_v14, %v1678_v20 }
 0x232   : > { %v8411_v25 = vadd.f32 %v2259_v38, %v1992_v56  ;;  %v1633_v48 = vpop.f32.mrf.mxu3  ;;  %v2264_v37 = vpop.f32.mrf.mxu1  ;;  %v2360_v56 = vld [vmem:[#allocation2 + $0xb0] sm:$0xff] }
 0x233   : > { %v1319_v49 = vpop.f32.mrf.mxu2  ;;  %v1950_v0 = vpop.f32.mrf.mxu0 }
 0x234   : > { %v1365_v42 = vadd.f32 %v1319_v49, %v8127_v1 }
 0x236   : > { %v1679_v43 = vadd.f32 %v1633_v48, %v1365_v42  ;;  %6928 = vmatmul.msk.bf16.gmra.mxu0 %vm280_vm0, %v8143_v17  ;;  %v2418_v48 = vpack.c.bf16 %v2360_v56, %v2359_v19  ;;  %v2732_v42 = vpack.c.bf16 %v2674_v13, %v2673_v53  ;;  %v2362_v19 = vld [vmem:[#allocation2 + $0xc8] sm:$0xff] }
 0x237   : > { %6888 = vmatmul.msk.bf16.gmra.mxu3 %vm280_vm0, %v2731_v7  ;;  %v2675_v56 = vld [vmem:[#allocation2 + $0xc1] sm:$0xff]  ;;  %v2676_v53 = vld [vmem:[#allocation2 + $0xc9] sm:$0xff] }
 0x238   : > { %6848 = vmatmul.msk.bf16.gmra.mxu2 %vm280_vm0, %v2417_v24  ;;  %v8418_v14 = vadd.f32 %v1947_v9, %v1679_v43  ;;  %v9661_v43 = vld [vmem:[#allocation5_spill] sm:$0xff] }
 0x23a   : > { %v1636_v5 = vpop.f32.mrf.mxu3  ;;  %v8421_v1 = vpop.f32.mrf.mxu1 }
 0x23b   : > { %v1322_v38 = vpop.f32.mrf.mxu2  ;;  %v1952_v63 = vpop.f32.mrf.mxu0 }
 0x23c   : > { %v1366_v39 = vadd.f32 %v1322_v38, %v8139_v6 }
 0x23e   : > { %v1680_v31 = vadd.f32 %v1636_v5, %v1366_v39  ;;  %v7396_v39 = vld [vmem:[%s9649_s4] sm:$0xff] }
 0x23f   : > { %3761 = vmatpush.bf16.msra.mxu1 %v7396_v39 }
 0x240   : > { %v1994_v20 = vadd.f32 %v1950_v0, %v1680_v31 }
 0x242   : > { %v8423_v17 = vadd.f32 %v2264_v37, %v1994_v20  ;;  %v1638_v60 = vpop.f32.mrf.mxu3  ;;  %v2269_v6 = vpop.f32.mrf.mxu1  ;;  %v2361_v20 = vld [vmem:[#allocation2 + $0xc0] sm:$0xff] }
 0x243   : > { %v1324_v18 = vpop.f32.mrf.mxu2  ;;  %v1955_v49 = vpop.f32.mrf.mxu0 }
 0x244   : > { %v1367_v9 = vadd.f32 %v1324_v18, %v8145_v29 }
 0x246   : > { %v1681_v24 = vadd.f32 %v1638_v60, %v1367_v9  ;;  %6929 = vmatmul.msk.bf16.gmra.mxu0 %vm280_vm0, %v8161_v32  ;;  %v9664_v60 = vld [vmem:[#allocation6_spill] sm:$0xff] }
 0x247   : > { %6889 = vmatmul.msk.bf16.gmra.mxu3 %vm280_vm0, %v2732_v42  ;;  %v2419_v42 = vpack.c.bf16 %v2362_v19, %v2361_v20  ;;  %v2363_v20 = vld [vmem:[#allocation2 + $0xd8] sm:$0xff]  ;;  %v2364_v19 = vld [vmem:[#allocation2 + $0xe0] sm:$0xff] }
 0x248   : > { %6849 = vmatmul.msk.bf16.gmra.mxu2 %vm280_vm0, %v2418_v48  ;;  %v8430_v0 = vadd.f32 %v1952_v63, %v1681_v24  ;;  %v2733_v24 = vpack.c.bf16 %v2676_v53, %v2675_v56  ;;  %v2677_v56 = vld [vmem:[#allocation2 + $0xd9] sm:$0xff]  ;;  %v2678_v53 = vld [vmem:[#allocation2 + $0xe1] sm:$0xff] }
 0x24a   : > { %v1641_v37 = vpop.f32.mrf.mxu3  ;;  %v8436_v32 = vpop.f32.mrf.mxu1 }
 0x24b   : > { %v1327_v7 = vpop.f32.mrf.mxu2  ;;  %v1957_v5 = vpop.f32.mrf.mxu0  ;;  %9662 = vst [vmem:[#allocation5_spill] sm:$0xff] %v8436_v32 }
 0x24c   : > { %v1368_v38 = vadd.f32 %v1327_v7, %v9661_v43 }
 0x24e   : > { %v1682_v29 = vadd.f32 %v1641_v37, %v1368_v38  ;;  %v9665_v37 = vld [vmem:[#allocation8_spill] sm:$0xff] }
 0x250   : > { %v1996_v31 = vadd.f32 %v1955_v49, %v1682_v29  ;;  %v9667_v29 = vld [vmem:[#allocation7_spill] sm:$0xff] }
 0x252   : > { %v8438_v63 = vadd.f32 %v2269_v6, %v1996_v31  ;;  %v1643_v18 = vpop.f32.mrf.mxu3  ;;  %v2274_v43 = vpop.f32.mrf.mxu1 }
 0x253   : > { %v1329_v13 = vpop.f32.mrf.mxu2  ;;  %v1960_v48 = vpop.f32.mrf.mxu0 }
 0x254   : > { %9663 = vst [vmem:[#allocation12_spill] sm:$0xff] %v8438_v63  ;;  %v1369_v9 = vadd.f32 %v1329_v13, %v9664_v60  ;;  %v2734_v63 = vpack.c.bf16 %v2678_v53, %v2677_v56  ;;  %v2366_v56 = vld [vmem:[#allocation2 + $0xf8] sm:$0xff] }
 0x255   : > { %v2679_v53 = vld [vmem:[#allocation2 + $0xf1] sm:$0xff] }
 0x256   : > { %v1683_v7 = vadd.f32 %v1643_v18, %v1369_v9  ;;  %6930 = vmatmul.msk.bf16.gmra.mxu0 %vm280_vm0, %v9665_v37  ;;  %v7568_v9 = vld [vmem:[#allocation3] sm:$0xff] }
 0x257   : > { %6890 = vmatmul.msk.bf16.gmra.mxu3 %vm280_vm0, %v2733_v24 }
 0x258   : > { %6850 = vmatmul.msk.bf16.gmra.mxu2 %vm280_vm0, %v2419_v42  ;;  %v8445_v49 = vadd.f32 %v1957_v5, %v1683_v7  ;;  %v3674_v42 = vpack.c.bf16 %v7568_v9, %v7568_v9  ;;  %v9668_v5 = vld [vmem:[#allocation9_spill] sm:$0xff] }
 0x259   : > { %v2680_v9 = vld [vmem:[#allocation2 + $0xf9] sm:$0xff] }
 0x25a   : > { %9666 = vst [vmem:[#allocation6_spill] sm:$0xff] %v8445_v49  ;;  %v1646_v38 = vpop.f32.mrf.mxu3  ;;  %v2420_v49 = vpack.c.bf16 %v2364_v19, %v2363_v20  ;;  %3762 = vmatmul.bf16.vlgmr.msra.gmra.mxu1 %v3674_v42  ;;  %v7427_v42 = vld [vmem:[%s9649_s4 + $0xf8] sm:$0xff] }
 0x25b   : > { %v1332_v6 = vpop.f32.mrf.mxu2  ;;  %v1962_v31 = vpop.f32.mrf.mxu0  ;;  %4648 = vmatpush.bf16.msrb.mxu0 %v7427_v42  ;;  %v2681_v42 = vld [vmem:[#allocation2 + $0x109] sm:$0xff] }
 0x25c   : > { %v1370_v39 = vadd.f32 %v1332_v6, %v9667_v29  ;;  %v8451_v6 = vpop.f32.mrf.mxu1  ;;  %v7419_v29 = vld [vmem:[%s9649_s4 + $0xb8] sm:$0xff] }
 0x25d   : > { %4350 = vmatpush.bf16.msrb.mxu3 %v7419_v29 }
 0x25e   : > { %v1684_v13 = vadd.f32 %v1646_v38, %v1370_v39 }
 0x260   : > { %v1998_v60 = vadd.f32 %v1960_v48, %v1684_v13 }
 0x262   : > { %v8448_v18 = vadd.f32 %v2274_v43, %v1998_v60  ;;  %v1648_v24 = vpop.f32.mrf.mxu3  ;;  %v7411_v43 = vld [vmem:[%s9649_s4 + $0x78] sm:$0xff]  ;;  %v9669_v60 = vld [vmem:[#allocation10_spill] sm:$0xff] }
 0x263   : > { %v1334_v37 = vpop.f32.mrf.mxu2  ;;  %v1965_v32 = vpop.f32.mrf.mxu0  ;;  %4052 = vmatpush.bf16.msrb.mxu2 %v7411_v43 }
 0x264   : > { %v1371_v7 = vadd.f32 %v1334_v37, %v9668_v5  ;;  %v2279_v19 = vpop.f32.mrf.mxu1 }
 0x266   : > { %v1685_v38 = vadd.f32 %v1648_v24, %v1371_v7  ;;  %6931 = vmatmul.msk.bf16.gmra.mxu0 %vm280_vm0, %v8209_v3  ;;  %v9671_v7 = vld [vmem:[#allocation11_spill] sm:$0xff] }
 0x267   : > { %6891 = vmatmul.msk.bf16.gmra.mxu3 %vm280_vm0, %v2734_v63 }
 0x268   : > { %6851 = vmatmul.msk.bf16.gmra.mxu2 %vm280_vm0, %v2420_v49  ;;  %v8457_v48 = vadd.f32 %v1962_v31, %v1685_v38  ;;  %v2365_v31 = vld [vmem:[#allocation2 + $0xf0] sm:$0xff] }
 0x269   : > { %v2421_v29 = vpack.c.bf16 %v2366_v56, %v2365_v31 }
 0x26a   : > { %v1651_v13 = vpop.f32.mrf.mxu3 }
 0x26b   : > { %v1337_v39 = vpop.f32.mrf.mxu2  ;;  %v1967_v20 = vpop.f32.mrf.mxu0 }
 0x26c   : > { %v1372_v3 = vadd.f32 %v1337_v39, %v9669_v60  ;;  %v2735_v39 = vpack.c.bf16 %v2680_v9, %v2679_v53  ;;  %v7435_v60 = vld [vmem:[%s9649_s4 + $0x138] sm:$0xff]  ;;  %v2367_v53 = vld [vmem:[#allocation2 + $0x108] sm:$0xff]  ;;  %v2368_v9 = vld [vmem:[#allocation2 + $0x110] sm:$0xff] }
 0x26d   : > { %4946 = vmatpush.bf16.msrb.mxu1 %v7435_v60 }
 0x26e   : > { %v1686_v49 = vadd.f32 %v1651_v13, %v1372_v3 }
 0x270   : > { %v2000_v63 = vadd.f32 %v1965_v32, %v1686_v49 }
 0x272   : > { %v8469_v37 = vadd.f32 %v2279_v19, %v2000_v63  ;;  %v1653_v5 = vpop.f32.mrf.mxu3 }
 0x273   : > { %v1339_v24 = vpop.f32.mrf.mxu2  ;;  %v3147_v43 = vpop.f32.mrf.mxu0 }
 0x274   : > { %9670 = vst [vmem:[#allocation8_spill] sm:$0xff] %v8469_v37  ;;  %v1373_v38 = vadd.f32 %v1339_v24, %v9671_v7  ;;  %v2682_v24 = vld [vmem:[#allocation2 + $0x111] sm:$0xff] }
 0x276   : > { %v1687_v13 = vadd.f32 %v1653_v5, %v1373_v38  ;;  %6932 = vmatmul.msk.bf16.gmra.mxu0 %vm280_vm0, %v8224_v55  ;;  %v8485_v55 = vld [vmem:[%s9647_s2] ss:$0 sm:$0xff] }
 0x277   : > { %6892 = vmatmul.msk.bf16.gmra.mxu3 %vm280_vm0, %v2735_v39 }
 0x278   : > { %6852 = vmatmul.msk.bf16.gmra.mxu2 %vm280_vm0, %v2421_v29  ;;  %v8476_v32 = vadd.f32 %v1967_v20, %v1687_v13  ;;  %v8490_v20 = vld [vmem:[%s9648_s3] ss:$0 sm:$0xff]  ;;  %v2422_v13 = vpack.c.bf16 %v2368_v9, %v2367_v53 }
 0x27a   : > { %9672 = vst [vmem:[#allocation7_spill] sm:$0xff] %v8476_v32  ;;  %v2833_v49 = vpop.f32.mrf.mxu3 }
 0x27b   : > { %v2519_v3 = vpop.f32.mrf.mxu2  ;;  %v3149_v63 = vpop.f32.mrf.mxu0 }
 0x27c   : > { %v2599_v19 = vadd.f32 %v2519_v3, %v8222_v59 }
 0x27e   : > { %v2913_v31 = vadd.f32 %v2833_v49, %v2599_v19 }
 0x280   : > { %v3227_v56 = vadd.f32 %v3147_v43, %v2913_v31  ;;  %v2736_v43 = vpack.c.bf16 %v2682_v24, %v2681_v42  ;;  %v7418_v31 = vld [vmem:[%s9649_s4 + $0xb0] sm:$0xff] }
 0x281   : > { %4351 = vmatpush.bf16.msrb.mxu3 %v7418_v31 }
 0x282   : > { %v3327_v5 = vmul.f32 %v8485_v55, %v3227_v56  ;;  %v2835_v7 = vpop.f32.mrf.mxu3 }
 0x283   : > { %v2521_v59 = vpop.f32.mrf.mxu2  ;;  %v3152_v39 = vpop.f32.mrf.mxu0 }
 0x284   : > { %v3363_v38 = vadd.f32 %v8490_v20, %v3327_v5  ;;  %v2600_v29 = vadd.f32 %v2521_v59, %v8235_v23  ;;  %v7410_v23 = vld [vmem:[%s9649_s4 + $0x70] sm:$0xff] }
 0x285   : > { %4053 = vmatpush.bf16.msrb.mxu2 %v7410_v23 }
 0x286   : > { %vm3395_vm2 = vcmp.gt.f32.partialorder %v3363_v38, 0.0  ;;  %v3427_v60 = vmul.f32 0.01, %v3363_v38  ;;  %v2914_v3 = vadd.f32 %v2835_v7, %v2600_v29  ;;  %6933 = vmatmul.msk.bf16.gmra.mxu0 %vm280_vm0, %v8243_v12  ;;  %v2370_v29 = vld [vmem:[#allocation2 + $0x128] sm:$0xff] }
 0x287   : > { %6893 = vmatmul.msk.bf16.gmra.mxu3 %vm280_vm0, %v2736_v43  ;;  %v2684_v43 = vld [vmem:[#allocation2 + $0x129] sm:$0xff] }
 0x288   : > { %v8497_v49 = vsel %vm3395_vm2, %v3363_v38, %v3427_v60  ;;  %v3228_v19 = vadd.f32 %v3149_v63, %v2914_v3  ;;  %6853 = vmatmul.msk.bf16.gmra.mxu2 %vm280_vm0, %v2422_v13  ;;  %v2369_v38 = vld [vmem:[#allocation2 + $0x120] sm:$0xff]  ;;  %v7426_v60 = vld [vmem:[%s9649_s4 + $0xf0] sm:$0xff] }
 0x289   : > { %3546 = vst [vmem:[#allocation3 + $0x19] sm:$0xff] %v8497_v49  ;;  %v2683_v13 = vld [vmem:[#allocation2 + $0x121] sm:$0xff]  ;;  %4649 = vmatpush.bf16.msrb.mxu0 %v7426_v60 }
 0x28a   : > { %v3328_v56 = vmul.f32 %v8485_v55, %v3228_v19  ;;  %v2838_v53 = vpop.f32.mrf.mxu3 }
 0x28b   : > { %v2524_v12 = vpop.f32.mrf.mxu2  ;;  %v3154_v42 = vpop.f32.mrf.mxu0 }
 0x28c   : > { %v3364_v63 = vadd.f32 %v8490_v20, %v3328_v56  ;;  %v2601_v9 = vadd.f32 %v2524_v12, %v8241_v10  ;;  %v2423_v12 = vpack.c.bf16 %v2370_v29, %v2369_v38  ;;  %v7434_v38 = vld [vmem:[%s9649_s4 + $0x130] sm:$0xff] }
 0x28d   : > { %4947 = vmatpush.bf16.msrb.mxu1 %v7434_v38 }
 0x28e   : > { %vm3396_vm3 = vcmp.gt.f32.partialorder %v3364_v63, 0.0  ;;  %v3428_v24 = vmul.f32 0.01, %v3364_v63  ;;  %v2915_v5 = vadd.f32 %v2838_v53, %v2601_v9  ;;  %v2737_v53 = vpack.c.bf16 %v2684_v43, %v2683_v13 }
 0x290   : > { %v8511_v59 = vsel %vm3396_vm3, %v3364_v63, %v3428_v24  ;;  %v3229_v7 = vadd.f32 %v3152_v39, %v2915_v5 }
 0x291   : > { %3547 = vst [vmem:[#allocation3 + $0x21] sm:$0xff] %v8511_v59 }
 0x292   : > { %v3329_v3 = vmul.f32 %v8485_v55, %v3229_v7  ;;  %v2840_v23 = vpop.f32.mrf.mxu3  ;;  %v3612_v7 = vld [vmem:[#allocation3 + $0x18] sm:$0xff] }
 0x293   : > { %v2526_v19 = vpop.f32.mrf.mxu2  ;;  %v3157_v56 = vpop.f32.mrf.mxu0 }
 0x294   : > { %v3365_v39 = vadd.f32 %v8490_v20, %v3329_v3  ;;  %v2602_v31 = vadd.f32 %v2526_v19, %v8257_v58 }
 0x296   : > { %vm3397_vm4 = vcmp.gt.f32.partialorder %v3365_v39, 0.0  ;;  %v3429_v63 = vmul.f32 0.01, %v3365_v39  ;;  %v2916_v9 = vadd.f32 %v2840_v23, %v2602_v31  ;;  %6934 = vmatmul.msk.bf16.gmra.mxu0 %vm280_vm0, %v8265_v50 }
 0x297   : > { %6894 = vmatmul.msk.bf16.gmra.mxu3 %vm280_vm0, %v2737_v53  ;;  %v2372_v53 = vld [vmem:[#allocation2 + $0x140] sm:$0xff] }
 0x298   : > { %v8524_v24 = vsel %vm3397_vm4, %v3365_v39, %v3429_v63  ;;  %v3230_v5 = vadd.f32 %v3154_v42, %v2916_v9  ;;  %6854 = vmatmul.msk.bf16.gmra.mxu2 %vm280_vm0, %v2423_v12  ;;  %v3613_v60 = vld [vmem:[#allocation3 + $0x20] sm:$0xff]  ;;  %v2371_v12 = vld [vmem:[#allocation2 + $0x138] sm:$0xff]  ;;  %v2686_v9 = vld [vmem:[#allocation2 + $0x141] sm:$0xff] }
 0x299   : > { %3548 = vst [vmem:[#allocation3 + $0x31] sm:$0xff] %v8524_v24  ;;  %v8529_v58 = vpack.c.bf16 %v3613_v60, %v3612_v7  ;;  %v2685_v63 = vld [vmem:[#allocation2 + $0x139] sm:$0xff] }
 0x29a   : > { %v3330_v29 = vmul.f32 %v8485_v55, %v3230_v5  ;;  %v2843_v13 = vpop.f32.mrf.mxu3 }
 0x29b   : > { %v2529_v50 = vpop.f32.mrf.mxu2  ;;  %3767 = vmatmul.bf16.gmra.mxu1 %v8529_v58  ;;  %v3159_v3 = vpop.f32.mrf.mxu0 }
 0x29c   : > { %v3366_v42 = vadd.f32 %v8490_v20, %v3330_v29  ;;  %v2603_v43 = vadd.f32 %v2529_v50, %v8263_v52 }
 0x29e   : > { %vm3398_vm5 = vcmp.gt.f32.partialorder %v3366_v42, 0.0  ;;  %v3430_v19 = vmul.f32 0.01, %v3366_v42  ;;  %v2917_v23 = vadd.f32 %v2843_v13, %v2603_v43  ;;  %v2424_v13 = vpack.c.bf16 %v2372_v53, %v2371_v12  ;;  %v7409_v12 = vld [vmem:[%s9649_s4 + $0x68] sm:$0xff] }
 0x29f   : > { %4054 = vmatpush.bf16.msrb.mxu2 %v7409_v12 }
 0x2a0   : > { %v8538_v39 = vsel %vm3398_vm5, %v3366_v42, %v3430_v19  ;;  %v3231_v31 = vadd.f32 %v3157_v56, %v2917_v23  ;;  %v2738_v56 = vpack.c.bf16 %v2686_v9, %v2685_v63 }
 0x2a1   : > { %3549 = vst [vmem:[#allocation3 + $0x39] sm:$0xff] %v8538_v39 }
 0x2a2   : > { %v3331_v7 = vmul.f32 %v8485_v55, %v3231_v31  ;;  %v2845_v60 = vpop.f32.mrf.mxu3  ;;  %v3614_v31 = vld [vmem:[#allocation3 + $0x30] sm:$0xff] }
 0x2a3   : > { %v2531_v52 = vpop.f32.mrf.mxu2  ;;  %v3162_v50 = vpop.f32.mrf.mxu0 }
 0x2a4   : > { %v3367_v38 = vadd.f32 %v8490_v20, %v3331_v7  ;;  %v2604_v29 = vadd.f32 %v2531_v52, %v8279_v51 }
 0x2a6   : > { %vm3399_vm6 = vcmp.gt.f32.partialorder %v3367_v38, 0.0  ;;  %v3431_v42 = vmul.f32 0.01, %v3367_v38  ;;  %v2918_v43 = vadd.f32 %v2845_v60, %v2604_v29  ;;  %6935 = vmatmul.msk.bf16.gmra.mxu0 %vm280_vm0, %v8287_v4  ;;  %v7417_v4 = vld [vmem:[%s9649_s4 + $0xa8] sm:$0xff] }
 0x2a7   : > { %6895 = vmatmul.msk.bf16.gmra.mxu3 %vm280_vm0, %v2738_v56 }
 0x2a8   : > { %v8548_v19 = vsel %vm3399_vm6, %v3367_v38, %v3431_v42  ;;  %v3232_v23 = vadd.f32 %v3159_v3, %v2918_v43  ;;  %6855 = vmatmul.msk.bf16.gmra.mxu2 %vm280_vm0, %v2424_v13  ;;  %v3615_v7 = vld [vmem:[#allocation3 + $0x38] sm:$0xff]  ;;  %4352 = vmatpush.bf16.msrb.mxu3 %v7417_v4  ;;  %v2373_v42 = vld [vmem:[#allocation2 + $0x150] sm:$0xff]  ;;  %v2374_v43 = vld [vmem:[#allocation2 + $0x158] sm:$0xff] }
 0x2a9   : > { %3550 = vst [vmem:[#allocation3 + $0x49] sm:$0xff] %v8548_v19  ;;  %v8553_v51 = vpack.c.bf16 %v3615_v7, %v3614_v31  ;;  %v2688_v31 = vld [vmem:[#allocation2 + $0x159] sm:$0xff]  ;;  %v7425_v7 = vld [vmem:[%s9649_s4 + $0xe8] sm:$0xff] }
 0x2aa   : > { %v3332_v3 = vmul.f32 %v8485_v55, %v3232_v23  ;;  %v2848_v63 = vpop.f32.mrf.mxu3  ;;  %v2687_v23 = vld [vmem:[#allocation2 + $0x151] sm:$0xff]  ;;  %4650 = vmatpush.bf16.msrb.mxu0 %v7425_v7 }
 0x2ab   : > { %v2534_v53 = vpop.f32.mrf.mxu2  ;;  %3772 = vmatmul.bf16.gmra.mxu1 %v8553_v51  ;;  %v3164_v60 = vpop.f32.mrf.mxu0 }
 0x2ac   : > { %v3368_v9 = vadd.f32 %v8490_v20, %v3332_v3  ;;  %v2605_v52 = vadd.f32 %v2534_v53, %v8285_v54 }
 0x2ae   : > { %vm3400_vm7 = vcmp.gt.f32.partialorder %v3368_v9, 0.0  ;;  %v3432_v38 = vmul.f32 0.01, %v3368_v9  ;;  %v2919_v29 = vadd.f32 %v2848_v63, %v2605_v52  ;;  %v2739_v52 = vpack.c.bf16 %v2688_v31, %v2687_v23 }
 0x2b0   : > { %v8565_v13 = vsel %vm3400_vm7, %v3368_v9, %v3432_v38  ;;  %v3233_v56 = vadd.f32 %v3162_v50, %v2919_v29  ;;  %v2425_v9 = vpack.c.bf16 %v2374_v43, %v2373_v42  ;;  %v7433_v42 = vld [vmem:[%s9649_s4 + $0x128] sm:$0xff] }
 0x2b1   : > { %3551 = vst [vmem:[#allocation3 + $0x51] sm:$0xff] %v8565_v13  ;;  %4948 = vmatpush.bf16.msrb.mxu1 %v7433_v42 }
 0x2b2   : > { %v3333_v12 = vmul.f32 %v8485_v55, %v3233_v56  ;;  %v2850_v3 = vpop.f32.mrf.mxu3  ;;  %v3616_v56 = vld [vmem:[#allocation3 + $0x48] sm:$0xff] }
 0x2b3   : > { %v2536_v4 = vpop.f32.mrf.mxu2  ;;  %v3167_v63 = vpop.f32.mrf.mxu0 }
 0x2b4   : > { %v3369_v50 = vadd.f32 %v8490_v20, %v3333_v12  ;;  %v2606_v53 = vadd.f32 %v2536_v4, %v8298_v2 }
 0x2b6   : > { %vm3401_vm8 = vcmp.gt.f32.partialorder %v3369_v50, 0.0  ;;  %v3433_v38 = vmul.f32 0.01, %v3369_v50  ;;  %v2920_v29 = vadd.f32 %v2850_v3, %v2606_v53  ;;  %6936 = vmatmul.msk.bf16.gmra.mxu0 %vm280_vm0, %v8308_v35  ;;  %v3004_v53 = vld [vmem:[#allocation2 + $0x172] sm:$0xff] }
 0x2b7   : > { %6896 = vmatmul.msk.bf16.gmra.mxu3 %vm280_vm0, %v2739_v52 }
 0x2b8   : > { %v8578_v5 = vsel %vm3401_vm8, %v3369_v50, %v3433_v38  ;;  %v3234_v54 = vadd.f32 %v3164_v60, %v2920_v29  ;;  %6856 = vmatmul.msk.bf16.gmra.mxu2 %vm280_vm0, %v2425_v9  ;;  %v3617_v7 = vld [vmem:[#allocation3 + $0x50] sm:$0xff]  ;;  %v3003_v50 = vld [vmem:[#allocation2 + $0x16a] sm:$0xff] }
 0x2b9   : > { %3552 = vst [vmem:[#allocation3 + $0x61] sm:$0xff] %v8578_v5  ;;  %v8583_v2 = vpack.c.bf16 %v3617_v7, %v3616_v56  ;;  %v2375_v38 = vld [vmem:[#allocation2 + $0x168] sm:$0xff]  ;;  %v2690_v56 = vld [vmem:[#allocation2 + $0x171] sm:$0xff]  ;;  %v7408_v7 = vld [vmem:[%s9649_s4 + $0x60] sm:$0xff] }
 0x2ba   : > { %v3334_v43 = vmul.f32 %v8485_v55, %v3234_v54  ;;  %v2853_v23 = vpop.f32.mrf.mxu3  ;;  %v2376_v54 = vld [vmem:[#allocation2 + $0x170] sm:$0xff]  ;;  %4055 = vmatpush.bf16.msrb.mxu2 %v7408_v7  ;;  %v7415_v7 = vld [vmem:[%s9649_s4 + $0x98] sm:$0xff] }
 0x2bb   : > { %v2539_v35 = vpop.f32.mrf.mxu2  ;;  %3777 = vmatmul.bf16.gmra.mxu1 %v8583_v2  ;;  %v3169_v12 = vpop.f32.mrf.mxu0  ;;  %v2689_v29 = vld [vmem:[#allocation2 + $0x169] sm:$0xff] }
 0x2bc   : > { %v3370_v60 = vadd.f32 %v8490_v20, %v3334_v43  ;;  %v2607_v31 = vadd.f32 %v2539_v35, %v8306_v15  ;;  %v2293_v15 = vadd.f32 %v8302_v36, %v8319_v16  ;;  %v3054_v43 = vpack.c.bf16 %v3004_v53, %v3003_v50  ;;  %v7424_v35 = vld [vmem:[%s9649_s4 + $0xe0] sm:$0xff] }
 0x2bd   : > { %v2740_v10 = vpack.c.bf16 %v2690_v56, %v2689_v29  ;;  %v7416_v36 = vld [vmem:[%s9649_s4 + $0xa0] sm:$0xff]  ;;  %4651 = vmatpush.bf16.msrb.mxu0 %v7424_v35  ;;  %v7407_v56 = vld [vmem:[%s9649_s4 + $0x58] sm:$0xff] }
 0x2be   : > { %vm3402_vm9 = vcmp.gt.f32.partialorder %v3370_v60, 0.0  ;;  %v3434_v4 = vmul.f32 0.01, %v3370_v60  ;;  %v2921_v3 = vadd.f32 %v2853_v23, %v2607_v31  ;;  %4353 = vmatpush.bf16.msrb.mxu3 %v7416_v36  ;;  %4056 = vmatpush.bf16.msrb.mxu2 %v7407_v56  ;;  %v7413_v56 = vld [vmem:[%s9649_s4 + $0x88] sm:$0xff] }
 0x2c0   : > { %v8592_v9 = vsel %vm3402_vm9, %v3370_v60, %v3434_v4  ;;  %v3235_v52 = vadd.f32 %v3167_v63, %v2921_v3  ;;  %v2426_v3 = vpack.c.bf16 %v2376_v54, %v2375_v38  ;;  %v3618_v53 = vld [vmem:[#allocation3 + $0x60] sm:$0xff] }
 0x2c1   : > { %3553 = vst [vmem:[#allocation3 + $0x69] sm:$0xff] %v8592_v9 }
 0x2c2   : > { %v3335_v42 = vmul.f32 %v8485_v55, %v3235_v52  ;;  %v2855_v23 = vpop.f32.mrf.mxu3  ;;  %v7423_v52 = vld [vmem:[%s9649_s4 + $0xd8] sm:$0xff]  ;;  %4354 = vmatpush.bf16.msrb.mxu3 %v7415_v7  ;;  %v2378_v7 = vld [vmem:[#allocation2 + $0x188] sm:$0xff] }
 0x2c3   : > { %v2541_v63 = vpop.f32.mrf.mxu2  ;;  %v3172_v4 = vpop.f32.mrf.mxu0  ;;  %4652 = vmatpush.bf16.msrb.mxu0 %v7423_v52 }
 0x2c4   : > { %v3371_v60 = vadd.f32 %v8490_v20, %v3335_v42  ;;  %v2608_v31 = vadd.f32 %v2541_v63, %v2293_v15 }
 0x2c6   : > { %vm3403_vm10 = vcmp.gt.f32.partialorder %v3371_v60, 0.0  ;;  %v3435_v16 = vmul.f32 0.01, %v3371_v60  ;;  %v2922_v50 = vadd.f32 %v2855_v23, %v2608_v31  ;;  %6937 = vmatmul.msk.bf16.gmra.mxu0 %vm280_vm0, %v3054_v43  ;;  %v7414_v31 = vld [vmem:[%s9649_s4 + $0x90] sm:$0xff] }
 0x2c7   : > { %6897 = vmatmul.msk.bf16.gmra.mxu3 %vm280_vm0, %v2740_v10  ;;  %v7422_v10 = vld [vmem:[%s9649_s4 + $0xd0] sm:$0xff] }
 0x2c8   : > { %v8614_v38 = vsel %vm3403_vm10, %v3371_v60, %v3435_v16  ;;  %v3236_v54 = vadd.f32 %v3169_v12, %v2922_v50  ;;  %6857 = vmatmul.msk.bf16.gmra.mxu2 %vm280_vm0, %v2426_v3  ;;  %v3619_v29 = vld [vmem:[#allocation3 + $0x68] sm:$0xff]  ;;  %v7406_v60 = vld [vmem:[%s9649_s4 + $0x50] sm:$0xff]  ;;  %4653 = vmatpush.bf16.msrb.mxu0 %v7422_v10  ;;  %v7421_v16 = vld [vmem:[%s9649_s4 + $0xc8] sm:$0xff] }
 0x2c9   : > { %3554 = vst [vmem:[#allocation3 + $0x79] sm:$0xff] %v8614_v38  ;;  %v8625_v15 = vpack.c.bf16 %v3619_v29, %v3618_v53  ;;  %4057 = vmatpush.bf16.msrb.mxu2 %v7406_v60  ;;  %v3005_v50 = vld [vmem:[#allocation2 + $0x182] sm:$0xff]  ;;  %4355 = vmatpush.bf16.msrb.mxu3 %v7414_v31 }
 0x2ca   : > { %v3336_v12 = vmul.f32 %v8485_v55, %v3236_v54  ;;  %v2858_v43 = vpop.f32.mrf.mxu3  ;;  %v2377_v54 = vld [vmem:[#allocation2 + $0x180] sm:$0xff]  ;;  %v7405_v29 = vld [vmem:[%s9649_s4 + $0x48] sm:$0xff] }
 0x2cb   : > { %v2544_v42 = vpop.f32.mrf.mxu2  ;;  %3782 = vmatmul.bf16.gmra.mxu1 %v8625_v15  ;;  %v3174_v23 = vpop.f32.mrf.mxu0  ;;  %v2692_v10 = vld [vmem:[#allocation2 + $0x189] sm:$0xff]  ;;  %v2427_v32 = vpack.c.bf16 %v2378_v7, %v2377_v54 }
 0x2cc   : > { %v3372_v35 = vadd.f32 %v8490_v20, %v3336_v12  ;;  %v2609_v63 = vadd.f32 %v2544_v42, %v8327_v46  ;;  %v3006_v46 = vld [vmem:[#allocation2 + $0x18a] sm:$0xff]  ;;  %v2691_v12 = vld [vmem:[#allocation2 + $0x181] sm:$0xff]  ;;  %4654 = vmatpush.bf16.msrb.mxu0 %v7421_v16 }
 0x2cd   : > { %4058 = vmatpush.bf16.msrb.mxu2 %v7405_v29  ;;  %4356 = vmatpush.bf16.msrb.mxu3 %v7413_v56  ;;  %v2741_v42 = vpack.c.bf16 %v2692_v10, %v2691_v12  ;;  %v7432_v12 = vld [vmem:[%s9649_s4 + $0x120] sm:$0xff] }
 0x2ce   : > { %vm3404_vm11 = vcmp.gt.f32.partialorder %v3372_v35, 0.0  ;;  %v3436_v3 = vmul.f32 0.01, %v3372_v35  ;;  %v2923_v36 = vadd.f32 %v2858_v43, %v2609_v63  ;;  %v7420_v63 = vld [vmem:[%s9649_s4 + $0xc0] sm:$0xff]  ;;  %4949 = vmatpush.bf16.msrb.mxu1 %v7432_v12 }
 0x2d0   : > { %v8643_v53 = vsel %vm3404_vm11, %v3372_v35, %v3436_v3  ;;  %v3237_v52 = vadd.f32 %v3172_v4, %v2923_v36  ;;  %v2295_v4 = vadd.f32 %v8322_v33, %v8337_v40  ;;  %v3055_v35 = vpack.c.bf16 %v3006_v46, %v3005_v50  ;;  %v7404_v33 = vld [vmem:[%s9649_s4 + $0x40] sm:$0xff]  ;;  %4655 = vmatpush.bf16.msrb.mxu0 %v7420_v63  ;;  %v3620_v29 = vld [vmem:[#allocation3 + $0x78] sm:$0xff] }
 0x2d1   : > { %3555 = vst [vmem:[#allocation3 + $0x81] sm:$0xff] %v8643_v53  ;;  %v7412_v40 = vld [vmem:[%s9649_s4 + $0x80] sm:$0xff]  ;;  %4059 = vmatpush.bf16.msrb.mxu2 %v7404_v33  ;;  %v2379_v33 = vld [vmem:[#allocation2 + $0x198] sm:$0xff] }
 0x2d2   : > { %v3337_v43 = vmul.f32 %v8485_v55, %v3237_v52  ;;  %v2860_v31 = vpop.f32.mrf.mxu3  ;;  %4357 = vmatpush.bf16.msrb.mxu3 %v7412_v40  ;;  %v2380_v40 = vld [vmem:[#allocation2 + $0x1a0] sm:$0xff] }
 0x2d3   : > { %v2546_v60 = vpop.f32.mrf.mxu2  ;;  %v3177_v16 = vpop.f32.mrf.mxu0 }
 0x2d4   : > { %v3373_v3 = vadd.f32 %v8490_v20, %v3337_v43  ;;  %v2610_v36 = vadd.f32 %v2546_v60, %v2295_v4  ;;  %v3007_v60 = vld [vmem:[#allocation2 + $0x19a] sm:$0xff] }
 0x2d6   : > { %vm3405_vm12 = vcmp.gt.f32.partialorder %v3373_v3, 0.0  ;;  %v3437_v50 = vmul.f32 0.01, %v3373_v3  ;;  %v2924_v46 = vadd.f32 %v2860_v31, %v2610_v36  ;;  %6938 = vmatmul.msk.bf16.gmra.mxu0 %vm280_vm0, %v3055_v35  ;;  %v3008_v31 = vld [vmem:[#allocation2 + $0x1a2] sm:$0xff] }
 0x2d7   : > { %6898 = vmatmul.msk.bf16.gmra.mxu3 %vm280_vm0, %v2741_v42 }
 0x2d8   : > { %v8668_v52 = vsel %vm3405_vm12, %v3373_v3, %v3437_v50  ;;  %v3238_v54 = vadd.f32 %v3174_v23, %v2924_v46  ;;  %6858 = vmatmul.msk.bf16.gmra.mxu2 %vm280_vm0, %v2427_v32  ;;  %v3621_v56 = vld [vmem:[#allocation3 + $0x80] sm:$0xff]  ;;  %v2693_v50 = vld [vmem:[#allocation2 + $0x199] sm:$0xff]  ;;  %v2694_v46 = vld [vmem:[#allocation2 + $0x1a1] sm:$0xff] }
 0x2d9   : > { %3556 = vst [vmem:[#allocation3 + $0x91] sm:$0xff] %v8668_v52  ;;  %v8673_v7 = vpack.c.bf16 %v3621_v56, %v3620_v29  ;;  %v3056_v56 = vpack.c.bf16 %v3008_v31, %v3007_v60 }
 0x2da   : > { %v3338_v10 = vmul.f32 %v8485_v55, %v3238_v54  ;;  %v2863_v43 = vpop.f32.mrf.mxu3 }
 0x2db   : > { %v2549_v4 = vpop.f32.mrf.mxu2  ;;  %3787 = vmatmul.bf16.gmra.mxu1 %v8673_v7  ;;  %v3179_v42 = vpop.f32.mrf.mxu0 }
 0x2dc   : > { %v3374_v32 = vadd.f32 %v8490_v20, %v3338_v10  ;;  %v2611_v23 = vadd.f32 %v2549_v4, %v8342_v41  ;;  %v2297_v41 = vadd.f32 %v8340_v62, %v8349_v44 }
 0x2de   : > { %vm3406_vm13 = vcmp.gt.f32.partialorder %v3374_v32, 0.0  ;;  %v3438_v35 = vmul.f32 0.01, %v3374_v32  ;;  %v2925_v63 = vadd.f32 %v2863_v43, %v2611_v23  ;;  %v2742_v23 = vpack.c.bf16 %v2694_v46, %v2693_v50 }
 0x2e0   : > { %v8682_v3 = vsel %vm3406_vm13, %v3374_v32, %v3438_v35  ;;  %v3239_v36 = vadd.f32 %v3177_v16, %v2925_v63  ;;  %v2428_v32 = vpack.c.bf16 %v2380_v40, %v2379_v33  ;;  %v3622_v62 = vld [vmem:[#allocation3 + $0x90] sm:$0xff] }
 0x2e1   : > { %3557 = vst [vmem:[#allocation3 + $0x99] sm:$0xff] %v8682_v3 }
 0x2e2   : > { %v3339_v29 = vmul.f32 %v8485_v55, %v3239_v36  ;;  %v2865_v10 = vpop.f32.mrf.mxu3 }
 0x2e3   : > { %v2551_v12 = vpop.f32.mrf.mxu2  ;;  %v3182_v43 = vpop.f32.mrf.mxu0 }
 0x2e4   : > { %v3375_v4 = vadd.f32 %v8490_v20, %v3339_v29  ;;  %v2612_v16 = vadd.f32 %v2551_v12, %v2297_v41  ;;  %v3907_v12 = vld [vmem:[#allocation3 + $0x1] sm:$0xff] }
 0x2e6   : > { %vm3407_vm14 = vcmp.gt.f32.partialorder %v3375_v4, 0.0  ;;  %v3439_v35 = vmul.f32 0.01, %v3375_v4  ;;  %v2926_v63 = vadd.f32 %v2865_v10, %v2612_v16  ;;  %6939 = vmatmul.msk.bf16.gmra.mxu0 %vm280_vm0, %v3056_v56  ;;  %v3908_v10 = vld [vmem:[#allocation3 + $0x9] sm:$0xff] }
 0x2e7   : > { %6899 = vmatmul.msk.bf16.gmra.mxu3 %vm280_vm0, %v2742_v23 }
 0x2e8   : > { %v8692_v54 = vsel %vm3407_vm14, %v3375_v4, %v3439_v35  ;;  %v3240_v37 = vadd.f32 %v3179_v42, %v2926_v63  ;;  %6859 = vmatmul.msk.bf16.gmra.mxu2 %vm280_vm0, %v2428_v32  ;;  %v3623_v44 = vld [vmem:[#allocation3 + $0x98] sm:$0xff]  ;;  %v4206_v4 = vld [vmem:[#allocation3 + $0xa] sm:$0xff]  ;;  %v2299_v32 = vadd.f32 %v8352_v45, %v8364_v22 }
 0x2e9   : > { %3558 = vst [vmem:[#allocation3 + $0xa9] sm:$0xff] %v8692_v54  ;;  %v8697_v60 = vpack.c.bf16 %v3623_v44, %v3622_v62  ;;  %v3971_v44 = vpack.c.bf16 %v3908_v10, %v3907_v12 }
 0x2ea   : > { %v3340_v31 = vmul.f32 %v8485_v55, %v3240_v37  ;;  %v2868_v33 = vpop.f32.mrf.mxu3  ;;  %v4205_v37 = vld [vmem:[#allocation3 + $0x2] sm:$0xff] }
 0x2eb   : > { %v2554_v36 = vpop.f32.mrf.mxu2  ;;  %3792 = vmatmul.bf16.gmra.mxu1 %v8697_v60  ;;  %v3184_v50 = vpop.f32.mrf.mxu0 }
 0x2ec   : > { %v3376_v40 = vadd.f32 %v8490_v20, %v3340_v31  ;;  %v2613_v42 = vadd.f32 %v2554_v36, %v8357_v34  ;;  %v4269_v31 = vpack.c.bf16 %v4206_v4, %v4205_v37  ;;  %v8725_v4 = vpop.f32.mrf.mxu1 }
 0x2ee   : > { %vm3408_vm15 = vcmp.gt.f32.partialorder %v3376_v40, 0.0  ;;  %v3440_v46 = vmul.f32 0.01, %v3376_v40  ;;  %v2927_v41 = vadd.f32 %v2868_v33, %v2613_v42 }
 0x2f0   : > { %v8703_v29 = vsel %vm3408_vm15, %v3376_v40, %v3440_v46  ;;  %v3241_v56 = vadd.f32 %v3182_v43, %v2927_v41  ;;  %v3624_v45 = vld [vmem:[#allocation3 + $0xa8] sm:$0xff] }
 0x2f1   : > { %3559 = vst [vmem:[#allocation3 + $0xb1] sm:$0xff] %v8703_v29  ;;  %v3978_v16 = vpack.c.bf16 %v8703_v29, %v8692_v54  ;;  %v7431_v41 = vld [vmem:[%s9649_s4 + $0x118] sm:$0xff] }
 0x2f2   : > { %v3341_v34 = vmul.f32 %v8485_v55, %v3241_v56  ;;  %v2870_v35 = vpop.f32.mrf.mxu3  ;;  %4950 = vmatpush.bf16.msrb.mxu1 %v7431_v41  ;;  %v9682_v29 = vld [vmem:[#allocation8_spill] sm:$0xff] }
 0x2f3   : > { %v2556_v23 = vpop.f32.mrf.mxu2  ;;  %v3187_v43 = vpop.f32.mrf.mxu0 }
 0x2f4   : > { %v3377_v63 = vadd.f32 %v8490_v20, %v3341_v34  ;;  %v2614_v62 = vadd.f32 %v2556_v23, %v2299_v32  ;;  %v8736_v41 = vpop.f32.mrf.mxu1 }
 0x2f6   : > { %vm3409_vm0 = vcmp.gt.f32.partialorder %v3377_v63, 0.0  ;;  %v3441_v36 = vmul.f32 0.01, %v3377_v63  ;;  %v2928_v33 = vadd.f32 %v2870_v35, %v2614_v62  ;;  %4656 = vmatmul.bf16.vlgmr.msrb.gmra.mxu0 %v8529_v58  ;;  %v2301_v62 = vadd.f32 %v8367_v11, %v8376_v61 }
 0x2f7   : > { %4358 = vmatmul.bf16.vlgmr.msrb.gmra.mxu3 %v4269_v31  ;;  %v9673_v61 = vpack.c.bf16 %v8511_v59, %v8497_v49 }
 0x2f8   : > { %v8713_v40 = vsel %vm3409_vm0, %v3377_v63, %v3441_v36  ;;  %v3242_v42 = vadd.f32 %v3184_v50, %v2928_v33  ;;  %4060 = vmatmul.bf16.vlgmr.msrb.gmra.mxu2 %v3971_v44  ;;  %v3625_v22 = vld [vmem:[#allocation3 + $0xb0] sm:$0xff]  ;;  %v4207_v36 = vld [vmem:[#allocation3 + $0x1a] sm:$0xff]  ;;  %v4208_v33 = vld [vmem:[#allocation3 + $0x22] sm:$0xff] }
 0x2f9   : > { %3560 = vst [vmem:[#allocation3 + $0xc1] sm:$0xff] %v8713_v40  ;;  %v8716_v46 = vpack.c.bf16 %v3625_v22, %v3624_v45 }
 0x2fa   : > { %v3342_v56 = vmul.f32 %v8485_v55, %v3242_v42  ;;  %v2873_v10 = vpop.f32.mrf.mxu3 }
 0x2fb   : > { %v2559_v12 = vpop.f32.mrf.mxu2  ;;  %3797 = vmatmul.bf16.gmra.mxu1 %v8716_v46  ;;  %v3189_v37 = vpop.f32.mrf.mxu0 }
 0x2fc   : > { %v3378_v58 = vadd.f32 %v8490_v20, %v3342_v56  ;;  %v2615_v50 = vadd.f32 %v2559_v12, %v8369_v30  ;;  %v4270_v12 = vpack.c.bf16 %v4208_v33, %v4207_v36 }
 0x2fe   : > { %vm3410_vm1 = vcmp.gt.f32.partialorder %v3378_v58, 0.0  ;;  %v3442_v32 = vmul.f32 0.01, %v3378_v58  ;;  %v2929_v34 = vadd.f32 %v2873_v10, %v2615_v50 }
 0x300   : > { %v8727_v23 = vsel %vm3410_vm1, %v3378_v58, %v3442_v32  ;;  %v3243_v35 = vadd.f32 %v3187_v43, %v2929_v34  ;;  %v3626_v58 = vld [vmem:[#allocation3 + $0xc0] sm:$0xff] }
 0x301   : > { %3561 = vst [vmem:[#allocation3 + $0xc9] sm:$0xff] %v8727_v23  ;;  %v3979_v63 = vpack.c.bf16 %v8727_v23, %v8713_v40 }
 0x302   : > { %v3343_v30 = vmul.f32 %v8485_v55, %v3243_v35  ;;  %v2875_v31 = vpop.f32.mrf.mxu3 }
 0x303   : > { %v2561_v44 = vpop.f32.mrf.mxu2  ;;  %v3192_v22 = vpop.f32.mrf.mxu0 }
 0x304   : > { %v3379_v42 = vadd.f32 %v8490_v20, %v3343_v30  ;;  %v2616_v45 = vadd.f32 %v2561_v44, %v2301_v62 }
 0x306   : > { %vm3411_vm2 = vcmp.gt.f32.partialorder %v3379_v42, 0.0  ;;  %v3443_v43 = vmul.f32 0.01, %v3379_v42  ;;  %v2930_v56 = vadd.f32 %v2875_v31, %v2616_v45  ;;  %4661 = vmatmul.bf16.gmra.mxu0 %v8553_v51  ;;  %v8753_v31 = vpop.f32.mrf.mxu1 }
 0x307   : > { %4363 = vmatmul.bf16.gmra.mxu3 %v4270_v12  ;;  %v4210_v12 = vld [vmem:[#allocation3 + $0x3a] sm:$0xff] }
 0x308   : > { %v8739_v10 = vsel %vm3411_vm2, %v3379_v42, %v3443_v43  ;;  %v3244_v11 = vadd.f32 %v3189_v37, %v2930_v56  ;;  %4065 = vmatmul.bf16.gmra.mxu2 %v9673_v61  ;;  %v3627_v50 = vld [vmem:[#allocation3 + $0xc8] sm:$0xff]  ;;  %v2303_v42 = vadd.f32 %v8379_v28, %v8391_v8  ;;  %v4209_v56 = vld [vmem:[#allocation3 + $0x32] sm:$0xff]  ;;  %v9674_v8 = vpack.c.bf16 %v8538_v39, %v8524_v24 }
 0x309   : > { %3562 = vst [vmem:[#allocation3 + $0xd9] sm:$0xff] %v8739_v10  ;;  %v8745_v32 = vpack.c.bf16 %v3627_v50, %v3626_v58 }
 0x30a   : > { %v3344_v34 = vmul.f32 %v8485_v55, %v3244_v11  ;;  %v2878_v62 = vpop.f32.mrf.mxu3 }
 0x30b   : > { %v2564_v35 = vpop.f32.mrf.mxu2  ;;  %3802 = vmatmul.bf16.gmra.mxu1 %v8745_v32  ;;  %v3194_v30 = vpop.f32.mrf.mxu0 }
 0x30c   : > { %v3380_v51 = vadd.f32 %v8490_v20, %v3344_v34  ;;  %v2617_v37 = vadd.f32 %v2564_v35, %v8384_v26  ;;  %v4271_v34 = vpack.c.bf16 %v4210_v12, %v4209_v56 }
 0x30e   : > { %vm3412_vm3 = vcmp.gt.f32.partialorder %v3380_v51, 0.0  ;;  %v3444_v49 = vmul.f32 0.01, %v3380_v51  ;;  %v2931_v59 = vadd.f32 %v2878_v62, %v2617_v37 }
 0x310   : > { %v8751_v44 = vsel %vm3412_vm3, %v3380_v51, %v3444_v49  ;;  %v3245_v36 = vadd.f32 %v3192_v22, %v2931_v59  ;;  %v3628_v51 = vld [vmem:[#allocation3 + $0xd8] sm:$0xff] }
 0x311   : > { %3563 = vst [vmem:[#allocation3 + $0xe1] sm:$0xff] %v8751_v44  ;;  %v3980_v33 = vpack.c.bf16 %v8751_v44, %v8739_v10  ;;  %v7466_v10 = vld [vmem:[%s9649_s4 + $0x230] sm:$0xff] }
 0x312   : > { %v3345_v45 = vmul.f32 %v8485_v55, %v3245_v36  ;;  %v2880_v43 = vpop.f32.mrf.mxu3 }
 0x313   : > { %v2566_v26 = vpop.f32.mrf.mxu2  ;;  %v3197_v58 = vpop.f32.mrf.mxu0 }
 0x314   : > { %v3381_v11 = vadd.f32 %v8490_v20, %v3345_v45  ;;  %v2618_v61 = vadd.f32 %v2566_v26, %v2303_v42 }
 0x316   : > { %vm3413_vm4 = vcmp.gt.f32.partialorder %v3381_v11, 0.0  ;;  %v3445_v22 = vmul.f32 0.01, %v3381_v11  ;;  %v2932_v50 = vadd.f32 %v2880_v43, %v2618_v61  ;;  %4666 = vmatmul.bf16.gmra.mxu0 %v8583_v2  ;;  %v7430_v2 = vld [vmem:[%s9649_s4 + $0x110] sm:$0xff]  ;;  %v2305_v61 = vadd.f32 %v8394_v57, %v8403_v47 }
 0x317   : > { %4368 = vmatmul.bf16.gmra.mxu3 %v4271_v34  ;;  %4951 = vmatpush.bf16.msrb.mxu1 %v7430_v2  ;;  %v4211_v34 = vld [vmem:[#allocation3 + $0x4a] sm:$0xff]  ;;  %v9675_v47 = vpack.c.bf16 %v8565_v13, %v8548_v19 }
 0x318   : > { %v8763_v35 = vsel %vm3413_vm4, %v3381_v11, %v3445_v22  ;;  %v3246_v62 = vadd.f32 %v3194_v30, %v2932_v50  ;;  %v8765_v28 = vpop.f32.mrf.mxu1  ;;  %4070 = vmatmul.bf16.gmra.mxu2 %v9674_v8  ;;  %v3629_v37 = vld [vmem:[#allocation3 + $0xe0] sm:$0xff] }
 0x319   : > { %3564 = vst [vmem:[#allocation3 + $0xf1] sm:$0xff] %v8763_v35  ;;  %v8771_v49 = vpack.c.bf16 %v3629_v37, %v3628_v51 }
 0x31a   : > { %v3346_v59 = vmul.f32 %v8485_v55, %v3246_v62  ;;  %v2883_v36 = vpop.f32.mrf.mxu3  ;;  %v4212_v62 = vld [vmem:[#allocation3 + $0x52] sm:$0xff] }
 0x31b   : > { %v2569_v30 = vpop.f32.mrf.mxu2  ;;  %3807 = vmatmul.bf16.gmra.mxu1 %v8771_v49  ;;  %v3199_v42 = vpop.f32.mrf.mxu0 }
 0x31c   : > { %v3382_v24 = vadd.f32 %v8490_v20, %v3346_v59  ;;  %v2619_v39 = vadd.f32 %v2569_v30, %v8396_v21  ;;  %v4272_v59 = vpack.c.bf16 %v4212_v62, %v4211_v34 }
 0x31e   : > { %vm3414_vm5 = vcmp.gt.f32.partialorder %v3382_v24, 0.0  ;;  %v3446_v45 = vmul.f32 0.01, %v3382_v24  ;;  %v2933_v26 = vadd.f32 %v2883_v36, %v2619_v39 }
 0x320   : > { %v8780_v43 = vsel %vm3414_vm5, %v3382_v24, %v3446_v45  ;;  %v3247_v56 = vadd.f32 %v3197_v58, %v2933_v26  ;;  %v8782_v12 = vpop.f32.mrf.mxu1  ;;  %v3630_v24 = vld [vmem:[#allocation3 + $0xf0] sm:$0xff] }
 0x321   : > { %3565 = vst [vmem:[#allocation3 + $0xf9] sm:$0xff] %v8780_v43  ;;  %v3981_v11 = vpack.c.bf16 %v8780_v43, %v8763_v35  ;;  %v7449_v43 = vld [vmem:[%s9649_s4 + $0x1a8] sm:$0xff] }
 0x322   : > { %v3347_v21 = vmul.f32 %v8485_v55, %v3247_v56  ;;  %v2885_v50 = vpop.f32.mrf.mxu3 }
 0x323   : > { %v2571_v22 = vpop.f32.mrf.mxu2  ;;  %v3202_v58 = vpop.f32.mrf.mxu0 }
 0x324   : > { %v3383_v8 = vadd.f32 %v8490_v20, %v3347_v21  ;;  %v2620_v51 = vadd.f32 %v2571_v22, %v2305_v61 }
 0x326   : > { %vm3415_vm6 = vcmp.gt.f32.partialorder %v3383_v8, 0.0  ;;  %v3447_v37 = vmul.f32 0.01, %v3383_v8  ;;  %v2934_v2 = vadd.f32 %v2885_v50, %v2620_v51  ;;  %4671 = vmatmul.bf16.gmra.mxu0 %v8625_v15 }
 0x327   : > { %4373 = vmatmul.bf16.gmra.mxu3 %v4272_v59  ;;  %v4214_v59 = vld [vmem:[#allocation3 + $0x6a] sm:$0xff] }
 0x328   : > { %v8792_v30 = vsel %vm3415_vm6, %v3383_v8, %v3447_v37  ;;  %v3248_v36 = vadd.f32 %v3199_v42, %v2934_v2  ;;  %v8794_v57 = vpop.f32.mrf.mxu1  ;;  %4075 = vmatmul.bf16.gmra.mxu2 %v9675_v47  ;;  %v3631_v39 = vld [vmem:[#allocation3 + $0xf8] sm:$0xff]  ;;  %v2307_v8 = vadd.f32 %v8406_v27, %v8418_v14  ;;  %v4213_v2 = vld [vmem:[#allocation3 + $0x62] sm:$0xff]  ;;  %v9676_v14 = vpack.c.bf16 %v8592_v9, %v8578_v5 }
 0x329   : > { %3566 = vst [vmem:[#allocation3 + $0x109] sm:$0xff] %v8792_v30  ;;  %v8800_v45 = vpack.c.bf16 %v3631_v39, %v3630_v24 }
 0x32a   : > { %v3348_v26 = vmul.f32 %v8485_v55, %v3248_v36  ;;  %v2888_v56 = vpop.f32.mrf.mxu3 }
 0x32b   : > { %v2574_v15 = vpop.f32.mrf.mxu2  ;;  %3812 = vmatmul.bf16.gmra.mxu1 %v8800_v45  ;;  %v3204_v21 = vpop.f32.mrf.mxu0 }
 0x32c   : > { %v3384_v42 = vadd.f32 %v8490_v20, %v3348_v26  ;;  %v2621_v61 = vadd.f32 %v2574_v15, %v8411_v25  ;;  %v4273_v26 = vpack.c.bf16 %v4214_v59, %v4213_v2 }
 0x32e   : > { %vm3416_vm7 = vcmp.gt.f32.partialorder %v3384_v42, 0.0  ;;  %v3448_v19 = vmul.f32 0.01, %v3384_v42  ;;  %v2935_v13 = vadd.f32 %v2888_v56, %v2621_v61 }
 0x330   : > { %v8806_v22 = vsel %vm3416_vm7, %v3384_v42, %v3448_v19  ;;  %v3249_v50 = vadd.f32 %v3202_v58, %v2935_v13  ;;  %v8808_v34 = vpop.f32.mrf.mxu1  ;;  %v3632_v42 = vld [vmem:[#allocation3 + $0x108] sm:$0xff] }
 0x331   : > { %3567 = vst [vmem:[#allocation3 + $0x111] sm:$0xff] %v8806_v22  ;;  %v3982_v62 = vpack.c.bf16 %v8806_v22, %v8792_v30  ;;  %v7465_v22 = vld [vmem:[%s9649_s4 + $0x228] sm:$0xff] }
 0x332   : > { %v3349_v51 = vmul.f32 %v8485_v55, %v3249_v50  ;;  %v2890_v37 = vpop.f32.mrf.mxu3 }
 0x333   : > { %v2576_v25 = vpop.f32.mrf.mxu2  ;;  %v3207_v58 = vpop.f32.mrf.mxu0 }
 0x334   : > { %v3385_v36 = vadd.f32 %v8490_v20, %v3349_v51  ;;  %v2622_v47 = vadd.f32 %v2576_v25, %v2307_v8 }
 0x336   : > { %vm3417_vm8 = vcmp.gt.f32.partialorder %v3385_v36, 0.0  ;;  %v3449_v24 = vmul.f32 0.01, %v3385_v36  ;;  %v2936_v39 = vadd.f32 %v2890_v37, %v2622_v47  ;;  %4676 = vmatmul.bf16.gmra.mxu0 %v8673_v7  ;;  %v7429_v7 = vld [vmem:[%s9649_s4 + $0x108] sm:$0xff] }
 0x337   : > { %4378 = vmatmul.bf16.gmra.mxu3 %v4273_v26  ;;  %4952 = vmatpush.bf16.msrb.mxu1 %v7429_v7  ;;  %v8853_v26 = vld [vmem:[%s9648_s3] ss:$0 sm:$0xff] }
 0x338   : > { %v8818_v15 = vsel %vm3417_vm8, %v3385_v36, %v3449_v24  ;;  %v3250_v56 = vadd.f32 %v3204_v21, %v2936_v39  ;;  %v8820_v27 = vpop.f32.mrf.mxu1  ;;  %4080 = vmatmul.bf16.gmra.mxu2 %v9676_v14  ;;  %v3633_v61 = vld [vmem:[#allocation3 + $0x110] sm:$0xff]  ;;  %v4216_v39 = vld [vmem:[#allocation3 + $0x82] sm:$0xff] }
 0x339   : > { %3568 = vst [vmem:[#allocation3 + $0x121] sm:$0xff] %v8818_v15  ;;  %v8826_v19 = vpack.c.bf16 %v3633_v61, %v3632_v42 }
 0x33a   : > { %v3350_v13 = vmul.f32 %v8485_v55, %v3250_v56  ;;  %v2893_v50 = vpop.f32.mrf.mxu3 }
 0x33b   : > { %v2579_v21 = vpop.f32.mrf.mxu2  ;;  %3817 = vmatmul.bf16.gmra.mxu1 %v8826_v19  ;;  %v3209_v8 = vpop.f32.mrf.mxu0 }
 0x33c   : > { %v3386_v5 = vadd.f32 %v8490_v20, %v3350_v13  ;;  %v2623_v9 = vadd.f32 %v2579_v21, %v8423_v17  ;;  %v2309_v20 = vadd.f32 %v8421_v1, %v8430_v0  ;;  %v8847_v17 = vld [vmem:[%s9647_s2] ss:$0 sm:$0xff] }
 0x33e   : > { %vm3418_vm9 = vcmp.gt.f32.partialorder %v3386_v5, 0.0  ;;  %v3450_v51 = vmul.f32 0.01, %v3386_v5  ;;  %v2937_v25 = vadd.f32 %v2893_v50, %v2623_v9  ;;  %v9677_v50 = vpack.c.bf16 %v8643_v53, %v8614_v38 }
 0x340   : > { %v8835_v37 = vsel %vm3418_vm9, %v3386_v5, %v3450_v51  ;;  %v3251_v2 = vadd.f32 %v3207_v58, %v2937_v25  ;;  %v8837_v59 = vpop.f32.mrf.mxu1  ;;  %v4215_v58 = vld [vmem:[#allocation3 + $0x7a] sm:$0xff] }
 0x341   : > { %3569 = vst [vmem:[#allocation3 + $0x129] sm:$0xff] %v8835_v37  ;;  %v3983_v55 = vpack.c.bf16 %v8835_v37, %v8818_v15  ;;  %v4274_v61 = vpack.c.bf16 %v4216_v39, %v4215_v58  ;;  %v3634_v5 = vld [vmem:[#allocation3 + $0x120] sm:$0xff]  ;;  %v7448_v37 = vld [vmem:[%s9649_s4 + $0x1a0] sm:$0xff] }
 0x342   : > { %v3351_v36 = vmul.f32 %v8847_v17, %v3251_v2  ;;  %v2895_v24 = vpop.f32.mrf.mxu3 }
 0x343   : > { %v2581_v47 = vpop.f32.mrf.mxu2  ;;  %v3212_v1 = vpop.f32.mrf.mxu0 }
 0x344   : > { %v3387_v56 = vadd.f32 %v8853_v26, %v3351_v36  ;;  %v2624_v14 = vadd.f32 %v2581_v47, %v2309_v20  ;;  %v9678_v20 = vld [vmem:[#allocation12_spill] sm:$0xff] }
 0x346   : > { %vm3419_vm10 = vcmp.gt.f32.partialorder %v3387_v56, 0.0  ;;  %v3451_v0 = vmul.f32 0.01, %v3387_v56  ;;  %v2938_v42 = vadd.f32 %v2895_v24, %v2624_v14  ;;  %4681 = vmatmul.bf16.gmra.mxu0 %v8697_v60  ;;  %v9679_v14 = vld [vmem:[#allocation6_spill] sm:$0xff] }
 0x347   : > { %4383 = vmatmul.bf16.gmra.mxu3 %v4274_v61 }
 0x348   : > { %v8857_v7 = vsel %vm3419_vm10, %v3387_v56, %v3451_v0  ;;  %v3252_v13 = vadd.f32 %v3209_v8, %v2938_v42  ;;  %v8859_v21 = vpop.f32.mrf.mxu1  ;;  %4085 = vmatmul.bf16.gmra.mxu2 %v9677_v50  ;;  %v3635_v9 = vld [vmem:[#allocation3 + $0x128] sm:$0xff]  ;;  %v9680_v0 = vld [vmem:[#allocation5_spill] sm:$0xff] }
 0x349   : > { %3570 = vst [vmem:[#allocation3 + $0x139] sm:$0xff] %v8857_v7  ;;  %v8865_v51 = vpack.c.bf16 %v3635_v9, %v3634_v5  ;;  %v2311_v42 = vadd.f32 %v9680_v0, %v9679_v14  ;;  %v4217_v5 = vld [vmem:[#allocation3 + $0x92] sm:$0xff]  ;;  %v4218_v9 = vld [vmem:[#allocation3 + $0x9a] sm:$0xff] }
 0x34a   : > { %v3352_v25 = vmul.f32 %v8847_v17, %v3252_v13  ;;  %v2898_v2 = vpop.f32.mrf.mxu3 }
 0x34b   : > { %v2584_v60 = vpop.f32.mrf.mxu2  ;;  %3822 = vmatmul.bf16.gmra.mxu1 %v8865_v51  ;;  %v3214_v47 = vpop.f32.mrf.mxu0 }
 0x34c   : > { %v3388_v8 = vadd.f32 %v8853_v26, %v3352_v25  ;;  %v2625_v36 = vadd.f32 %v2584_v60, %v9678_v20  ;;  %v4275_v20 = vpack.c.bf16 %v4218_v9, %v4217_v5 }
 0x34e   : > { %vm3420_vm11 = vcmp.gt.f32.partialorder %v3388_v8, 0.0  ;;  %v3452_v38 = vmul.f32 0.01, %v3388_v8  ;;  %v2939_v53 = vadd.f32 %v2898_v2, %v2625_v36 }
 0x350   : > { %v8871_v24 = vsel %vm3420_vm11, %v3388_v8, %v3452_v38  ;;  %v3253_v58 = vadd.f32 %v3212_v1, %v2939_v53  ;;  %v8873_v39 = vpop.f32.mrf.mxu1  ;;  %v3636_v14 = vld [vmem:[#allocation3 + $0x138] sm:$0xff] }
 0x351   : > { %3571 = vst [vmem:[#allocation3 + $0x141] sm:$0xff] %v8871_v24  ;;  %v3984_v56 = vpack.c.bf16 %v8871_v24, %v8857_v7  ;;  %v7454_v7 = vld [vmem:[%s9649_s4 + $0x1d0] sm:$0xff] }
 0x352   : > { %v3353_v61 = vmul.f32 %v8847_v17, %v3253_v58  ;;  %v2900_v50 = vpop.f32.mrf.mxu3  ;;  %v9681_v58 = vpack.c.bf16 %v8682_v3, %v8668_v52 }
 0x353   : > { %v2586_v13 = vpop.f32.mrf.mxu2  ;;  %v3217_v1 = vpop.f32.mrf.mxu0 }
 0x354   : > { %v3389_v25 = vadd.f32 %v8853_v26, %v3353_v61  ;;  %v2626_v60 = vadd.f32 %v2586_v13, %v2311_v42 }
 0x356   : > { %vm3421_vm12 = vcmp.gt.f32.partialorder %v3389_v25, 0.0  ;;  %v3453_v2 = vmul.f32 0.01, %v3389_v25  ;;  %v2940_v8 = vadd.f32 %v2900_v50, %v2626_v60  ;;  %4686 = vmatmul.bf16.gmra.mxu0 %v8716_v46  ;;  %v7428_v46 = vld [vmem:[%s9649_s4 + $0x100] sm:$0xff] }
 0x357   : > { %4388 = vmatmul.bf16.gmra.mxu3 %v4275_v20  ;;  %4953 = vmatpush.bf16.msrb.mxu1 %v7428_v46  ;;  %v4220_v46 = vld [vmem:[#allocation3 + $0xb2] sm:$0xff] }
 0x358   : > { %v8883_v36 = vsel %vm3421_vm12, %v3389_v25, %v3453_v2  ;;  %v3254_v38 = vadd.f32 %v3214_v47, %v2940_v8  ;;  %v8885_v53 = vpop.f32.mrf.mxu1  ;;  %4090 = vmatmul.bf16.gmra.mxu2 %v9681_v58  ;;  %v3637_v0 = vld [vmem:[#allocation3 + $0x140] sm:$0xff]  ;;  %v7443_v8 = vld [vmem:[%s9649_s4 + $0x178] sm:$0xff] }
 0x359   : > { %3572 = vst [vmem:[#allocation3 + $0x151] sm:$0xff] %v8883_v36  ;;  %v8891_v42 = vpack.c.bf16 %v3637_v0, %v3636_v14  ;;  %v4219_v0 = vld [vmem:[#allocation3 + $0xaa] sm:$0xff]  ;;  %5244 = vmatpush.bf16.msra.mxu2 %v7443_v8 }
 0x35a   : > { %v3354_v61 = vmul.f32 %v8847_v17, %v3254_v38  ;;  %v2903_v13 = vpop.f32.mrf.mxu3  ;;  %v2313_v38 = vadd.f32 %v8451_v6, %v8457_v48 }
 0x35b   : > { %v2589_v47 = vpop.f32.mrf.mxu2  ;;  %3827 = vmatmul.bf16.gmra.mxu1 %v8891_v42  ;;  %v3219_v50 = vpop.f32.mrf.mxu0 }
 0x35c   : > { %v3390_v52 = vadd.f32 %v8853_v26, %v3354_v61  ;;  %v2627_v3 = vadd.f32 %v2589_v47, %v8448_v18  ;;  %v7451_v18 = vld [vmem:[%s9649_s4 + $0x1b8] sm:$0xff] }
 0x35d   : > { %5543 = vmatpush.bf16.msra.mxu3 %v7451_v18  ;;  %v7459_v18 = vld [vmem:[%s9649_s4 + $0x1f8] sm:$0xff] }
 0x35e   : > { %vm3422_vm13 = vcmp.gt.f32.partialorder %v3390_v52, 0.0  ;;  %v3454_v5 = vmul.f32 0.01, %v3390_v52  ;;  %v2941_v9 = vadd.f32 %v2903_v13, %v2627_v3  ;;  %5841 = vmatpush.bf16.msra.mxu0 %v7459_v18 }
 0x360   : > { %v8900_v25 = vsel %vm3422_vm13, %v3390_v52, %v3454_v5  ;;  %v3255_v60 = vadd.f32 %v3217_v1, %v2941_v9  ;;  %v8902_v2 = vpop.f32.mrf.mxu1  ;;  %v4276_v5 = vpack.c.bf16 %v4220_v46, %v4219_v0  ;;  %v7467_v46 = vld [vmem:[%s9649_s4 + $0x238] sm:$0xff] }
 0x361   : > { %3573 = vst [vmem:[#allocation3 + $0x159] sm:$0xff] %v8900_v25  ;;  %v3985_v20 = vpack.c.bf16 %v8900_v25, %v8883_v36  ;;  %6139 = vmatpush.bf16.msra.mxu1 %v7467_v46 }
 0x362   : > { %v3355_v1 = vmul.f32 %v8847_v17, %v3255_v60  ;;  %v2905_v14 = vpop.f32.mrf.mxu3  ;;  %v3638_v60 = vld [vmem:[#allocation3 + $0x150] sm:$0xff] }
 0x363   : > { %v2591_v58 = vpop.f32.mrf.mxu2  ;;  %v3222_v13 = vpop.f32.mrf.mxu0 }
 0x364   : > { %v3391_v61 = vadd.f32 %v8853_v26, %v3355_v1  ;;  %v2628_v47 = vadd.f32 %v2591_v58, %v2313_v38 }
 0x365   : > { %6140 = vmatpush.bf16.msra.mxu1 %v7466_v10 }
 0x366   : > { %vm3423_vm14 = vcmp.gt.f32.partialorder %v3391_v61, 0.0  ;;  %v3455_v52 = vmul.f32 0.01, %v3391_v61  ;;  %v2942_v3 = vadd.f32 %v2905_v14, %v2628_v47  ;;  %4691 = vmatmul.bf16.gmra.mxu0 %v8745_v32 }
 0x367   : > { %4393 = vmatmul.bf16.gmra.mxu3 %v4276_v5  ;;  %v9683_v5 = vld [vmem:[#allocation7_spill] sm:$0xff] }
 0x368   : > { %v8918_v9 = vsel %vm3423_vm14, %v3391_v61, %v3455_v52  ;;  %v3256_v6 = vadd.f32 %v3219_v50, %v2942_v3  ;;  %v8920_v48 = vpop.f32.mrf.mxu1  ;;  %4095 = vmatmul.bf16.gmra.mxu2 %v3978_v16  ;;  %v3639_v8 = vld [vmem:[#allocation3 + $0x158] sm:$0xff] }
 0x369   : > { %3574 = vst [vmem:[#allocation3 + $0x169] sm:$0xff] %v8918_v9  ;;  %v8929_v32 = vpack.c.bf16 %v3639_v8, %v3638_v60  ;;  %6141 = vmatpush.bf16.msra.mxu1 %v7465_v22  ;;  %v4810_v22 = vld [vmem:[#allocation3 + $0x81] sm:$0xff] }
 0x36a   : > { %v3356_v38 = vmul.f32 %v8847_v17, %v3256_v6  ;;  %v2908_v1 = vpop.f32.mrf.mxu3  ;;  %v2315_v6 = vadd.f32 %v8725_v4, %v9683_v5 }
 0x36b   : > { %v2594_v50 = vpop.f32.mrf.mxu2  ;;  %3832 = vmatmul.bf16.gmra.mxu1 %v8929_v32  ;;  %v3224_v58 = vpop.f32.mrf.mxu0 }
 0x36c   : > { %v3392_v54 = vadd.f32 %v8853_v26, %v3356_v38  ;;  %v2629_v16 = vadd.f32 %v2594_v50, %v9682_v29  ;;  %v4221_v38 = vld [vmem:[#allocation3 + $0xc2] sm:$0xff]  ;;  %v4222_v50 = vld [vmem:[#allocation3 + $0xca] sm:$0xff] }
 0x36e   : > { %vm3424_vm15 = vcmp.gt.f32.partialorder %v3392_v54, 0.0  ;;  %v3456_v14 = vmul.f32 0.01, %v3392_v54  ;;  %v2943_v0 = vadd.f32 %v2908_v1, %v2629_v16 }
 0x370   : > { %v8938_v61 = vsel %vm3424_vm15, %v3392_v54, %v3456_v14  ;;  %v3257_v47 = vadd.f32 %v3222_v13, %v2943_v0  ;;  %v8940_v52 = vpop.f32.mrf.mxu1  ;;  %v4277_v14 = vpack.c.bf16 %v4222_v50, %v4221_v38  ;;  %v3640_v4 = vld [vmem:[#allocation3 + $0x168] sm:$0xff] }
 0x371   : > { %3575 = vst [vmem:[#allocation3 + $0x171] sm:$0xff] %v8938_v61 }
 0x372   : > { %v3357_v60 = vmul.f32 %v8847_v17, %v3257_v47  ;;  %v2910_v18 = vpop.f32.mrf.mxu3 }
 0x373   : > { %v2596_v8 = vpop.f32.mrf.mxu2  ;;  %v4657_v54 = vpop.f32.mrf.mxu0 }
 0x374   : > { %v3393_v1 = vadd.f32 %v8853_v26, %v3357_v60  ;;  %v2630_v13 = vadd.f32 %v2596_v8, %v2315_v6 }
 0x376   : > { %vm3425_vm0 = vcmp.gt.f32.partialorder %v3393_v1, 0.0  ;;  %v3457_v29 = vmul.f32 0.01, %v3393_v1  ;;  %v2944_v16 = vadd.f32 %v2910_v18, %v2630_v13  ;;  %4696 = vmatmul.bf16.gmra.mxu0 %v8771_v49  ;;  %v4223_v13 = vld [vmem:[#allocation3 + $0xda] sm:$0xff] }
 0x377   : > { %4398 = vmatmul.bf16.gmra.mxu3 %v4277_v14 }
 0x378   : > { %v3489_v0 = vsel %vm3425_vm0, %v3393_v1, %v3457_v29  ;;  %v3258_v46 = vadd.f32 %v3224_v58, %v2944_v16  ;;  %v8950_v3 = vpop.f32.mrf.mxu1  ;;  %4100 = vmatmul.bf16.gmra.mxu2 %v3979_v63  ;;  %v3641_v47 = vld [vmem:[#allocation3 + $0x170] sm:$0xff]  ;;  %v7442_v63 = vld [vmem:[%s9649_s4 + $0x170] sm:$0xff] }
 0x379   : > { %3576 = vst [vmem:[#allocation3 + $0x181] sm:$0xff] %v3489_v0  ;;  %v8955_v5 = vpack.c.bf16 %v3641_v47, %v3640_v4  ;;  %5245 = vmatpush.bf16.msra.mxu2 %v7442_v63  ;;  %v4224_v29 = vld [vmem:[#allocation3 + $0xe2] sm:$0xff]  ;;  %v4225_v63 = vld [vmem:[#allocation3 + $0xf2] sm:$0xff] }
 0x37a   : > { %v3358_v6 = vmul.f32 %v8847_v17, %v3258_v46  ;;  %v4359_v60 = vpop.f32.mrf.mxu3  ;;  %v7450_v17 = vld [vmem:[%s9649_s4 + $0x1b0] sm:$0xff]  ;;  %v4278_v46 = vpack.c.bf16 %v4224_v29, %v4223_v13 }
 0x37b   : > { %3837 = vmatmul.bf16.gmra.mxu1 %v8955_v5  ;;  %v4061_v49 = vpop.f32.mrf.mxu2  ;;  %v4659_v18 = vpop.f32.mrf.mxu0  ;;  %5544 = vmatpush.bf16.msra.mxu3 %v7450_v17  ;;  %v4802_v4 = vld [vmem:[#allocation3 + $0x21] sm:$0xff]  ;;  %v4804_v13 = vld [vmem:[#allocation3 + $0x39] sm:$0xff] }
 0x37c   : > { %v3394_v58 = vadd.f32 %v8853_v26, %v3358_v6  ;;  %v4141_v8 = vadd.f32 %v4061_v49, %v8736_v41  ;;  %v7458_v6 = vld [vmem:[%s9649_s4 + $0x1f0] sm:$0xff] }
 0x37d   : > { %5842 = vmatpush.bf16.msra.mxu0 %v7458_v6  ;;  %v7441_v6 = vld [vmem:[%s9649_s4 + $0x168] sm:$0xff] }
 0x37e   : > { %vm3426_vm1 = vcmp.gt.f32.partialorder %v3394_v58, 0.0  ;;  %v3458_v40 = vmul.f32 0.01, %v3394_v58  ;;  %v4439_v23 = vadd.f32 %v4359_v60, %v4141_v8  ;;  %5246 = vmatpush.bf16.msra.mxu2 %v7441_v6 }
 0x37f   : > { %5545 = vmatpush.bf16.msra.mxu3 %v7449_v43  ;;  %v4808_v43 = vld [vmem:[#allocation3 + $0x69] sm:$0xff] }
 0x380   : > { %v3490_v38 = vsel %vm3426_vm1, %v3394_v58, %v3458_v40  ;;  %v8964_v50 = vpop.f32.mrf.mxu1  ;;  %v8969_v1 = vadd.f32 %v4657_v54, %v4439_v23  ;;  %v4801_v54 = vld [vmem:[#allocation3 + $0x19] sm:$0xff] }
 0x381   : > { %3577 = vst [vmem:[#allocation3 + $0x189] sm:$0xff] %v3490_v38  ;;  %v4226_v38 = vld [vmem:[#allocation3 + $0xfa] sm:$0xff] }
 0x382   : > { %v4361_v26 = vpop.f32.mrf.mxu3 }
 0x383   : > { %v4063_v41 = vpop.f32.mrf.mxu2  ;;  %v4662_v14 = vpop.f32.mrf.mxu0  ;;  %5546 = vmatpush.bf16.msra.mxu3 %v7448_v37 }
 0x384   : > { %v4142_v16 = vadd.f32 %v4063_v41, %v8753_v31  ;;  %v4865_v31 = vpack.c.bf16 %v4802_v4, %v4801_v54 }
 0x386   : > { %v4440_v0 = vadd.f32 %v4361_v26, %v4142_v16  ;;  %4701 = vmatmul.bf16.gmra.mxu0 %v8800_v45  ;;  %v4803_v16 = vld [vmem:[#allocation3 + $0x31] sm:$0xff] }
 0x387   : > { %4403 = vmatmul.bf16.gmra.mxu3 %v4278_v46 }
 0x388   : > { %v8973_v47 = vpop.f32.mrf.mxu1  ;;  %4105 = vmatmul.bf16.gmra.mxu2 %v3980_v33  ;;  %v8981_v49 = vadd.f32 %v4659_v18, %v4440_v0  ;;  %v9000_v0 = vpack.c.bf16 %v4804_v13, %v4803_v16  ;;  %v4534_v36 = vld [vmem:[#allocation3 + $0x188] sm:$0xff] }
 0x38a   : > { %v4364_v45 = vpop.f32.mrf.mxu3 }
 0x38b   : > { %v4066_v60 = vpop.f32.mrf.mxu2  ;;  %4954 = vmatmul.bf16.vlgmr.msrb.gmra.mxu1 %v4865_v31  ;;  %v4664_v8 = vpop.f32.mrf.mxu0 }
 0x38c   : > { %v4143_v58 = vadd.f32 %v4066_v60, %v8765_v28  ;;  %v4279_v28 = vpack.c.bf16 %v4226_v38, %v4225_v63  ;;  %v4805_v63 = vld [vmem:[#allocation3 + $0x49] sm:$0xff]  ;;  %v7457_v38 = vld [vmem:[%s9649_s4 + $0x1e8] sm:$0xff] }
 0x38d   : > { %5843 = vmatpush.bf16.msra.mxu0 %v7457_v38  ;;  %v4231_v38 = vld [vmem:[#allocation3 + $0x13a] sm:$0xff] }
 0x38e   : > { %v4441_v40 = vadd.f32 %v4364_v45, %v4143_v58  ;;  %v4227_v45 = vld [vmem:[#allocation3 + $0x10a] sm:$0xff] }
 0x390   : > { %v8987_v44 = vpop.f32.mrf.mxu1  ;;  %v8989_v33 = vadd.f32 %v4662_v14, %v4441_v40 }
 0x392   : > { %v4366_v23 = vpop.f32.mrf.mxu3 }
 0x393   : > { %v4068_v18 = vpop.f32.mrf.mxu2  ;;  %v4667_v41 = vpop.f32.mrf.mxu0 }
 0x394   : > { %v4144_v17 = vadd.f32 %v4068_v18, %v8782_v12  ;;  %v4806_v18 = vld [vmem:[#allocation3 + $0x51] sm:$0xff] }
 0x396   : > { %v4442_v26 = vadd.f32 %v4366_v23, %v4144_v17  ;;  %4706 = vmatmul.bf16.gmra.mxu0 %v8826_v19 }
 0x397   : > { %4408 = vmatmul.bf16.gmra.mxu3 %v4279_v28 }
 0x398   : > { %v8993_v29 = vpop.f32.mrf.mxu1  ;;  %4110 = vmatmul.bf16.gmra.mxu2 %v3981_v11  ;;  %v8998_v14 = vadd.f32 %v4664_v8, %v4442_v26 }
 0x39a   : > { %v4369_v12 = vpop.f32.mrf.mxu3 }
 0x39b   : > { %v4071_v46 = vpop.f32.mrf.mxu2  ;;  %4959 = vmatmul.bf16.gmra.mxu1 %v9000_v0  ;;  %v4669_v4 = vpop.f32.mrf.mxu0 }
 0x39c   : > { %v4145_v19 = vadd.f32 %v4071_v46, %v8794_v57  ;;  %v4228_v57 = vld [vmem:[#allocation3 + $0x112] sm:$0xff] }
 0x39d   : > { %v4280_v10 = vpack.c.bf16 %v4228_v57, %v4227_v45 }
 0x39e   : > { %v4443_v54 = vadd.f32 %v4369_v12, %v4145_v19  ;;  %v4229_v12 = vld [vmem:[#allocation3 + $0x122] sm:$0xff]  ;;  %v4230_v19 = vld [vmem:[#allocation3 + $0x12a] sm:$0xff] }
 0x3a0   : > { %v9007_v35 = vpop.f32.mrf.mxu1  ;;  %v9012_v11 = vadd.f32 %v4667_v41, %v4443_v54 }
 0x3a2   : > { %v4371_v60 = vpop.f32.mrf.mxu3 }
 0x3a3   : > { %v4073_v31 = vpop.f32.mrf.mxu2  ;;  %v4672_v8 = vpop.f32.mrf.mxu0 }
 0x3a4   : > { %v4146_v58 = vadd.f32 %v4073_v31, %v8808_v34  ;;  %v9026_v34 = vpack.c.bf16 %v4806_v18, %v4805_v63 }
 0x3a6   : > { %v4444_v40 = vadd.f32 %v4371_v60, %v4146_v58  ;;  %4711 = vmatmul.bf16.gmra.mxu0 %v8865_v51  ;;  %v4807_v60 = vld [vmem:[#allocation3 + $0x61] sm:$0xff] }
 0x3a7   : > { %4413 = vmatmul.bf16.gmra.mxu3 %v4280_v10  ;;  %v9046_v57 = vpack.c.bf16 %v4808_v43, %v4807_v60  ;;  %v7440_v10 = vld [vmem:[%s9649_s4 + $0x160] sm:$0xff]  ;;  %v7446_v43 = vld [vmem:[%s9649_s4 + $0x190] sm:$0xff] }
 0x3a8   : > { %v9016_v23 = vpop.f32.mrf.mxu1  ;;  %4115 = vmatmul.bf16.gmra.mxu2 %v3982_v62  ;;  %v9024_v17 = vadd.f32 %v4669_v4, %v4444_v40 }
 0x3a9   : > { %5247 = vmatpush.bf16.msra.mxu2 %v7440_v10  ;;  %v7452_v10 = vld [vmem:[%s9649_s4 + $0x1c0] sm:$0xff] }
 0x3aa   : > { %v4374_v41 = vpop.f32.mrf.mxu3 }
 0x3ab   : > { %v4076_v51 = vpop.f32.mrf.mxu2  ;;  %4964 = vmatmul.bf16.gmra.mxu1 %v9026_v34  ;;  %v4674_v28 = vpop.f32.mrf.mxu0 }
 0x3ac   : > { %v4147_v26 = vadd.f32 %v4076_v51, %v8820_v27  ;;  %v4281_v27 = vpack.c.bf16 %v4230_v19, %v4229_v12  ;;  %v4232_v51 = vld [vmem:[#allocation3 + $0x142] sm:$0xff]  ;;  %v4809_v12 = vld [vmem:[#allocation3 + $0x79] sm:$0xff] }
 0x3ae   : > { %v4445_v30 = vadd.f32 %v4374_v41, %v4147_v26 }
 0x3b0   : > { %v9033_v62 = vpop.f32.mrf.mxu1  ;;  %v9035_v13 = vadd.f32 %v4672_v8, %v4445_v30  ;;  %v4282_v30 = vpack.c.bf16 %v4232_v51, %v4231_v38 }
 0x3b2   : > { %v4376_v46 = vpop.f32.mrf.mxu3 }
 0x3b3   : > { %v4078_v16 = vpop.f32.mrf.mxu2  ;;  %v4677_v54 = vpop.f32.mrf.mxu0 }
 0x3b4   : > { %v4148_v4 = vadd.f32 %v4078_v16, %v8837_v59  ;;  %v7455_v16 = vld [vmem:[%s9649_s4 + $0x1d8] sm:$0xff] }
 0x3b6   : > { %v4446_v6 = vadd.f32 %v4376_v46, %v4148_v4  ;;  %4716 = vmatmul.bf16.gmra.mxu0 %v8891_v42  ;;  %v9081_v4 = vpack.c.bf16 %v4810_v22, %v4809_v12  ;;  %v4812_v22 = vld [vmem:[#allocation3 + $0x99] sm:$0xff] }
 0x3b7   : > { %4418 = vmatmul.bf16.gmra.mxu3 %v4281_v27  ;;  %v7438_v27 = vld [vmem:[%s9649_s4 + $0x150] sm:$0xff] }
 0x3b8   : > { %v9039_v31 = vpop.f32.mrf.mxu1  ;;  %4120 = vmatmul.bf16.gmra.mxu2 %v3983_v55  ;;  %v9044_v45 = vadd.f32 %v4674_v28, %v4446_v6 }
 0x3ba   : > { %v4379_v59 = vpop.f32.mrf.mxu3 }
 0x3bb   : > { %v4081_v58 = vpop.f32.mrf.mxu2  ;;  %4969 = vmatmul.bf16.gmra.mxu1 %v9046_v57  ;;  %v4679_v8 = vpop.f32.mrf.mxu0 }
 0x3bc   : > { %v4149_v42 = vadd.f32 %v4081_v58, %v8859_v21  ;;  %v7456_v21 = vld [vmem:[%s9649_s4 + $0x1e0] sm:$0xff] }
 0x3bd   : > { %5844 = vmatpush.bf16.msra.mxu0 %v7456_v21  ;;  %v7464_v58 = vld [vmem:[%s9649_s4 + $0x220] sm:$0xff] }
 0x3be   : > { %v4447_v40 = vadd.f32 %v4379_v59, %v4149_v42  ;;  %6142 = vmatpush.bf16.msra.mxu1 %v7464_v58  ;;  %v7437_v42 = vld [vmem:[%s9649_s4 + $0x148] sm:$0xff] }
 0x3c0   : > { %v9053_v15 = vpop.f32.mrf.mxu1  ;;  %v9058_v55 = vadd.f32 %v4677_v54, %v4447_v40 }
 0x3c1   : > { %5845 = vmatpush.bf16.msra.mxu0 %v7455_v16 }
 0x3c2   : > { %v4381_v63 = vpop.f32.mrf.mxu3 }
 0x3c3   : > { %v4083_v18 = vpop.f32.mrf.mxu2  ;;  %v4682_v26 = vpop.f32.mrf.mxu0 }
 0x3c4   : > { %v4150_v41 = vadd.f32 %v4083_v18, %v8873_v39  ;;  %v7439_v39 = vld [vmem:[%s9649_s4 + $0x158] sm:$0xff]  ;;  %v4233_v18 = vld [vmem:[#allocation3 + $0x152] sm:$0xff] }
 0x3c5   : > { %5248 = vmatpush.bf16.msra.mxu2 %v7439_v39  ;;  %5846 = vmatpush.bf16.msra.mxu0 %v7454_v7 }
 0x3c6   : > { %v4448_v28 = vadd.f32 %v4381_v63, %v4150_v41  ;;  %4721 = vmatmul.bf16.gmra.mxu0 %v8929_v32  ;;  %v7447_v32 = vld [vmem:[%s9649_s4 + $0x198] sm:$0xff]  ;;  %v4234_v63 = vld [vmem:[#allocation3 + $0x15a] sm:$0xff]  ;;  %v7436_v41 = vld [vmem:[%s9649_s4 + $0x140] sm:$0xff] }
 0x3c7   : > { %4423 = vmatmul.bf16.gmra.mxu3 %v4282_v30  ;;  %v4283_v30 = vpack.c.bf16 %v4234_v63, %v4233_v18  ;;  %v4813_v18 = vld [vmem:[#allocation3 + $0xa9] sm:$0xff] }
 0x3c8   : > { %v9068_v46 = vpop.f32.mrf.mxu1  ;;  %4125 = vmatmul.bf16.gmra.mxu2 %v3984_v56  ;;  %v9079_v19 = vadd.f32 %v4679_v8, %v4448_v28  ;;  %5547 = vmatpush.bf16.msra.mxu3 %v7447_v32  ;;  %v7445_v8 = vld [vmem:[%s9649_s4 + $0x188] sm:$0xff] }
 0x3c9   : > { %5249 = vmatpush.bf16.msra.mxu2 %v7438_v27 }
 0x3ca   : > { %v4384_v56 = vpop.f32.mrf.mxu3 }
 0x3cb   : > { %v4086_v24 = vpop.f32.mrf.mxu2  ;;  %4974 = vmatmul.bf16.gmra.mxu1 %v9081_v4  ;;  %v4684_v6 = vpop.f32.mrf.mxu0 }
 0x3cc   : > { %v4151_v54 = vadd.f32 %v4086_v24, %v8885_v53  ;;  %5548 = vmatpush.bf16.msra.mxu3 %v7446_v43  ;;  %v7453_v53 = vld [vmem:[%s9649_s4 + $0x1c8] sm:$0xff]  ;;  %v4533_v43 = vld [vmem:[#allocation3 + $0x180] sm:$0xff] }
 0x3cd   : > { %5847 = vmatpush.bf16.msra.mxu0 %v7453_v53  ;;  %5250 = vmatpush.bf16.msra.mxu2 %v7437_v42  ;;  %v4582_v42 = vpack.c.bf16 %v4534_v36, %v4533_v43  ;;  %v4816_v43 = vld [vmem:[#allocation3 + $0xc9] sm:$0xff] }
 0x3ce   : > { %v4449_v60 = vadd.f32 %v4384_v56, %v4151_v54 }
 0x3d0   : > { %v9100_v59 = vpop.f32.mrf.mxu1  ;;  %v9108_v40 = vadd.f32 %v4682_v26, %v4449_v60  ;;  %5549 = vmatpush.bf16.msra.mxu3 %v7445_v8  ;;  %v7444_v26 = vld [vmem:[%s9649_s4 + $0x180] sm:$0xff] }
 0x3d1   : > { %5848 = vmatpush.bf16.msra.mxu0 %v7452_v10  ;;  %5251 = vmatpush.bf16.msra.mxu2 %v7436_v41  ;;  %v4236_v60 = vld [vmem:[#allocation3 + $0x172] sm:$0xff] }
 0x3d2   : > { %v4386_v21 = vpop.f32.mrf.mxu3 }
 0x3d3   : > { %v4088_v37 = vpop.f32.mrf.mxu2  ;;  %v4687_v51 = vpop.f32.mrf.mxu0 }
 0x3d4   : > { %v4152_v38 = vadd.f32 %v4088_v37, %v8902_v2  ;;  %5550 = vmatpush.bf16.msra.mxu3 %v7444_v26  ;;  %v4811_v2 = vld [vmem:[#allocation3 + $0x91] sm:$0xff] }
 0x3d5   : > { %v9128_v39 = vpack.c.bf16 %v4812_v22, %v4811_v2 }
 0x3d6   : > { %v4450_v28 = vadd.f32 %v4386_v21, %v4152_v38  ;;  %4726 = vmatmul.bf16.gmra.mxu0 %v8955_v5  ;;  %v9684_v21 = vpack.c.bf16 %v8938_v61, %v8918_v9 }
 0x3d7   : > { %4428 = vmatmul.bf16.gmra.mxu3 %v4283_v30  ;;  %v7463_v30 = vld [vmem:[%s9649_s4 + $0x218] sm:$0xff] }
 0x3d8   : > { %v9121_v16 = vpop.f32.mrf.mxu1  ;;  %4130 = vmatmul.bf16.gmra.mxu2 %v3985_v20  ;;  %v9126_v12 = vadd.f32 %v4684_v6, %v4450_v28  ;;  %v4235_v6 = vld [vmem:[#allocation3 + $0x16a] sm:$0xff]  ;;  %6143 = vmatpush.bf16.msra.mxu1 %v7463_v30 }
 0x3d9   : > { %v4284_v10 = vpack.c.bf16 %v4236_v60, %v4235_v6  ;;  %v4815_v60 = vld [vmem:[#allocation3 + $0xc1] sm:$0xff] }
 0x3da   : > { %v4389_v7 = vpop.f32.mrf.mxu3 }
 0x3db   : > { %v4091_v32 = vpop.f32.mrf.mxu2  ;;  %4979 = vmatmul.bf16.gmra.mxu1 %v9128_v39  ;;  %v4689_v24 = vpop.f32.mrf.mxu0 }
 0x3dc   : > { %v4153_v5 = vadd.f32 %v4091_v32, %v8920_v48  ;;  %v4814_v48 = vld [vmem:[#allocation3 + $0xb1] sm:$0xff]  ;;  %v5099_v32 = vld [vmem:[#allocation3 + $0x1a] sm:$0xff] }
 0x3dd   : > { %v9144_v38 = vpack.c.bf16 %v4814_v48, %v4813_v18 }
 0x3de   : > { %v4451_v56 = vadd.f32 %v4389_v7, %v4153_v5  ;;  %v5100_v7 = vld [vmem:[#allocation3 + $0x22] sm:$0xff]  ;;  %v5399_v5 = vld [vmem:[#allocation3 + $0x38] sm:$0xff] }
 0x3e0   : > { %v9132_v54 = vpop.f32.mrf.mxu1  ;;  %v9134_v27 = vadd.f32 %v4687_v51, %v4451_v56 }
 0x3e2   : > { %v4391_v20 = vpop.f32.mrf.mxu3 }
 0x3e3   : > { %v4093_v25 = vpop.f32.mrf.mxu2  ;;  %v4692_v53 = vpop.f32.mrf.mxu0 }
 0x3e4   : > { %v4154_v58 = vadd.f32 %v4093_v25, %v8940_v52  ;;  %v5163_v25 = vpack.c.bf16 %v5100_v7, %v5099_v32  ;;  %v4818_v7 = vld [vmem:[#allocation3 + $0xe1] sm:$0xff] }
 0x3e6   : > { %v4452_v8 = vadd.f32 %v4391_v20, %v4154_v58  ;;  %4731 = vmatmul.bf16.gmra.mxu0 %v4582_v42 }
 0x3e7   : > { %4433 = vmatmul.bf16.gmra.mxu3 %v4284_v10 }
 0x3e8   : > { %v9137_v37 = vpop.f32.mrf.mxu1  ;;  %4135 = vmatmul.bf16.gmra.mxu2 %v9684_v21  ;;  %v9142_v63 = vadd.f32 %v4689_v24, %v4452_v8 }
 0x3ea   : > { %v4394_v52 = vpop.f32.mrf.mxu3 }
 0x3eb   : > { %v4096_v51 = vpop.f32.mrf.mxu2  ;;  %4984 = vmatmul.bf16.gmra.mxu1 %v9144_v38  ;;  %v4694_v26 = vpop.f32.mrf.mxu0 }
 0x3ec   : > { %v4155_v41 = vadd.f32 %v4096_v51, %v8950_v3  ;;  %v5398_v3 = vld [vmem:[#allocation3 + $0x30] sm:$0xff] }
 0x3ed   : > { %v5462_v20 = vpack.c.bf16 %v5399_v5, %v5398_v3 }
 0x3ee   : > { %v4453_v28 = vadd.f32 %v4394_v52, %v4155_v41  ;;  %v5101_v52 = vld [vmem:[#allocation3 + $0x32] sm:$0xff]  ;;  %v5102_v41 = vld [vmem:[#allocation3 + $0x3a] sm:$0xff] }
 0x3ef   : > { %v9171_v32 = vpack.c.bf16 %v5102_v41, %v5101_v52  ;;  %v5402_v41 = vld [vmem:[#allocation3 + $0x60] sm:$0xff] }
 0x3f0   : > { %v9151_v9 = vpop.f32.mrf.mxu1  ;;  %v9153_v61 = vadd.f32 %v4692_v53, %v4453_v28  ;;  %v9161_v53 = vpack.c.bf16 %v4816_v43, %v4815_v60  ;;  %v7462_v60 = vld [vmem:[%s9649_s4 + $0x210] sm:$0xff] }
 0x3f1   : > { %6144 = vmatpush.bf16.msra.mxu1 %v7462_v60 }
 0x3f2   : > { %v4396_v2 = vpop.f32.mrf.mxu3 }
 0x3f3   : > { %v4098_v22 = vpop.f32.mrf.mxu2  ;;  %v4697_v56 = vpop.f32.mrf.mxu0 }
 0x3f4   : > { %v4156_v24 = vadd.f32 %v4098_v22, %v8964_v50  ;;  %v5400_v22 = vld [vmem:[#allocation3 + $0x48] sm:$0xff] }
 0x3f6   : > { %v4454_v36 = vadd.f32 %v4396_v2, %v4156_v24  ;;  %5849 = vmatmul.bf16.vlgmr.msra.gmra.mxu0 %v9000_v0  ;;  %v4817_v24 = vld [vmem:[#allocation3 + $0xd9] sm:$0xff] }
 0x3f7   : > { %5551 = vmatmul.bf16.vlgmr.msra.gmra.mxu3 %v5462_v20 }
 0x3f8   : > { %v9157_v6 = vpop.f32.mrf.mxu1  ;;  %5252 = vmatmul.bf16.vlgmr.msra.gmra.mxu2 %v5163_v25  ;;  %v9159_v58 = vadd.f32 %v4694_v26, %v4454_v36  ;;  %v5401_v26 = vld [vmem:[#allocation3 + $0x50] sm:$0xff] }
 0x3fa   : > { %v4399_v8 = vpop.f32.mrf.mxu3 }
 0x3fb   : > { %v4101_v42 = vpop.f32.mrf.mxu2  ;;  %4989 = vmatmul.bf16.gmra.mxu1 %v9161_v53  ;;  %v4699_v10 = vpop.f32.mrf.mxu0 }
 0x3fc   : > { %v4157_v50 = vadd.f32 %v4101_v42, %v8973_v47  ;;  %v5463_v47 = vpack.c.bf16 %v5401_v26, %v5400_v22 }
 0x3fe   : > { %v4455_v0 = vadd.f32 %v4399_v8, %v4157_v50 }
 0x400   : > { %v9165_v48 = vpop.f32.mrf.mxu1  ;;  %v9167_v21 = vadd.f32 %v4697_v56, %v4455_v0  ;;  %v5103_v0 = vld [vmem:[#allocation3 + $0x4a] sm:$0xff] }
 0x402   : > { %v4401_v51 = vpop.f32.mrf.mxu3 }
 0x403   : > { %v4103_v18 = vpop.f32.mrf.mxu2  ;;  %v4702_v30 = vpop.f32.mrf.mxu0 }
 0x404   : > { %v4158_v28 = vadd.f32 %v4103_v18, %v8987_v44  ;;  %v9179_v44 = vpack.c.bf16 %v4818_v7, %v4817_v24  ;;  %v5104_v18 = vld [vmem:[#allocation3 + $0x52] sm:$0xff] }
 0x406   : > { %v4456_v2 = vadd.f32 %v4401_v51, %v4158_v28  ;;  %5854 = vmatmul.bf16.gmra.mxu0 %v9026_v34  ;;  %v5403_v51 = vld [vmem:[#allocation3 + $0x68] sm:$0xff]  ;;  %v9193_v28 = vpack.c.bf16 %v5104_v18, %v5103_v0 }
 0x407   : > { %5556 = vmatmul.bf16.gmra.mxu3 %v5463_v47  ;;  %v5464_v22 = vpack.c.bf16 %v5403_v51, %v5402_v41  ;;  %v5404_v51 = vld [vmem:[#allocation3 + $0x78] sm:$0xff] }
 0x408   : > { %v4955_v5 = vpop.f32.mrf.mxu1  ;;  %5257 = vmatmul.bf16.gmra.mxu2 %v9171_v32  ;;  %v9174_v56 = vadd.f32 %v4699_v10, %v4456_v2 }
 0x409   : > { %v9177_v3 = vadd.f32 %v4955_v5, %v8969_v1 }
 0x40a   : > { %v4404_v25 = vpop.f32.mrf.mxu3 }
 0x40b   : > { %v4106_v36 = vpop.f32.mrf.mxu2  ;;  %4994 = vmatmul.bf16.gmra.mxu1 %v9179_v44  ;;  %v4704_v20 = vpop.f32.mrf.mxu0 }
 0x40c   : > { %v4159_v34 = vadd.f32 %v4106_v36, %v8993_v29 }
 0x40e   : > { %v4457_v43 = vadd.f32 %v4404_v25, %v4159_v34 }
 0x410   : > { %v4957_v42 = vpop.f32.mrf.mxu1  ;;  %v9186_v8 = vadd.f32 %v4702_v30, %v4457_v43  ;;  %v4820_v30 = vld [vmem:[#allocation3 + $0xf9] sm:$0xff] }
 0x411   : > { %v9189_v1 = vadd.f32 %v4957_v42, %v8981_v49  ;;  %v4819_v49 = vld [vmem:[#allocation3 + $0xf1] sm:$0xff] }
 0x412   : > { %v4406_v10 = vpop.f32.mrf.mxu3 }
 0x413   : > { %v4108_v50 = vpop.f32.mrf.mxu2  ;;  %v4707_v52 = vpop.f32.mrf.mxu0 }
 0x414   : > { %v4160_v29 = vadd.f32 %v4108_v50, %v9007_v35  ;;  %v9201_v35 = vpack.c.bf16 %v4820_v30, %v4819_v49  ;;  %v5106_v50 = vld [vmem:[#allocation3 + $0x6a] sm:$0xff] }
 0x416   : > { %v4458_v26 = vadd.f32 %v4406_v10, %v4160_v29  ;;  %5859 = vmatmul.bf16.gmra.mxu0 %v9046_v57  ;;  %v5405_v10 = vld [vmem:[#allocation3 + $0x80] sm:$0xff] }
 0x417   : > { %5561 = vmatmul.bf16.gmra.mxu3 %v5464_v22  ;;  %v5465_v41 = vpack.c.bf16 %v5405_v10, %v5404_v51 }
 0x418   : > { %v4960_v2 = vpop.f32.mrf.mxu1  ;;  %5262 = vmatmul.bf16.gmra.mxu2 %v9193_v28  ;;  %v9196_v47 = vadd.f32 %v4704_v20, %v4458_v26 }
 0x419   : > { %v9199_v7 = vadd.f32 %v4960_v2, %v8989_v33  ;;  %v5105_v33 = vld [vmem:[#allocation3 + $0x62] sm:$0xff] }
 0x41a   : > { %v4409_v24 = vpop.f32.mrf.mxu3 }
 0x41b   : > { %v4111_v5 = vpop.f32.mrf.mxu2  ;;  %4999 = vmatmul.bf16.gmra.mxu1 %v9201_v35  ;;  %v4709_v36 = vpop.f32.mrf.mxu0 }
 0x41c   : > { %v4161_v57 = vadd.f32 %v4111_v5, %v9016_v23  ;;  %v9212_v23 = vpack.c.bf16 %v5106_v50, %v5105_v33  ;;  %v5108_v33 = vld [vmem:[#allocation3 + $0x82] sm:$0xff]  ;;  %v5407_v50 = vld [vmem:[#allocation3 + $0x98] sm:$0xff] }
 0x41e   : > { %v4459_v25 = vadd.f32 %v4409_v24, %v4161_v57  ;;  %v7461_v57 = vld [vmem:[%s9649_s4 + $0x208] sm:$0xff] }
 0x41f   : > { %6145 = vmatpush.bf16.msra.mxu1 %v7461_v57 }
 0x420   : > { %v4962_v34 = vpop.f32.mrf.mxu1  ;;  %v9205_v43 = vadd.f32 %v4707_v52, %v4459_v25  ;;  %v4822_v52 = vld [vmem:[#allocation3 + $0x111] sm:$0xff] }
 0x421   : > { %v9208_v60 = vadd.f32 %v4962_v34, %v8998_v14  ;;  %v4821_v14 = vld [vmem:[#allocation3 + $0x109] sm:$0xff] }
 0x422   : > { %v4411_v42 = vpop.f32.mrf.mxu3 }
 0x423   : > { %v4113_v20 = vpop.f32.mrf.mxu2  ;;  %v4712_v18 = vpop.f32.mrf.mxu0 }
 0x424   : > { %v4162_v0 = vadd.f32 %v4113_v20, %v9033_v62  ;;  %v9220_v62 = vpack.c.bf16 %v4822_v52, %v4821_v14 }
 0x426   : > { %v4460_v29 = vadd.f32 %v4411_v42, %v4162_v0  ;;  %5864 = vmatmul.bf16.gmra.mxu0 %v9081_v4  ;;  %v5107_v42 = vld [vmem:[#allocation3 + $0x7a] sm:$0xff]  ;;  %v5406_v0 = vld [vmem:[#allocation3 + $0x90] sm:$0xff] }
 0x427   : > { %5566 = vmatmul.bf16.gmra.mxu3 %v5465_v41  ;;  %v5466_v41 = vpack.c.bf16 %v5407_v50, %v5406_v0  ;;  %v5408_v0 = vld [vmem:[#allocation3 + $0xa8] sm:$0xff] }
 0x428   : > { %v4965_v26 = vpop.f32.mrf.mxu1  ;;  %5267 = vmatmul.bf16.gmra.mxu2 %v9212_v23  ;;  %v9215_v22 = vadd.f32 %v4709_v36, %v4460_v29  ;;  %v9234_v29 = vpack.c.bf16 %v5108_v33, %v5107_v42  ;;  %v5110_v42 = vld [vmem:[#allocation3 + $0x9a] sm:$0xff]  ;;  %v5409_v33 = vld [vmem:[#allocation3 + $0xb0] sm:$0xff] }
 0x429   : > { %v9218_v30 = vadd.f32 %v4965_v26, %v9012_v11 }
 0x42a   : > { %v4414_v49 = vpop.f32.mrf.mxu3 }
 0x42b   : > { %v4116_v2 = vpop.f32.mrf.mxu2  ;;  %5004 = vmatmul.bf16.gmra.mxu1 %v9220_v62  ;;  %v4714_v5 = vpop.f32.mrf.mxu0 }
 0x42c   : > { %v4163_v4 = vadd.f32 %v4116_v2, %v9039_v31 }
 0x42e   : > { %v4461_v24 = vadd.f32 %v4414_v49, %v4163_v4 }
 0x430   : > { %v4967_v25 = vpop.f32.mrf.mxu1  ;;  %v9227_v36 = vadd.f32 %v4712_v18, %v4461_v24  ;;  %v4824_v18 = vld [vmem:[#allocation3 + $0x129] sm:$0xff] }
 0x431   : > { %v9230_v11 = vadd.f32 %v4967_v25, %v9024_v17  ;;  %v4823_v17 = vld [vmem:[#allocation3 + $0x121] sm:$0xff] }
 0x432   : > { %v4416_v20 = vpop.f32.mrf.mxu3 }
 0x433   : > { %v4118_v34 = vpop.f32.mrf.mxu2  ;;  %v4717_v10 = vpop.f32.mrf.mxu0 }
 0x434   : > { %v4164_v31 = vadd.f32 %v4118_v34, %v9053_v15  ;;  %v9242_v15 = vpack.c.bf16 %v4824_v18, %v4823_v17 }
 0x436   : > { %v4462_v51 = vadd.f32 %v4416_v20, %v4164_v31  ;;  %5869 = vmatmul.bf16.gmra.mxu0 %v9128_v39 }
 0x437   : > { %5571 = vmatmul.bf16.gmra.mxu3 %v5466_v41  ;;  %v5467_v41 = vpack.c.bf16 %v5409_v33, %v5408_v0  ;;  %v5112_v33 = vld [vmem:[#allocation3 + $0xb2] sm:$0xff] }
 0x438   : > { %v4970_v52 = vpop.f32.mrf.mxu1  ;;  %5272 = vmatmul.bf16.gmra.mxu2 %v9234_v29  ;;  %v9237_v26 = vadd.f32 %v4714_v5, %v4462_v51 }
 0x439   : > { %v9240_v14 = vadd.f32 %v4970_v52, %v9035_v13  ;;  %v5109_v13 = vld [vmem:[#allocation3 + $0x92] sm:$0xff] }
 0x43a   : > { %v4419_v49 = vpop.f32.mrf.mxu3 }
 0x43b   : > { %v4121_v2 = vpop.f32.mrf.mxu2  ;;  %5009 = vmatmul.bf16.gmra.mxu1 %v9242_v15  ;;  %v4719_v4 = vpop.f32.mrf.mxu0 }
 0x43c   : > { %v4165_v39 = vadd.f32 %v4121_v2, %v9068_v46  ;;  %v9253_v46 = vpack.c.bf16 %v5110_v42, %v5109_v13  ;;  %v5111_v42 = vld [vmem:[#allocation3 + $0xaa] sm:$0xff] }
 0x43e   : > { %v4463_v24 = vadd.f32 %v4419_v49, %v4165_v39 }
 0x440   : > { %v4972_v57 = vpop.f32.mrf.mxu1  ;;  %v9246_v25 = vadd.f32 %v4717_v10, %v4463_v24  ;;  %v4826_v10 = vld [vmem:[#allocation3 + $0x141] sm:$0xff] }
 0x441   : > { %v9249_v34 = vadd.f32 %v4972_v57, %v9044_v45  ;;  %v4825_v45 = vld [vmem:[#allocation3 + $0x139] sm:$0xff]  ;;  %v7460_v57 = vld [vmem:[%s9649_s4 + $0x200] sm:$0xff] }
 0x442   : > { %v4421_v20 = vpop.f32.mrf.mxu3  ;;  %6146 = vmatpush.bf16.msra.mxu1 %v7460_v57 }
 0x443   : > { %v4123_v5 = vpop.f32.mrf.mxu2  ;;  %v4722_v31 = vpop.f32.mrf.mxu0 }
 0x444   : > { %v4166_v50 = vadd.f32 %v4123_v5, %v9100_v59  ;;  %v9261_v59 = vpack.c.bf16 %v4826_v10, %v4825_v45  ;;  %v9275_v10 = vpack.c.bf16 %v5112_v33, %v5111_v42 }
 0x446   : > { %v4464_v51 = vadd.f32 %v4421_v20, %v4166_v50  ;;  %5874 = vmatmul.bf16.gmra.mxu0 %v9144_v38  ;;  %v5411_v50 = vld [vmem:[#allocation3 + $0xc8] sm:$0xff] }
 0x447   : > { %5576 = vmatmul.bf16.gmra.mxu3 %v5467_v41 }
 0x448   : > { %v4975_v18 = vpop.f32.mrf.mxu1  ;;  %5277 = vmatmul.bf16.gmra.mxu2 %v9253_v46  ;;  %v9256_v52 = vadd.f32 %v4719_v4, %v4464_v51  ;;  %v5410_v51 = vld [vmem:[#allocation3 + $0xc0] sm:$0xff] }
 0x449   : > { %v9259_v17 = vadd.f32 %v4975_v18, %v9058_v55  ;;  %v5468_v18 = vpack.c.bf16 %v5411_v50, %v5410_v51  ;;  %v5114_v50 = vld [vmem:[#allocation3 + $0xca] sm:$0xff] }
 0x44a   : > { %v4424_v49 = vpop.f32.mrf.mxu3 }
 0x44b   : > { %v4126_v2 = vpop.f32.mrf.mxu2  ;;  %5014 = vmatmul.bf16.gmra.mxu1 %v9261_v59  ;;  %v4724_v39 = vpop.f32.mrf.mxu0 }
 0x44c   : > { %v4167_v38 = vadd.f32 %v4126_v2, %v9121_v16 }
 0x44e   : > { %v4465_v24 = vadd.f32 %v4424_v49, %v4167_v38 }
 0x450   : > { %v4977_v5 = vpop.f32.mrf.mxu1  ;;  %v9268_v4 = vadd.f32 %v4722_v31, %v4465_v24  ;;  %v4828_v31 = vld [vmem:[#allocation3 + $0x159] sm:$0xff] }
 0x451   : > { %v9271_v55 = vadd.f32 %v4977_v5, %v9079_v19  ;;  %v4827_v19 = vld [vmem:[#allocation3 + $0x151] sm:$0xff] }
 0x452   : > { %v4426_v13 = vpop.f32.mrf.mxu3 }
 0x453   : > { %v4128_v20 = vpop.f32.mrf.mxu2  ;;  %v4727_v0 = vpop.f32.mrf.mxu0 }
 0x454   : > { %v4168_v16 = vadd.f32 %v4128_v20, %v9132_v54  ;;  %v9283_v54 = vpack.c.bf16 %v4828_v31, %v4827_v19 }
 0x456   : > { %v4466_v41 = vadd.f32 %v4426_v13, %v4168_v16  ;;  %5879 = vmatmul.bf16.gmra.mxu0 %v9161_v53  ;;  %v5413_v16 = vld [vmem:[#allocation3 + $0xe0] sm:$0xff] }
 0x457   : > { %5581 = vmatmul.bf16.gmra.mxu3 %v5468_v18  ;;  %v5412_v18 = vld [vmem:[#allocation3 + $0xd8] sm:$0xff] }
 0x458   : > { %v4980_v45 = vpop.f32.mrf.mxu1  ;;  %5282 = vmatmul.bf16.gmra.mxu2 %v9275_v10  ;;  %v9278_v2 = vadd.f32 %v4724_v39, %v4466_v41 }
 0x459   : > { %v9281_v49 = vadd.f32 %v4980_v45, %v9108_v40  ;;  %v5113_v40 = vld [vmem:[#allocation3 + $0xc2] sm:$0xff]  ;;  %v5469_v45 = vpack.c.bf16 %v5413_v16, %v5412_v18  ;;  %v5415_v18 = vld [vmem:[#allocation3 + $0xf8] sm:$0xff] }
 0x45a   : > { %v4429_v24 = vpop.f32.mrf.mxu3 }
 0x45b   : > { %v4131_v38 = vpop.f32.mrf.mxu2  ;;  %5019 = vmatmul.bf16.gmra.mxu1 %v9283_v54  ;;  %v4729_v57 = vpop.f32.mrf.mxu0 }
 0x45c   : > { %v4169_v53 = vadd.f32 %v4131_v38, %v9137_v37  ;;  %v9294_v37 = vpack.c.bf16 %v5114_v50, %v5113_v40 }
 0x45e   : > { %v4467_v5 = vadd.f32 %v4429_v24, %v4169_v53 }
 0x460   : > { %v4982_v20 = vpop.f32.mrf.mxu1  ;;  %v9287_v13 = vadd.f32 %v4727_v0, %v4467_v5  ;;  %v4830_v0 = vld [vmem:[#allocation3 + $0x171] sm:$0xff] }
 0x461   : > { %v9290_v42 = vadd.f32 %v4982_v20, %v9126_v12  ;;  %v4829_v12 = vld [vmem:[#allocation3 + $0x169] sm:$0xff] }
 0x462   : > { %v4431_v33 = vpop.f32.mrf.mxu3 }
 0x463   : > { %v4133_v39 = vpop.f32.mrf.mxu2  ;;  %v4732_v41 = vpop.f32.mrf.mxu0 }
 0x464   : > { %v4170_v51 = vadd.f32 %v4133_v39, %v9151_v9  ;;  %v9302_v9 = vpack.c.bf16 %v4830_v0, %v4829_v12  ;;  %v5414_v0 = vld [vmem:[#allocation3 + $0xf0] sm:$0xff] }
 0x465   : > { %v5470_v12 = vpack.c.bf16 %v5415_v18, %v5414_v0  ;;  %v5118_v0 = vld [vmem:[#allocation3 + $0xfa] sm:$0xff] }
 0x466   : > { %v4468_v31 = vadd.f32 %v4431_v33, %v4170_v51  ;;  %5884 = vmatmul.bf16.gmra.mxu0 %v9179_v44  ;;  %v5116_v51 = vld [vmem:[#allocation3 + $0xe2] sm:$0xff] }
 0x467   : > { %5586 = vmatmul.bf16.gmra.mxu3 %v5469_v45 }
 0x468   : > { %v4985_v19 = vpop.f32.mrf.mxu1  ;;  %5287 = vmatmul.bf16.gmra.mxu2 %v9294_v37  ;;  %v9297_v38 = vadd.f32 %v4729_v57, %v4468_v31 }
 0x469   : > { %v9300_v24 = vadd.f32 %v4985_v19, %v9134_v27  ;;  %v5115_v27 = vld [vmem:[#allocation3 + $0xda] sm:$0xff] }
 0x46a   : > { %v4434_v5 = vpop.f32.mrf.mxu3 }
 0x46b   : > { %v4136_v53 = vpop.f32.mrf.mxu2  ;;  %5024 = vmatmul.bf16.gmra.mxu1 %v9302_v9  ;;  %v4734_v20 = vpop.f32.mrf.mxu0 }
 0x46c   : > { %v4171_v44 = vadd.f32 %v4136_v53, %v9157_v6  ;;  %v9313_v6 = vpack.c.bf16 %v5116_v51, %v5115_v27 }
 0x46e   : > { %v4469_v39 = vadd.f32 %v4434_v5, %v4171_v44 }
 0x470   : > { %v4987_v33 = vpop.f32.mrf.mxu1  ;;  %v9306_v40 = vadd.f32 %v4732_v41, %v4469_v39  ;;  %v4832_v41 = vld [vmem:[#allocation3 + $0x189] sm:$0xff] }
 0x471   : > { %v9309_v50 = vadd.f32 %v4987_v33, %v9142_v63  ;;  %v4831_v63 = vld [vmem:[#allocation3 + $0x181] sm:$0xff] }
 0x472   : > { %v4436_v16 = vpop.f32.mrf.mxu3 }
 0x473   : > { %v4138_v57 = vpop.f32.mrf.mxu2  ;;  %v5850_v45 = vpop.f32.mrf.mxu0 }
 0x474   : > { %v4172_v31 = vadd.f32 %v4138_v57, %v9165_v48  ;;  %v9321_v48 = vpack.c.bf16 %v4832_v41, %v4831_v63 }
 0x476   : > { %v4470_v19 = vadd.f32 %v4436_v16, %v4172_v31  ;;  %5889 = vmatmul.bf16.gmra.mxu0 %v9201_v35 }
 0x477   : > { %5591 = vmatmul.bf16.gmra.mxu3 %v5470_v12 }
 0x478   : > { %v4990_v53 = vpop.f32.mrf.mxu1  ;;  %5292 = vmatmul.bf16.gmra.mxu2 %v9313_v6  ;;  %v9316_v5 = vadd.f32 %v4734_v20, %v4470_v19  ;;  %v5417_v19 = vld [vmem:[#allocation3 + $0x110] sm:$0xff] }
 0x479   : > { %v9319_v44 = vadd.f32 %v4990_v53, %v9153_v61  ;;  %v5117_v61 = vld [vmem:[#allocation3 + $0xf2] sm:$0xff]  ;;  %v5416_v53 = vld [vmem:[#allocation3 + $0x108] sm:$0xff] }
 0x47a   : > { %v5552_v35 = vpop.f32.mrf.mxu3 }
 0x47b   : > { %5029 = vmatmul.bf16.gmra.mxu1 %v9321_v48  ;;  %v5253_v39 = vpop.f32.mrf.mxu2  ;;  %v5852_v57 = vpop.f32.mrf.mxu0 }
 0x47c   : > { %v5333_v33 = vadd.f32 %v5253_v39, %v9177_v3  ;;  %v9332_v3 = vpack.c.bf16 %v5118_v0, %v5117_v61  ;;  %v5471_v39 = vpack.c.bf16 %v5417_v19, %v5416_v53  ;;  %v5119_v19 = vld [vmem:[#allocation3 + $0x10a] sm:$0xff] }
 0x47e   : > { %v5632_v16 = vadd.f32 %v5552_v35, %v5333_v33 }
 0x480   : > { %v4992_v27 = vpop.f32.mrf.mxu1  ;;  %v9325_v51 = vadd.f32 %v5850_v45, %v5632_v16 }
 0x481   : > { %v9328_v18 = vadd.f32 %v4992_v27, %v9159_v58 }
 0x482   : > { %v5554_v31 = vpop.f32.mrf.mxu3 }
 0x483   : > { %v5255_v20 = vpop.f32.mrf.mxu2  ;;  %v5855_v41 = vpop.f32.mrf.mxu0 }
 0x484   : > { %v5334_v12 = vadd.f32 %v5255_v20, %v9189_v1 }
 0x486   : > { %v5633_v63 = vadd.f32 %v5554_v31, %v5334_v12  ;;  %5894 = vmatmul.bf16.gmra.mxu0 %v9220_v62  ;;  %v5120_v12 = vld [vmem:[#allocation3 + $0x112] sm:$0xff] }
 0x487   : > { %5596 = vmatmul.bf16.gmra.mxu3 %v5471_v39 }
 0x488   : > { %v4995_v45 = vpop.f32.mrf.mxu1  ;;  %5297 = vmatmul.bf16.gmra.mxu2 %v9332_v3  ;;  %v9335_v58 = vadd.f32 %v5852_v57, %v5633_v63  ;;  %v5418_v63 = vld [vmem:[#allocation3 + $0x120] sm:$0xff] }
 0x489   : > { %v9338_v35 = vadd.f32 %v4995_v45, %v9167_v21  ;;  %v5419_v21 = vld [vmem:[#allocation3 + $0x128] sm:$0xff] }
 0x48a   : > { %v5557_v16 = vpop.f32.mrf.mxu3 }
 0x48b   : > { %v5258_v33 = vpop.f32.mrf.mxu2  ;;  %6147 = vmatmul.bf16.vlgmr.msra.gmra.mxu1 %v9171_v32  ;;  %v5857_v62 = vpop.f32.mrf.mxu0  ;;  %v9349_v32 = vpack.c.bf16 %v5120_v12, %v5119_v19  ;;  %v5121_v12 = vld [vmem:[#allocation3 + $0x122] sm:$0xff] }
 0x48c   : > { %v5335_v1 = vadd.f32 %v5258_v33, %v9199_v7  ;;  %v5472_v7 = vpack.c.bf16 %v5419_v21, %v5418_v63  ;;  %v5122_v21 = vld [vmem:[#allocation3 + $0x12a] sm:$0xff]  ;;  %v5420_v63 = vld [vmem:[#allocation3 + $0x138] sm:$0xff] }
 0x48e   : > { %v5634_v27 = vadd.f32 %v5557_v16, %v5335_v1 }
 0x490   : > { %v4997_v20 = vpop.f32.mrf.mxu1  ;;  %v9342_v31 = vadd.f32 %v5855_v41, %v5634_v27 }
 0x491   : > { %v9345_v61 = vadd.f32 %v4997_v20, %v9174_v56 }
 0x492   : > { %v5559_v57 = vpop.f32.mrf.mxu3 }
 0x493   : > { %v5260_v0 = vpop.f32.mrf.mxu2  ;;  %v5860_v45 = vpop.f32.mrf.mxu0 }
 0x494   : > { %v5336_v53 = vadd.f32 %v5260_v0, %v9208_v60 }
 0x496   : > { %v5635_v39 = vadd.f32 %v5559_v57, %v5336_v53  ;;  %5899 = vmatmul.bf16.gmra.mxu0 %v9242_v15 }
 0x497   : > { %5601 = vmatmul.bf16.gmra.mxu3 %v5472_v7 }
 0x498   : > { %v5000_v41 = vpop.f32.mrf.mxu1  ;;  %5302 = vmatmul.bf16.gmra.mxu2 %v9349_v32  ;;  %v9352_v56 = vadd.f32 %v5857_v62, %v5635_v39 }
 0x499   : > { %v9355_v33 = vadd.f32 %v5000_v41, %v9186_v8  ;;  %v5421_v8 = vld [vmem:[#allocation3 + $0x140] sm:$0xff] }
 0x49a   : > { %v5562_v1 = vpop.f32.mrf.mxu3 }
 0x49b   : > { %v5263_v16 = vpop.f32.mrf.mxu2  ;;  %6152 = vmatmul.bf16.gmra.mxu1 %v9193_v28  ;;  %v5862_v57 = vpop.f32.mrf.mxu0  ;;  %v9366_v28 = vpack.c.bf16 %v5122_v21, %v5121_v12  ;;  %v5423_v12 = vld [vmem:[#allocation3 + $0x158] sm:$0xff] }
 0x49c   : > { %v5337_v60 = vadd.f32 %v5263_v16, %v9218_v30  ;;  %v5473_v30 = vpack.c.bf16 %v5421_v8, %v5420_v63  ;;  %v5422_v8 = vld [vmem:[#allocation3 + $0x150] sm:$0xff] }
 0x49e   : > { %v5636_v15 = vadd.f32 %v5562_v1, %v5337_v60 }
 0x4a0   : > { %v5002_v27 = vpop.f32.mrf.mxu1  ;;  %v9359_v20 = vadd.f32 %v5860_v45, %v5636_v15 }
 0x4a1   : > { %v9362_v0 = vadd.f32 %v5002_v27, %v9196_v47 }
 0x4a2   : > { %v5564_v62 = vpop.f32.mrf.mxu3 }
 0x4a3   : > { %v5265_v19 = vpop.f32.mrf.mxu2  ;;  %v5865_v1 = vpop.f32.mrf.mxu0 }
 0x4a4   : > { %v5338_v53 = vadd.f32 %v5265_v19, %v9230_v11 }
 0x4a6   : > { %v5637_v39 = vadd.f32 %v5564_v62, %v5338_v53  ;;  %5904 = vmatmul.bf16.gmra.mxu0 %v9261_v59  ;;  %v5124_v62 = vld [vmem:[#allocation3 + $0x142] sm:$0xff] }
 0x4a7   : > { %5606 = vmatmul.bf16.gmra.mxu3 %v5473_v30 }
 0x4a8   : > { %v5005_v7 = vpop.f32.mrf.mxu1  ;;  %5307 = vmatmul.bf16.gmra.mxu2 %v9366_v28  ;;  %v9369_v47 = vadd.f32 %v5862_v57, %v5637_v39  ;;  %v5123_v57 = vld [vmem:[#allocation3 + $0x13a] sm:$0xff] }
 0x4a9   : > { %v9372_v45 = vadd.f32 %v5005_v7, %v9205_v43 }
 0x4aa   : > { %v5567_v16 = vpop.f32.mrf.mxu3 }
 0x4ab   : > { %v5268_v41 = vpop.f32.mrf.mxu2  ;;  %6157 = vmatmul.bf16.gmra.mxu1 %v9212_v23  ;;  %v9383_v23 = vpack.c.bf16 %v5124_v62, %v5123_v57  ;;  %v5867_v63 = vpop.f32.mrf.mxu0  ;;  %v5128_v57 = vld [vmem:[#allocation3 + $0x172] sm:$0xff]  ;;  %v5427_v62 = vld [vmem:[#allocation3 + $0x188] sm:$0xff] }
 0x4ac   : > { %v5339_v11 = vadd.f32 %v5268_v41, %v9240_v14  ;;  %v5474_v14 = vpack.c.bf16 %v5423_v12, %v5422_v8  ;;  %v5126_v41 = vld [vmem:[#allocation3 + $0x15a] sm:$0xff] }
 0x4ae   : > { %v5638_v59 = vadd.f32 %v5567_v16, %v5339_v11  ;;  %v5425_v16 = vld [vmem:[#allocation3 + $0x170] sm:$0xff]  ;;  %v5424_v11 = vld [vmem:[#allocation3 + $0x168] sm:$0xff] }
 0x4b0   : > { %v5007_v60 = vpop.f32.mrf.mxu1  ;;  %v9376_v15 = vadd.f32 %v5865_v1, %v5638_v59  ;;  %v5475_v59 = vpack.c.bf16 %v5425_v16, %v5424_v11 }
 0x4b1   : > { %v9379_v27 = vadd.f32 %v5007_v60, %v9215_v22 }
 0x4b2   : > { %v5569_v21 = vpop.f32.mrf.mxu3 }
 0x4b3   : > { %v5270_v19 = vpop.f32.mrf.mxu2 }
 0x4b4   : > { %v5340_v43 = vadd.f32 %v5270_v19, %v9249_v34  ;;  %v5127_v19 = vld [vmem:[#allocation3 + $0x16a] sm:$0xff] }
 0x4b5   : > { %v9407_v12 = vpack.c.bf16 %v5128_v57, %v5127_v19 }
 0x4b6   : > { %v5639_v53 = vadd.f32 %v5569_v21, %v5340_v43  ;;  %5909 = vmatmul.bf16.gmra.mxu0 %v9283_v54  ;;  %v5125_v54 = vld [vmem:[#allocation3 + $0x152] sm:$0xff] }
 0x4b7   : > { %5611 = vmatmul.bf16.gmra.mxu3 %v5474_v14  ;;  %v9396_v1 = vpack.c.bf16 %v5126_v41, %v5125_v54 }
 0x4b8   : > { %v5010_v39 = vpop.f32.mrf.mxu1  ;;  %5312 = vmatmul.bf16.gmra.mxu2 %v9383_v23  ;;  %v9386_v22 = vadd.f32 %v5867_v63, %v5639_v53  ;;  %v5130_v63 = vld [vmem:[#allocation3 + $0x18a] sm:$0xff] }
 0x4b9   : > { %v9389_v30 = vadd.f32 %v5010_v39, %v9227_v36  ;;  %v7571_v39 = vld [vmem:[#allocation3] sm:$0xff] }
 0x4bb   : > { %6162 = vmatmul.bf16.gmra.mxu1 %v9234_v29 }
 0x4c0   : > { %v5012_v34 = vpop.f32.mrf.mxu1 }
 0x4c1   : > { %v9393_v7 = vadd.f32 %v5012_v34, %v9237_v26  ;;  %v5477_v34 = vpack.c.bf16 %v7571_v39, %v7571_v39 }
 0x4c6   : > { %5914 = vmatmul.bf16.gmra.mxu0 %v9302_v9  ;;  %v5426_v9 = vld [vmem:[#allocation3 + $0x180] sm:$0xff] }
 0x4c7   : > { %5616 = vmatmul.bf16.gmra.mxu3 %v5475_v59  ;;  %v5476_v43 = vpack.c.bf16 %v5427_v62, %v5426_v9  ;;  %v9459_v9 = vpop.f32.mrf.mxu3 }
 0x4c8   : > { %v5015_v60 = vpop.f32.mrf.mxu1  ;;  %5317 = vmatmul.bf16.gmra.mxu2 %v9396_v1 }
 0x4c9   : > { %v9400_v36 = vadd.f32 %v5015_v60, %v9246_v25 }
 0x4cb   : > { %6167 = vmatmul.bf16.gmra.mxu1 %v9253_v46  ;;  %v5726_v46 = vld [vmem:[#allocation3 + $0x199] sm:$0xff] }
 0x4cf   : > { %v9471_v39 = vpop.f32.mrf.mxu3 }
 0x4d0   : > { %v5017_v29 = vpop.f32.mrf.mxu1 }
 0x4d1   : > { %v9404_v26 = vadd.f32 %v5017_v29, %v9256_v52  ;;  %v5727_v52 = vld [vmem:[#allocation3 + $0x1a1] sm:$0xff] }
 0x4d2   : > { %v5775_v14 = vpack.c.bf16 %v5727_v52, %v5726_v46 }
 0x4d6   : > { %5919 = vmatmul.bf16.gmra.mxu0 %v9321_v48  ;;  %v5129_v48 = vld [vmem:[#allocation3 + $0x182] sm:$0xff] }
 0x4d7   : > { %5621 = vmatmul.bf16.gmra.mxu3 %v5476_v43  ;;  %v9417_v54 = vpack.c.bf16 %v5130_v63, %v5129_v48 }
 0x4d8   : > { %v5020_v21 = vpop.f32.mrf.mxu1  ;;  %5322 = vmatmul.bf16.gmra.mxu2 %v9407_v12 }
 0x4d9   : > { %v9411_v25 = vadd.f32 %v5020_v21, %v9268_v4  ;;  %v9462_v21 = vpop.f32.mrf.mxu0 }
 0x4db   : > { %6172 = vmatmul.bf16.gmra.mxu1 %v9275_v10 }
 0x4e0   : > { %v5022_v8 = vpop.f32.mrf.mxu1 }
 0x4e1   : > { %v9415_v53 = vadd.f32 %v5022_v8, %v9278_v2 }
 0x4e6   : > { %5924 = vmatmul.bf16.gmra.mxu0 %v5775_v14 }
 0x4e7   : > { %5626 = vmatmul.bf16.gmra.mxu3 %v5477_v34 }
 0x4e8   : > { %v5025_v41 = vpop.f32.mrf.mxu1  ;;  %5327 = vmatmul.bf16.gmra.mxu2 %v9417_v54 }
 0x4e9   : > { %v9421_v4 = vadd.f32 %v5025_v41, %v9287_v13  ;;  %v9437_v13 = vld [vmem:[%s9650_s5] ss:$0 sm:$0xff] }
 0x4eb   : > { %6177 = vmatmul.bf16.gmra.mxu1 %v9294_v37 }
 0x4f0   : > { %v5027_v10 = vpop.f32.mrf.mxu1 }
 0x4f1   : > { %v9425_v2 = vadd.f32 %v5027_v10, %v9297_v38  ;;  %v9443_v38 = vld [vmem:[%s9651_s6] ss:$0 sm:$0xff]  ;;  %v9473_v10 = vpop.f32.mrf.mxu0 }
 0x4f8   : > { %v5030_v16 = vpop.f32.mrf.mxu1 }
 0x4f9   : > { %v9428_v11 = vadd.f32 %v5030_v16, %v9306_v40 }
 0x4fb   : > { %6182 = vmatmul.bf16.gmra.mxu1 %v9313_v6 }
 0x500   : > { %v5032_v59 = vpop.f32.mrf.mxu1 }
 0x501   : > { %v9432_v60 = vadd.f32 %v5032_v59, %v9316_v5  ;;  %v9449_v5 = vpop.f32.mrf.mxu2 }
 0x508   : > { %v6148_v37 = vpop.f32.mrf.mxu1 }
 0x509   : > { %v6228_v29 = vadd.f32 %v6148_v37, %v9325_v51  ;;  %v9464_v52 = vpop.f32.mrf.mxu2 }
 0x50b   : > { %v6328_v40 = vmul.f32 %v9437_v13, %v6228_v29  ;;  %6187 = vmatmul.bf16.gmra.mxu1 %v9332_v3 }
 0x50d   : > { %v6364_v6 = vadd.f32 %v9443_v38, %v6328_v40  ;;  %v9481_v40 = vpop.f32.mrf.mxu3 }
 0x50f   : > { %vm6396_vm2 = vcmp.gt.f32.partialorder %v6364_v6, 0.0  ;;  %v6428_v51 = vmul.f32 0.01, %v6364_v6 }
 0x510   : > { %v6150_v19 = vpop.f32.mrf.mxu1 }
 0x511   : > { %v6460_v57 = vsel %vm6396_vm2, %v6364_v6, %v6428_v51  ;;  %v6229_v62 = vadd.f32 %v6150_v19, %v9335_v58  ;;  %v9476_v37 = vpop.f32.mrf.mxu2 }
 0x512   : > { %6492 = vst [vmem:[%s9454_s9] sm:$0xff] %v6460_v57  ;;  %v9485_v57 = vpop.f32.mrf.mxu0 }
 0x513   : > { %v6329_v3 = vmul.f32 %v9437_v13, %v6229_v62 }
 0x515   : > { %v6365_v43 = vadd.f32 %v9443_v38, %v6329_v3 }
 0x517   : > { %vm6397_vm3 = vcmp.gt.f32.partialorder %v6365_v43, 0.0  ;;  %v6429_v46 = vmul.f32 0.01, %v6365_v43 }
 0x518   : > { %v6153_v8 = vpop.f32.mrf.mxu1 }
 0x519   : > { %v6461_v14 = vsel %vm6397_vm3, %v6365_v43, %v6429_v46  ;;  %v6230_v48 = vadd.f32 %v6153_v8, %v9342_v31  ;;  %v9489_v62 = vpop.f32.mrf.mxu2 }
 0x51a   : > { %6493 = vst [vmem:[%s9454_s9 + $0x8] sm:$0xff] %v6461_v14 }
 0x51b   : > { %v6330_v58 = vmul.f32 %v9437_v13, %v6230_v48  ;;  %6192 = vmatmul.bf16.gmra.mxu1 %v9349_v32  ;;  %v9493_v48 = vpop.f32.mrf.mxu3 }
 0x51d   : > { %v6366_v63 = vadd.f32 %v9443_v38, %v6330_v58  ;;  %v9497_v58 = vpop.f32.mrf.mxu0 }
 0x51f   : > { %vm6398_vm4 = vcmp.gt.f32.partialorder %v6366_v63, 0.0  ;;  %v6430_v34 = vmul.f32 0.01, %v6366_v63 }
 0x520   : > { %v6155_v41 = vpop.f32.mrf.mxu1 }
 0x521   : > { %v6462_v16 = vsel %vm6398_vm4, %v6366_v63, %v6430_v34  ;;  %v6231_v59 = vadd.f32 %v6155_v41, %v9352_v56  ;;  %v9500_v63 = vpop.f32.mrf.mxu2 }
 0x522   : > { %6494 = vst [vmem:[%s9454_s9 + $0x10] sm:$0xff] %v6462_v16 }
 0x523   : > { %v6331_v31 = vmul.f32 %v9437_v13, %v6231_v59 }
 0x525   : > { %v6367_v32 = vadd.f32 %v9443_v38, %v6331_v31  ;;  %v9506_v31 = vpop.f32.mrf.mxu3 }
 0x527   : > { %vm6399_vm5 = vcmp.gt.f32.partialorder %v6367_v32, 0.0  ;;  %v6431_v29 = vmul.f32 0.01, %v6367_v32 }
 0x528   : > { %v6158_v6 = vpop.f32.mrf.mxu1 }
 0x529   : > { %v6463_v51 = vsel %vm6399_vm5, %v6367_v32, %v6431_v29  ;;  %v6232_v19 = vadd.f32 %v6158_v6, %v9359_v20  ;;  %v5341_v29 = vadd.f32 %v9449_v5, %v9259_v17  ;;  %v9511_v6 = vpop.f32.mrf.mxu0  ;;  %v5342_v17 = vadd.f32 %v9464_v52, %v9271_v55 }
 0x52a   : > { %6495 = vst [vmem:[%s9454_s9 + $0x18] sm:$0xff] %v6463_v51  ;;  %v5343_v52 = vadd.f32 %v9476_v37, %v9281_v49  ;;  %v5344_v49 = vadd.f32 %v9489_v62, %v9290_v42 }
 0x52b   : > { %v6332_v56 = vmul.f32 %v9437_v13, %v6232_v19  ;;  %6197 = vmatmul.bf16.gmra.mxu1 %v9366_v28  ;;  %v9513_v19 = vpop.f32.mrf.mxu2 }
 0x52d   : > { %v6368_v3 = vadd.f32 %v9443_v38, %v6332_v56 }
 0x52f   : > { %vm6400_vm6 = vcmp.gt.f32.partialorder %v6368_v3, 0.0  ;;  %v6432_v43 = vmul.f32 0.01, %v6368_v3 }
 0x530   : > { %v6160_v46 = vpop.f32.mrf.mxu1 }
 0x531   : > { %v6464_v8 = vsel %vm6400_vm6, %v6368_v3, %v6432_v43  ;;  %v6233_v14 = vadd.f32 %v6160_v46, %v9369_v47 }
 0x532   : > { %6496 = vst [vmem:[%s9454_s9 + $0x20] sm:$0xff] %v6464_v8  ;;  %v9520_v8 = vpop.f32.mrf.mxu3 }
 0x533   : > { %v6333_v20 = vmul.f32 %v9437_v13, %v6233_v14 }
 0x535   : > { %v6369_v28 = vadd.f32 %v9443_v38, %v6333_v20 }
 0x537   : > { %vm6401_vm7 = vcmp.gt.f32.partialorder %v6369_v28, 0.0  ;;  %v6433_v34 = vmul.f32 0.01, %v6369_v28 }
 0x538   : > { %v6163_v41 = vpop.f32.mrf.mxu1 }
 0x539   : > { %v6465_v16 = vsel %vm6401_vm7, %v6369_v28, %v6433_v34  ;;  %v6234_v59 = vadd.f32 %v6163_v41, %v9376_v15  ;;  %v9525_v28 = vpop.f32.mrf.mxu0  ;;  %v5641_v41 = vadd.f32 %v9471_v39, %v5342_v17  ;;  %v5642_v39 = vadd.f32 %v9481_v40, %v5343_v52 }
 0x53a   : > { %6497 = vst [vmem:[%s9454_s9 + $0x28] sm:$0xff] %v6465_v16  ;;  %v5643_v40 = vadd.f32 %v9493_v48, %v5344_v49 }
 0x53b   : > { %v6334_v47 = vmul.f32 %v9437_v13, %v6234_v59  ;;  %6202 = vmatmul.bf16.gmra.mxu1 %v9383_v23  ;;  %v5640_v23 = vadd.f32 %v9459_v9, %v5341_v29  ;;  %v5288_v9 = vpop.f32.mrf.mxu2  ;;  %v5939_v59 = vadd.f32 %v9473_v10, %v5641_v41  ;;  %v5940_v10 = vadd.f32 %v9485_v57, %v5642_v39 }
 0x53c   : > { %v5345_v57 = vadd.f32 %v9500_v63, %v9300_v24 }
 0x53d   : > { %v6370_v32 = vadd.f32 %v9443_v38, %v6334_v47  ;;  %v5938_v14 = vadd.f32 %v9462_v21, %v5640_v23  ;;  %v5587_v47 = vpop.f32.mrf.mxu3 }
 0x53f   : > { %vm6402_vm8 = vcmp.gt.f32.partialorder %v6370_v32, 0.0  ;;  %v6434_v51 = vmul.f32 0.01, %v6370_v32 }
 0x540   : > { %v6165_v56 = vpop.f32.mrf.mxu1 }
 0x541   : > { %v6466_v15 = vsel %vm6402_vm8, %v6370_v32, %v6434_v51  ;;  %v6235_v3 = vadd.f32 %v6165_v56, %v9386_v22  ;;  %v5885_v56 = vpop.f32.mrf.mxu0 }
 0x542   : > { %6498 = vst [vmem:[%s9454_s9 + $0x30] sm:$0xff] %v6466_v15 }
 0x543   : > { %v6335_v43 = vmul.f32 %v9437_v13, %v6235_v3  ;;  %v5290_v15 = vpop.f32.mrf.mxu2 }
 0x545   : > { %v6371_v46 = vadd.f32 %v9443_v38, %v6335_v43  ;;  %v5589_v17 = vpop.f32.mrf.mxu3 }
 0x547   : > { %vm6403_vm9 = vcmp.gt.f32.partialorder %v6371_v46, 0.0  ;;  %v6435_v5 = vmul.f32 0.01, %v6371_v46 }
 0x548   : > { %v6168_v20 = vpop.f32.mrf.mxu1 }
 0x549   : > { %v6467_v22 = vsel %vm6403_vm9, %v6371_v46, %v6435_v5  ;;  %v6236_v34 = vadd.f32 %v6168_v20, %v5938_v14  ;;  %v9546_v14 = vpop.f32.mrf.mxu0 }
 0x54a   : > { %6499 = vst [vmem:[%s9454_s9 + $0x38] sm:$0xff] %v6467_v22  ;;  %v5941_v22 = vadd.f32 %v9497_v58, %v5643_v40  ;;  %v6025_v40 = vld [vmem:[#allocation3 + $0x1a2] sm:$0xff] }
 0x54b   : > { %v6336_v16 = vmul.f32 %v9437_v13, %v6236_v34  ;;  %6207 = vmatmul.bf16.gmra.mxu1 %v9396_v1  ;;  %v5293_v62 = vpop.f32.mrf.mxu2 }
 0x54d   : > { %v6372_v55 = vadd.f32 %v9443_v38, %v6336_v16  ;;  %v5644_v16 = vadd.f32 %v9506_v31, %v5345_v57 }
 0x54f   : > { %vm6404_vm10 = vcmp.gt.f32.partialorder %v6372_v55, 0.0  ;;  %v6436_v21 = vmul.f32 0.01, %v6372_v55  ;;  %v5942_v58 = vadd.f32 %v9511_v6, %v5644_v16 }
 0x550   : > { %v6170_v32 = vpop.f32.mrf.mxu1 }
 0x551   : > { %v6468_v29 = vsel %vm6404_vm10, %v6372_v55, %v6436_v21  ;;  %v6237_v51 = vadd.f32 %v6170_v32, %v5939_v59  ;;  %v5592_v55 = vpop.f32.mrf.mxu3  ;;  %v5346_v21 = vadd.f32 %v9513_v19, %v9309_v50  ;;  %v5890_v24 = vpop.f32.mrf.mxu0  ;;  %v5347_v50 = vadd.f32 %v5288_v9, %v9319_v44 }
 0x552   : > { %6500 = vst [vmem:[%s9454_s9 + $0x40] sm:$0xff] %v6468_v29  ;;  %v5348_v9 = vadd.f32 %v5290_v15, %v9328_v18 }
 0x553   : > { %v6337_v1 = vmul.f32 %v9437_v13, %v6237_v51  ;;  %v5295_v59 = vpop.f32.mrf.mxu2  ;;  %v5645_v31 = vadd.f32 %v9520_v8, %v5346_v21 }
 0x555   : > { %v6373_v3 = vadd.f32 %v9443_v38, %v6337_v1  ;;  %v5943_v6 = vadd.f32 %v9525_v28, %v5645_v31 }
 0x557   : > { %vm6405_vm11 = vcmp.gt.f32.partialorder %v6373_v3, 0.0  ;;  %v6437_v37 = vmul.f32 0.01, %v6373_v3 }
 0x558   : > { %v6173_v23 = vpop.f32.mrf.mxu1 }
 0x559   : > { %v6469_v43 = vsel %vm6405_vm11, %v6373_v3, %v6437_v37  ;;  %v6238_v46 = vadd.f32 %v6173_v23, %v5940_v10  ;;  %v5594_v19 = vpop.f32.mrf.mxu3  ;;  %v5892_v37 = vpop.f32.mrf.mxu0 }
 0x55a   : > { %6501 = vst [vmem:[%s9454_s9 + $0x48] sm:$0xff] %v6469_v43  ;;  %v5646_v43 = vadd.f32 %v5587_v47, %v5347_v50  ;;  %v5647_v47 = vadd.f32 %v5589_v17, %v5348_v9 }
 0x55b   : > { %v6338_v5 = vmul.f32 %v9437_v13, %v6238_v46  ;;  %6212 = vmatmul.bf16.gmra.mxu1 %v9407_v12  ;;  %v5298_v8 = vpop.f32.mrf.mxu2 }
 0x55c   : > { %v5944_v44 = vadd.f32 %v5885_v56, %v5646_v43  ;;  %v5349_v56 = vadd.f32 %v5293_v62, %v9338_v35  ;;  %v5945_v15 = vadd.f32 %v9546_v14, %v5647_v47 }
 0x55d   : > { %v6374_v42 = vadd.f32 %v9443_v38, %v6338_v5 }
 0x55e   : > { %v5648_v17 = vadd.f32 %v5592_v55, %v5349_v56 }
 0x55f   : > { %vm6406_vm12 = vcmp.gt.f32.partialorder %v6374_v42, 0.0  ;;  %v6438_v20 = vmul.f32 0.01, %v6374_v42 }
 0x560   : > { %v6175_v34 = vpop.f32.mrf.mxu1  ;;  %v5946_v62 = vadd.f32 %v5890_v24, %v5648_v17 }
 0x561   : > { %v6470_v41 = vsel %vm6406_vm12, %v6374_v42, %v6438_v20  ;;  %v6239_v48 = vadd.f32 %v6175_v34, %v5941_v22  ;;  %v5597_v57 = vpop.f32.mrf.mxu3 }
 0x562   : > { %6502 = vst [vmem:[%s9454_s9 + $0x50] sm:$0xff] %v6470_v41  ;;  %v5895_v41 = vpop.f32.mrf.mxu0 }
 0x563   : > { %v6339_v12 = vmul.f32 %v9437_v13, %v6239_v48  ;;  %v5300_v16 = vpop.f32.mrf.mxu2 }
 0x564   : > { %v5352_v9 = vadd.f32 %v5300_v16, %v9362_v0 }
 0x565   : > { %v6375_v52 = vadd.f32 %v9443_v38, %v6339_v12 }
 0x567   : > { %vm6407_vm13 = vcmp.gt.f32.partialorder %v6375_v52, 0.0  ;;  %v6439_v63 = vmul.f32 0.01, %v6375_v52 }
 0x568   : > { %v6178_v32 = vpop.f32.mrf.mxu1 }
 0x569   : > { %v6471_v29 = vsel %vm6407_vm13, %v6375_v52, %v6439_v63  ;;  %v6240_v51 = vadd.f32 %v6178_v32, %v5942_v58  ;;  %v5599_v58 = vpop.f32.mrf.mxu3 }
 0x56a   : > { %6503 = vst [vmem:[%s9454_s9 + $0x58] sm:$0xff] %v6471_v29  ;;  %v5897_v29 = vpop.f32.mrf.mxu0 }
 0x56b   : > { %v6340_v39 = vmul.f32 %v9437_v13, %v6240_v51  ;;  %6217 = vmatmul.bf16.gmra.mxu1 %v9417_v54  ;;  %v6024_v54 = vld [vmem:[#allocation3 + $0x19a] sm:$0xff]  ;;  %v5303_v31 = vpop.f32.mrf.mxu2 }
 0x56c   : > { %v6073_v28 = vpack.c.bf16 %v6025_v40, %v6024_v54 }
 0x56d   : > { %v6376_v1 = vadd.f32 %v9443_v38, %v6340_v39  ;;  %v5350_v39 = vadd.f32 %v5295_v59, %v9345_v61 }
 0x56f   : > { %vm6408_vm14 = vcmp.gt.f32.partialorder %v6376_v1, 0.0  ;;  %v6440_v3 = vmul.f32 0.01, %v6376_v1 }
 0x570   : > { %v6180_v49 = vpop.f32.mrf.mxu1 }
 0x571   : > { %v6472_v10 = vsel %vm6408_vm14, %v6376_v1, %v6440_v3  ;;  %v6241_v23 = vadd.f32 %v6180_v49, %v5943_v6  ;;  %v5649_v3 = vadd.f32 %v5594_v19, %v5350_v39  ;;  %v5602_v55 = vpop.f32.mrf.mxu3 }
 0x572   : > { %6504 = vst [vmem:[%s9454_s9 + $0x60] sm:$0xff] %v6472_v10  ;;  %v5351_v10 = vadd.f32 %v5298_v8, %v9355_v33 }
 0x573   : > { %v6341_v46 = vmul.f32 %v9437_v13, %v6241_v23  ;;  %v5900_v23 = vpop.f32.mrf.mxu0  ;;  %v5947_v61 = vadd.f32 %v5892_v37, %v5649_v3  ;;  %v5305_v59 = vpop.f32.mrf.mxu2 }
 0x574   : > { %v5650_v40 = vadd.f32 %v5597_v57, %v5351_v10  ;;  %v5354_v17 = vadd.f32 %v5305_v59, %v9379_v27 }
 0x575   : > { %v6377_v5 = vadd.f32 %v9443_v38, %v6341_v46 }
 0x576   : > { %v5948_v8 = vadd.f32 %v5895_v41, %v5650_v40 }
 0x577   : > { %vm6409_vm15 = vcmp.gt.f32.partialorder %v6377_v5, 0.0  ;;  %v6441_v42 = vmul.f32 0.01, %v6377_v5 }
 0x578   : > { %v6183_v20 = vpop.f32.mrf.mxu1 }
 0x579   : > { %v6473_v22 = vsel %vm6409_vm15, %v6377_v5, %v6441_v42  ;;  %v6242_v34 = vadd.f32 %v6183_v20, %v5944_v44  ;;  %v5604_v44 = vpop.f32.mrf.mxu3 }
 0x57a   : > { %6505 = vst [vmem:[%s9454_s9 + $0x68] sm:$0xff] %v6473_v22 }
 0x57b   : > { %v6342_v48 = vmul.f32 %v9437_v13, %v6242_v34  ;;  %6222 = vmatmul.bf16.gmra.mxu1 %v6073_v28  ;;  %v5902_v28 = vpop.f32.mrf.mxu0  ;;  %v5308_v22 = vpop.f32.mrf.mxu2  ;;  %v5651_v34 = vadd.f32 %v5599_v58, %v5352_v9 }
 0x57c   : > { %v5355_v3 = vadd.f32 %v5308_v22, %v9389_v30 }
 0x57d   : > { %v6378_v12 = vadd.f32 %v9443_v38, %v6342_v48  ;;  %v5353_v48 = vadd.f32 %v5303_v31, %v9372_v45  ;;  %v5949_v0 = vadd.f32 %v5897_v29, %v5651_v34 }
 0x57f   : > { %vm6410_vm0 = vcmp.gt.f32.partialorder %v6378_v12, 0.0  ;;  %v6442_v18 = vmul.f32 0.01, %v6378_v12 }
 0x580   : > { %v6185_v52 = vpop.f32.mrf.mxu1 }
 0x581   : > { %v6474_v21 = vsel %vm6410_vm0, %v6378_v12, %v6442_v18  ;;  %v6243_v63 = vadd.f32 %v6185_v52, %v5945_v15  ;;  %v5607_v16 = vpop.f32.mrf.mxu3  ;;  %v5652_v15 = vadd.f32 %v5602_v55, %v5353_v48 }
 0x582   : > { %6506 = vst [vmem:[%s9454_s9 + $0x70] sm:$0xff] %v6474_v21 }
 0x583   : > { %v6343_v32 = vmul.f32 %v9437_v13, %v6243_v63  ;;  %v5905_v52 = vpop.f32.mrf.mxu0  ;;  %v5310_v63 = vpop.f32.mrf.mxu2 }
 0x585   : > { %v6379_v51 = vadd.f32 %v9443_v38, %v6343_v32  ;;  %v5950_v32 = vadd.f32 %v5900_v23, %v5652_v15  ;;  %v5654_v23 = vadd.f32 %v5607_v16, %v5355_v3 }
 0x587   : > { %vm6411_vm1 = vcmp.gt.f32.partialorder %v6379_v51, 0.0  ;;  %v6443_v35 = vmul.f32 0.01, %v6379_v51  ;;  %v5952_v30 = vadd.f32 %v5905_v52, %v5654_v23 }
 0x588   : > { %v6188_v1 = vpop.f32.mrf.mxu1 }
 0x589   : > { %v6475_v14 = vsel %vm6411_vm1, %v6379_v51, %v6443_v35  ;;  %v6244_v50 = vadd.f32 %v6188_v1, %v5946_v62  ;;  %v5609_v39 = vpop.f32.mrf.mxu3  ;;  %v5653_v35 = vadd.f32 %v5604_v44, %v5354_v17 }
 0x58a   : > { %6507 = vst [vmem:[%s9454_s9 + $0x78] sm:$0xff] %v6475_v14 }
 0x58b   : > { %v6344_v6 = vmul.f32 %v9437_v13, %v6244_v50  ;;  %v5907_v1 = vpop.f32.mrf.mxu0  ;;  %v5313_v50 = vpop.f32.mrf.mxu2 }
 0x58d   : > { %v6380_v49 = vadd.f32 %v9443_v38, %v6344_v6  ;;  %v5951_v6 = vadd.f32 %v5902_v28, %v5653_v35  ;;  %v5357_v28 = vadd.f32 %v5313_v50, %v9400_v36 }
 0x58f   : > { %vm6412_vm2 = vcmp.gt.f32.partialorder %v6380_v49, 0.0  ;;  %v6444_v43 = vmul.f32 0.01, %v6380_v49 }
 0x590   : > { %v6190_v46 = vpop.f32.mrf.mxu1 }
 0x591   : > { %v6476_v24 = vsel %vm6412_vm2, %v6380_v49, %v6444_v43  ;;  %v6245_v54 = vadd.f32 %v6190_v46, %v5947_v61  ;;  %v5612_v61 = vpop.f32.mrf.mxu3  ;;  %v5356_v46 = vadd.f32 %v5310_v63, %v9393_v7 }
 0x592   : > { %6508 = vst [vmem:[%s9454_s9 + $0x80] sm:$0xff] %v6476_v24  ;;  %v5656_v48 = vadd.f32 %v5612_v61, %v5357_v28 }
 0x593   : > { %v6345_v19 = vmul.f32 %v9437_v13, %v6245_v54  ;;  %v5910_v24 = vpop.f32.mrf.mxu0  ;;  %v5315_v40 = vpop.f32.mrf.mxu2  ;;  %v5655_v9 = vadd.f32 %v5609_v39, %v5356_v46 }
 0x594   : > { %v5358_v16 = vadd.f32 %v5315_v40, %v9404_v26  ;;  %v5954_v36 = vadd.f32 %v5910_v24, %v5656_v48 }
 0x595   : > { %v6381_v5 = vadd.f32 %v9443_v38, %v6345_v19 }
 0x597   : > { %vm6413_vm3 = vcmp.gt.f32.partialorder %v6381_v5, 0.0  ;;  %v6445_v33 = vmul.f32 0.01, %v6381_v5 }
 0x598   : > { %v6193_v42 = vpop.f32.mrf.mxu1 }
 0x599   : > { %v6477_v37 = vsel %vm6413_vm3, %v6381_v5, %v6445_v33  ;;  %v6246_v20 = vadd.f32 %v6193_v42, %v5948_v8  ;;  %v5614_v42 = vpop.f32.mrf.mxu3 }
 0x59a   : > { %6509 = vst [vmem:[%s9454_s9 + $0x88] sm:$0xff] %v6477_v37  ;;  %v5953_v37 = vadd.f32 %v5907_v1, %v5655_v9 }
 0x59b   : > { %v6346_v57 = vmul.f32 %v9437_v13, %v6246_v20  ;;  %v5912_v22 = vpop.f32.mrf.mxu0 }
 0x59d   : > { %v6382_v47 = vadd.f32 %v9443_v38, %v6346_v57 }
 0x59f   : > { %vm6414_vm4 = vcmp.gt.f32.partialorder %v6382_v47, 0.0  ;;  %v6446_v12 = vmul.f32 0.01, %v6382_v47 }
 0x5a0   : > { %v6195_v56 = vpop.f32.mrf.mxu1 }
 0x5a1   : > { %v6478_v41 = vsel %vm6414_vm4, %v6382_v47, %v6446_v12  ;;  %v6247_v18 = vadd.f32 %v6195_v56, %v5949_v0  ;;  %v5318_v47 = vpop.f32.mrf.mxu2 }
 0x5a2   : > { %6510 = vst [vmem:[%s9454_s9 + $0x90] sm:$0xff] %v6478_v41  ;;  %v5617_v41 = vpop.f32.mrf.mxu3 }
 0x5a3   : > { %v6347_v21 = vmul.f32 %v9437_v13, %v6247_v18  ;;  %v5915_v63 = vpop.f32.mrf.mxu0 }
 0x5a5   : > { %v6383_v58 = vadd.f32 %v9443_v38, %v6347_v21  ;;  %v5657_v21 = vadd.f32 %v5614_v42, %v5358_v16 }
 0x5a7   : > { %vm6415_vm5 = vcmp.gt.f32.partialorder %v6383_v58, 0.0  ;;  %v6447_v45 = vmul.f32 0.01, %v6383_v58 }
 0x5a8   : > { %v6198_v51 = vpop.f32.mrf.mxu1 }
 0x5a9   : > { %v6479_v29 = vsel %vm6415_vm5, %v6383_v58, %v6447_v45  ;;  %v6248_v31 = vadd.f32 %v6198_v51, %v5950_v32  ;;  %v5320_v17 = vpop.f32.mrf.mxu2  ;;  %v5359_v32 = vadd.f32 %v5318_v47, %v9411_v25  ;;  %v5955_v51 = vadd.f32 %v5912_v22, %v5657_v21 }
 0x5aa   : > { %6511 = vst [vmem:[%s9454_s9 + $0x98] sm:$0xff] %v6479_v29  ;;  %v5619_v35 = vpop.f32.mrf.mxu3 }
 0x5ab   : > { %v6348_v62 = vmul.f32 %v9437_v13, %v6248_v31 }
 0x5ad   : > { %v6384_v14 = vadd.f32 %v9443_v38, %v6348_v62  ;;  %v5658_v62 = vadd.f32 %v5617_v41, %v5359_v32 }
 0x5af   : > { %vm6416_vm6 = vcmp.gt.f32.partialorder %v6384_v14, 0.0  ;;  %v6448_v27 = vmul.f32 0.01, %v6384_v14 }
 0x5b0   : > { %v6200_v55 = vpop.f32.mrf.mxu1 }
 0x5b1   : > { %v6480_v49 = vsel %vm6416_vm6, %v6384_v14, %v6448_v27  ;;  %v6249_v10 = vadd.f32 %v6200_v55, %v5951_v6  ;;  %v5917_v14 = vpop.f32.mrf.mxu0  ;;  %v5323_v3 = vpop.f32.mrf.mxu2  ;;  %v5360_v27 = vadd.f32 %v5320_v17, %v9415_v53  ;;  %v5956_v6 = vadd.f32 %v5915_v63, %v5658_v62 }
 0x5b2   : > { %6512 = vst [vmem:[%s9454_s9 + $0xa0] sm:$0xff] %v6480_v49  ;;  %v5622_v61 = vpop.f32.mrf.mxu3  ;;  %v5361_v24 = vadd.f32 %v5323_v3, %v9421_v4 }
 0x5b3   : > { %v6349_v43 = vmul.f32 %v9437_v13, %v6249_v10  ;;  %v5659_v23 = vadd.f32 %v5619_v35, %v5360_v27 }
 0x5b5   : > { %v6385_v59 = vadd.f32 %v9443_v38, %v6349_v43  ;;  %v5957_v53 = vadd.f32 %v5917_v14, %v5659_v23 }
 0x5b7   : > { %vm6417_vm7 = vcmp.gt.f32.partialorder %v6385_v59, 0.0  ;;  %v6449_v54 = vmul.f32 0.01, %v6385_v59 }
 0x5b8   : > { %v6203_v19 = vpop.f32.mrf.mxu1 }
 0x5b9   : > { %v6481_v5 = vsel %vm6417_vm7, %v6385_v59, %v6449_v54  ;;  %v6250_v44 = vadd.f32 %v6203_v19, %v5952_v30  ;;  %v5920_v46 = vpop.f32.mrf.mxu0  ;;  %v5325_v30 = vpop.f32.mrf.mxu2 }
 0x5ba   : > { %6513 = vst [vmem:[%s9454_s9 + $0xa8] sm:$0xff] %v6481_v5  ;;  %v5362_v42 = vadd.f32 %v5325_v30, %v9425_v2 }
 0x5bb   : > { %v6350_v33 = vmul.f32 %v9437_v13, %v6250_v44  ;;  %v5660_v44 = vadd.f32 %v5622_v61, %v5361_v24 }
 0x5bd   : > { %v6386_v8 = vadd.f32 %v9443_v38, %v6350_v33  ;;  %v5958_v4 = vadd.f32 %v5920_v46, %v5660_v44 }
 0x5bf   : > { %vm6418_vm8 = vcmp.gt.f32.partialorder %v6386_v8, 0.0  ;;  %v6450_v7 = vmul.f32 0.01, %v6386_v8 }
 0x5c0   : > { %v6205_v20 = vpop.f32.mrf.mxu1 }
 0x5c1   : > { %v6482_v34 = vsel %vm6418_vm8, %v6386_v8, %v6450_v7  ;;  %v6251_v57 = vadd.f32 %v6205_v20, %v5953_v37  ;;  %v5624_v8 = vpop.f32.mrf.mxu3  ;;  %v5922_v22 = vpop.f32.mrf.mxu0 }
 0x5c2   : > { %6514 = vst [vmem:[%s9454_s9 + $0xb0] sm:$0xff] %v6482_v34  ;;  %v5328_v34 = vpop.f32.mrf.mxu2 }
 0x5c3   : > { %v6351_v12 = vmul.f32 %v9437_v13, %v6251_v57  ;;  %v5661_v57 = vadd.f32 %v5624_v8, %v5362_v42 }
 0x5c5   : > { %v6387_v0 = vadd.f32 %v9443_v38, %v6351_v12  ;;  %v5959_v16 = vadd.f32 %v5922_v22, %v5661_v57 }
 0x5c7   : > { %vm6419_vm9 = vcmp.gt.f32.partialorder %v6387_v0, 0.0  ;;  %v6451_v56 = vmul.f32 0.01, %v6387_v0 }
 0x5c8   : > { %v6208_v18 = vpop.f32.mrf.mxu1 }
 0x5c9   : > { %v6483_v15 = vsel %vm6419_vm9, %v6387_v0, %v6451_v56  ;;  %v6252_v52 = vadd.f32 %v6208_v18, %v5954_v36  ;;  %v5627_v12 = vpop.f32.mrf.mxu3  ;;  %v5363_v0 = vadd.f32 %v5328_v34, %v9428_v11  ;;  %v5925_v18 = vpop.f32.mrf.mxu0 }
 0x5ca   : > { %6515 = vst [vmem:[%s9454_s9 + $0xb8] sm:$0xff] %v6483_v15  ;;  %v5330_v21 = vpop.f32.mrf.mxu2 }
 0x5cb   : > { %v6352_v58 = vmul.f32 %v9437_v13, %v6252_v52  ;;  %v5662_v15 = vadd.f32 %v5627_v12, %v5363_v0  ;;  %v5364_v17 = vadd.f32 %v5330_v21, %v9432_v60 }
 0x5cd   : > { %v6388_v45 = vadd.f32 %v9443_v38, %v6352_v58  ;;  %v5960_v58 = vadd.f32 %v5925_v18, %v5662_v15 }
 0x5cf   : > { %vm6420_vm10 = vcmp.gt.f32.partialorder %v6388_v45, 0.0  ;;  %v6452_v26 = vmul.f32 0.01, %v6388_v45 }
 0x5d0   : > { %v6210_v29 = vpop.f32.mrf.mxu1 }
 0x5d1   : > { %v6484_v31 = vsel %vm6420_vm10, %v6388_v45, %v6452_v26  ;;  %v6253_v39 = vadd.f32 %v6210_v29, %v5955_v51  ;;  %v5629_v45 = vpop.f32.mrf.mxu3 }
 0x5d2   : > { %6516 = vst [vmem:[%s9454_s9 + $0xc0] sm:$0xff] %v6484_v31  ;;  %v5663_v29 = vadd.f32 %v5629_v45, %v5364_v17 }
 0x5d3   : > { %v6353_v1 = vmul.f32 %v9437_v13, %v6253_v39  ;;  %v5927_v39 = vpop.f32.mrf.mxu0 }
 0x5d4   : > { %v5961_v62 = vadd.f32 %v5927_v39, %v5663_v29 }
 0x5d5   : > { %v6389_v50 = vadd.f32 %v9443_v38, %v6353_v1 }
 0x5d7   : > { %vm6421_vm11 = vcmp.gt.f32.partialorder %v6389_v50, 0.0  ;;  %v6453_v25 = vmul.f32 0.01, %v6389_v50 }
 0x5d8   : > { %v6213_v55 = vpop.f32.mrf.mxu1 }
 0x5d9   : > { %v6485_v49 = vsel %vm6421_vm11, %v6389_v50, %v6453_v25  ;;  %v6254_v10 = vadd.f32 %v6213_v55, %v5956_v6 }
 0x5da   : > { %6517 = vst [vmem:[%s9454_s9 + $0xc8] sm:$0xff] %v6485_v49 }
 0x5db   : > { %v6354_v43 = vmul.f32 %v9437_v13, %v6254_v10 }
 0x5dd   : > { %v6390_v59 = vadd.f32 %v9443_v38, %v6354_v43 }
 0x5df   : > { %vm6422_vm12 = vcmp.gt.f32.partialorder %v6390_v59, 0.0  ;;  %v6454_v54 = vmul.f32 0.01, %v6390_v59 }
 0x5e0   : > { %v6215_v40 = vpop.f32.mrf.mxu1 }
 0x5e1   : > { %v6486_v19 = vsel %vm6422_vm12, %v6390_v59, %v6454_v54  ;;  %v6255_v5 = vadd.f32 %v6215_v40, %v5957_v53 }
 0x5e2   : > { %6518 = vst [vmem:[%s9454_s9 + $0xd0] sm:$0xff] %v6486_v19 }
 0x5e3   : > { %v6355_v9 = vmul.f32 %v9437_v13, %v6255_v5 }
 0x5e5   : > { %v6391_v33 = vadd.f32 %v9443_v38, %v6355_v9 }
 0x5e7   : > { %vm6423_vm13 = vcmp.gt.f32.partialorder %v6391_v33, 0.0  ;;  %v6455_v28 = vmul.f32 0.01, %v6391_v33 }
 0x5e8   : > { %v6218_v7 = vpop.f32.mrf.mxu1 }
 0x5e9   : > { %v6487_v37 = vsel %vm6423_vm13, %v6391_v33, %v6455_v28  ;;  %v6256_v20 = vadd.f32 %v6218_v7, %v5958_v4 }
 0x5ea   : > { %6519 = vst [vmem:[%s9454_s9 + $0xd8] sm:$0xff] %v6487_v37 }
 0x5eb   : > { %v6356_v47 = vmul.f32 %v9437_v13, %v6256_v20 }
 0x5ed   : > { %v6392_v48 = vadd.f32 %v9443_v38, %v6356_v47 }
 0x5ef   : > { %vm6424_vm14 = vcmp.gt.f32.partialorder %v6392_v48, 0.0  ;;  %v6456_v2 = vmul.f32 0.01, %v6392_v48 }
 0x5f0   : > { %v6220_v56 = vpop.f32.mrf.mxu1 }
 0x5f1   : > { %v6488_v36 = vsel %vm6424_vm14, %v6392_v48, %v6456_v2  ;;  %v6257_v41 = vadd.f32 %v6220_v56, %v5959_v16 }
 0x5f2   : > { %6520 = vst [vmem:[%s9454_s9 + $0xe0] sm:$0xff] %v6488_v36 }
 0x5f3   : > { %v6357_v52 = vmul.f32 %v9437_v13, %v6257_v41 }
 0x5f5   : > { %v6393_v63 = vadd.f32 %v9443_v38, %v6357_v52 }
 0x5f7   : > { %vm6425_vm15 = vcmp.gt.f32.partialorder %v6393_v63, 0.0  ;;  %v6457_v11 = vmul.f32 0.01, %v6393_v63 }
 0x5f8   : > { %v6223_v32 = vpop.f32.mrf.mxu1 }
 0x5f9   : > { %v6489_v26 = vsel %vm6425_vm15, %v6393_v63, %v6457_v11  ;;  %v6258_v51 = vadd.f32 %v6223_v32, %v5960_v58 }
 0x5fa   : > { %6521 = vst [vmem:[%s9454_s9 + $0xe8] sm:$0xff] %v6489_v26 }
 0x5fb   : > { %v6358_v31 = vmul.f32 %v9437_v13, %v6258_v51 }
 0x5fd   : > { %v6394_v35 = vadd.f32 %v9443_v38, %v6358_v31 }
 0x5ff   : > { %vm6426_vm0 = vcmp.gt.f32.partialorder %v6394_v35, 0.0  ;;  %v6458_v1 = vmul.f32 0.01, %v6394_v35 }
 0x600   : > { %v6225_v14 = vpop.f32.mrf.mxu1 }
 0x601   : > { %v6490_v60 = vsel %vm6426_vm0, %v6394_v35, %v6458_v1  ;;  %v6259_v50 = vadd.f32 %v6225_v14, %v5961_v62 }
 0x602   : > { %6522 = vst [vmem:[%s9454_s9 + $0xf0] sm:$0xff] %v6490_v60 }
 0x603   : > { %v6359_v3 = vmul.f32 %v9437_v13, %v6259_v50 }
 0x605   : > { %v6395_v27 = vadd.f32 %v9443_v38, %v6359_v3 }
 0x607   : > { %vm6427_vm1 = vcmp.gt.f32.partialorder %v6395_v27, 0.0  ;;  %v6459_v25 = vmul.f32 0.01, %v6395_v27 }
 0x609   : > { %v6491_v6 = vsel %vm6427_vm1, %v6395_v27, %v6459_v25 }
 0x60a   : > { %6523 = vst [vmem:[%s9454_s9 + $0xf8] sm:$0xff] %v6491_v6 }
 0x60b PF: > { %s17_s24 = sadd.s32 1, %s7578_s24  }
 0x60c   : > { %p14_p4 = scmp.ge.s32.totalorder %s17_s24, 4  }
 0x60e   :  { %16 = sbr.rel (!%p14_p4) target bundleno = 1 (0x1), region = 98 }

</bundles_post_ra>
